<compile_context>
chip_gen: v7x
topology: tpu7x:2x2x1
jax: 0.10.0
libtpu: 0.0.40
codegen_flags: <defaults>
</compile_context>

<pallas_src>
import functools

import jax
import jax.numpy as jnp
from jax import lax
from jax.experimental import pallas as pl
from jax.experimental.pallas import tpu as pltpu


def decoder_kernel(z_ref, p_ref, out_ref, *, H, O, r_bias, r_bout, r_wbd):
    """Batched input projection + unrolled LSTM recurrence + block-diag output matmul.

    z_ref:   (B, T, D)        batch-first input
    p_ref:   (rows, 256)      packed parameter slab:
               rows [0, D)           lanes [0, 4H)     : W_ih^T        (D, 4H)
               rows [0, H)           lanes [4H, 8H)    : W_hh^T        (H, 4H)
               row  r_bias           lanes [0, 4H)     : b_ih + b_hh   (1, 4H)
               row  r_bout           lanes [0, T*O)    : tile(b_out,T) (1, T*O)
               rows [r_wbd, r_wbd+T*H) lanes [0, T*O)  : blockdiag(W_out^T) (T*H, T*O)
    out_ref: (B, T*O)         output, lane-dense (row b = [y_{b,0}, ..., y_{b,T-1}])
    """
    B, T, D = z_ref.shape
    G = 4 * H
    f32 = jnp.float32
    hi = lax.Precision.HIGHEST

    # Static, tile-aligned slices of the single parameter slab (one DMA feeds all).
    wih = p_ref[0:D, 0:G]                       # (D, 4H)
    whh = p_ref[0:H, G:2 * G]                   # (H, 4H)
    b = p_ref[r_bias:r_bias + 1, 0:G]           # (1, 4H)  fused LSTM bias
    bout = p_ref[r_bout:r_bout + 1, 0:T * O]    # (1, T*O) tiled Linear bias
    wbd = p_ref[r_wbd:r_wbd + T * H, 0:T * O]   # (T*H, T*O) block-diagonal Linear weight

    # Input projection for all timesteps at once (bias folded in): one MXU op.
    z_flat = z_ref[...].reshape(B * T, D)                                       # (B*T, D)
    gx_all = jnp.dot(z_flat, wih, preferred_element_type=f32, precision=hi) + b  # (B*T, 4H)
    gx = gx_all.reshape(B, T, G)

    # Serial recurrence, fully unrolled (T is static); h/c stay register-resident.
    h = jnp.zeros((B, H), f32)
    c = jnp.zeros((B, H), f32)
    hs = []
    for t in range(T):
        gates = gx[:, t, :] + jnp.dot(h, whh, preferred_element_type=f32, precision=hi)
        # Full-vreg nonlinearities: 2 EUP pushes per step instead of 4.
        sg = jax.nn.sigmoid(gates)               # (B, 4H)
        tg = jnp.tanh(gates)                     # (B, 4H)
        i_ = sg[:, 0:H]                          # input gate
        f_ = sg[:, H:2 * H]                      # forget gate
        g_ = tg[:, 2 * H:3 * H]                  # cell candidate
        o_ = sg[:, 3 * H:4 * H]                  # output gate
        c = f_ * c + i_ * g_
        h = o_ * jnp.tanh(c)
        hs.append(h)

    # Lane-concatenate hidden states -> (B, T*H), one block-diagonal matmul, one
    # unmasked lane-dense store.
    h_cat = jnp.concatenate(hs, axis=1)                                          # (B, T*H)
    y = jnp.dot(h_cat, wbd, preferred_element_type=f32, precision=hi) + bout     # (B, T*O)
    out_ref[...] = y.astype(out_ref.dtype)


def pack_decoder_params(w_ih, w_hh, b_ih, b_hh, w_out, b_out, seq_len):
    """One-time repack of the PyTorch parameters into a single lane-aligned f32 slab.

    Call this once at parameter-load time; reuse the slab across forward calls.
    """
    GH, D = w_ih.shape            # (4H, latent_size)
    H = w_hh.shape[1]             # hidden_size == out_size
    O = w_out.shape[0]            # out_size
    T = seq_len
    G = 4 * H
    assert GH == G and D == H == O, "Decoder.forward requires latent_size == out_size"

    LW = max(2 * G, T * H, T * O)                 # slab lane width (256 here)
    r_bias = ((max(D, H) + 7) // 8) * 8           # 32   (sublane-tile aligned)
    r_bout = r_bias + 8                           # 40
    r_wbd = r_bout + 8                            # 48
    rows = r_wbd + T * H                          # 304

    wih_t = jnp.transpose(w_ih).astype(jnp.float32)            # (D, 4H)
    whh_t = jnp.transpose(w_hh).astype(jnp.float32)            # (H, 4H)
    b_fused = (b_ih + b_hh).astype(jnp.float32)                # (4H,)
    wout_t = jnp.transpose(w_out).astype(jnp.float32)          # (H, O)
    # Block-diagonal output weight: one (T*H, T*O) matmul replaces T small ones and
    # makes the kernel's output store lane-dense.
    w_bd = jnp.kron(jnp.eye(T, dtype=jnp.float32), wout_t)     # (T*H, T*O)
    bout_tiled = jnp.tile(b_out.astype(jnp.float32), T)        # (T*O,)

    slab = jnp.zeros((rows, LW), jnp.float32)
    slab = slab.at[0:D, 0:G].set(wih_t)
    slab = slab.at[0:H, G:2 * G].set(whh_t)
    slab = slab.at[r_bias, 0:G].set(b_fused)
    slab = slab.at[r_bout, 0:T * O].set(bout_tiled)
    slab = slab.at[r_wbd:r_wbd + T * H, 0:T * O].set(w_bd)

    meta = dict(H=H, O=O, T=T, r_bias=r_bias, r_bout=r_bout, r_wbd=r_wbd)
    return slab, meta


def decoder_forward(z, slab, meta):
    """z: (B, T, latent_size) -> (B, T, out_size). Matches PyTorch Decoder.forward."""
    B, T, D = z.shape
    H, O = meta["H"], meta["O"]
    assert T == meta["T"], "slab was packed for a different sequence length"

    kernel = functools.partial(
        decoder_kernel, H=H, O=O,
        r_bias=meta["r_bias"], r_bout=meta["r_bout"], r_wbd=meta["r_wbd"])

    flops = (2 * B * T * D * 4 * H            # input projection
             + T * 2 * B * H * 4 * H          # recurrence matmuls
             + 2 * B * (T * H) * (T * O))     # block-diagonal output matmul
    transcendentals = T * B * (2 * 4 * H + H)  # sigmoid+tanh on gates, tanh on c
    bytes_accessed = 4 * (z.size + slab.size + B * T * O)

    vmem = pl.BlockSpec(memory_space=pltpu.MemorySpace.VMEM)
    out_flat = pl.pallas_call(
        kernel,
        out_shape=jax.ShapeDtypeStruct((B, T * O), jnp.float32),
        in_specs=[vmem, vmem],
        out_specs=vmem,
        cost_estimate=pl.CostEstimate(
            flops=flops, transcendentals=transcendentals,
            bytes_accessed=bytes_accessed),
    )(z.astype(jnp.float32), slab)

    # Row b of out_flat is [y_{b,0}, ..., y_{b,T-1}] so this reshape is metadata-only.
    return out_flat.reshape(B, T, O)


def reference_forward(z, w_ih, w_hh, b_ih, b_hh, w_out, b_out):
    """Pure-JAX reference mirroring torch.nn.LSTM (batch_first) + Linear."""
    B, T, D = z.shape
    H = w_hh.shape[1]
    hi = lax.Precision.HIGHEST

    def step(carry, x_t):
        h, c = carry
        gates = (jnp.dot(x_t, w_ih.T, precision=hi) + b_ih
                 + jnp.dot(h, w_hh.T, precision=hi) + b_hh)
        i, f, g, o = jnp.split(gates, 4, axis=-1)
        i = jax.nn.sigmoid(i)
        f = jax.nn.sigmoid(f)
        g = jnp.tanh(g)
        o = jax.nn.sigmoid(o)
        c = f * c + i * g
        h = o * jnp.tanh(c)
        return (h, c), h

    h0 = jnp.zeros((B, H), jnp.float32)
    c0 = jnp.zeros((B, H), jnp.float32)
    _, hs = lax.scan(step, (h0, c0), jnp.transpose(z, (1, 0, 2)))
    w = jnp.transpose(hs, (1, 0, 2))                    # (B, T, H)
    return jnp.dot(w, w_out.T, precision=hi) + b_out


if __name__ == "__main__":
    latent_size = 32     # must equal out_size for the PyTorch forward to be valid
    out_size = 32
    B, T = 2, 8
    H = out_size

    key = jax.random.PRNGKey(0)
    kz, k1, k2, k3, k4, k5, k6 = jax.random.split(key, 7)

    # Deterministic parameter init (PyTorch-style uniform(-1/sqrt(H), 1/sqrt(H))).
    bound = 1.0 / (H ** 0.5)
    w_ih = jax.random.uniform(k1, (4 * H, latent_size), jnp.float32, -bound, bound)
    w_hh = jax.random.uniform(k2, (4 * H, H), jnp.float32, -bound, bound)
    b_ih = jax.random.uniform(k3, (4 * H,), jnp.float32, -bound, bound)
    b_hh = jax.random.uniform(k4, (4 * H,), jnp.float32, -bound, bound)
    w_out = jax.random.uniform(k5, (out_size, latent_size), jnp.float32, -bound, bound)
    b_out = jax.random.uniform(k6, (out_size,), jnp.float32, -bound, bound)

    z = jax.random.normal(kz, (B, T, latent_size), jnp.float32)

    # One-time parameter repack (kept and reused across all forward calls).
    slab, meta = pack_decoder_params(w_ih, w_hh, b_ih, b_hh, w_out, b_out, seq_len=T)
    slab = jax.block_until_ready(slab)

    out = decoder_forward(z, slab, meta)
    out = jax.block_until_ready(out)

    ref = reference_forward(z, w_ih, w_hh, b_ih, b_hh, w_out, b_out)
    assert out.shape == (B, T, out_size), out.shape
    assert jnp.allclose(out, ref, atol=1e-5, rtol=1e-5), float(jnp.max(jnp.abs(out - ref)))

    print("KERNEL_OK")
</pallas_src>

<mosaic_0001>
module attributes {stable_mosaic.version = 11 : i64} {
  func.func @decoder_kernel(%arg0: memref<2x8x32xf32, #tpu.memory_space<vmem>>, %arg1: memref<304x256xf32, #tpu.memory_space<vmem>>, %arg2: memref<2x256xf32, #tpu.memory_space<vmem>>) attributes {dimension_semantics = [], scalar_prefetch = 0 : i64, scratch_operands = 0 : i64, tpu.core_type = #tpu.core_type<tc>} {
    %c0 = arith.constant 0 : index
    %c0_0 = arith.constant 0 : index
    %0 = vector.load %arg1[%c0, %c0_0] : memref<304x256xf32, #tpu.memory_space<vmem>>, vector<32x128xf32>
    %c0_1 = arith.constant 0 : index
    %c128 = arith.constant 128 : index
    %1 = vector.load %arg1[%c0_1, %c128] : memref<304x256xf32, #tpu.memory_space<vmem>>, vector<32x128xf32>
    %c32 = arith.constant 32 : index
    %c0_2 = arith.constant 0 : index
    %2 = vector.load %arg1[%c32, %c0_2] : memref<304x256xf32, #tpu.memory_space<vmem>>, vector<1x128xf32>
    %c40 = arith.constant 40 : index
    %c0_3 = arith.constant 0 : index
    %3 = vector.load %arg1[%c40, %c0_3] : memref<304x256xf32, #tpu.memory_space<vmem>>, vector<1x256xf32>
    %c48 = arith.constant 48 : index
    %c0_4 = arith.constant 0 : index
    %4 = vector.load %arg1[%c48, %c0_4] : memref<304x256xf32, #tpu.memory_space<vmem>>, vector<256x256xf32>
    %c0_5 = arith.constant 0 : index
    %c0_6 = arith.constant 0 : index
    %c0_7 = arith.constant 0 : index
    %5 = vector.load %arg0[%c0_5, %c0_6, %c0_7] : memref<2x8x32xf32, #tpu.memory_space<vmem>>, vector<2x8x32xf32>
    %6 = vector.shape_cast %5 : vector<2x8x32xf32> to vector<16x32xf32>
    %cst = arith.constant dense<0.000000e+00> : vector<16x128xf32>
    %7 = tpu.matmul %6, %0, %cst {dimension_numbers = #tpu.dot_dimension_numbers<[1], [0], [0], [1], [0, 0, 1, 1], [], []>, precision = #tpu.contract_precision<fp32>} : vector<16x32xf32>, vector<32x128xf32>, vector<16x128xf32> -> vector<16x128xf32>
    %8 = vector.broadcast %2 : vector<1x128xf32> to vector<16x128xf32>
    %9 = arith.addf %7, %8 : vector<16x128xf32>
    %10 = vector.shape_cast %9 : vector<16x128xf32> to vector<2x8x128xf32>
    %cst_8 = arith.constant 0.000000e+00 : f32
    %11 = vector.broadcast %cst_8 : f32 to vector<2x32xf32>
    %cst_9 = arith.constant 0.000000e+00 : f32
    %12 = vector.broadcast %cst_9 : f32 to vector<2x32xf32>
    %13 = vector.extract_strided_slice %10 {offsets = [0, 0, 0], sizes = [2, 1, 128], strides = [1, 1, 1]} : vector<2x8x128xf32> to vector<2x1x128xf32>
    %14 = vector.shape_cast %13 : vector<2x1x128xf32> to vector<2x128xf32>
    %cst_10 = arith.constant dense<0.000000e+00> : vector<2x128xf32>
    %15 = tpu.matmul %11, %1, %cst_10 {dimension_numbers = #tpu.dot_dimension_numbers<[1], [0], [0], [1], [0, 0, 1, 1], [], []>, precision = #tpu.contract_precision<fp32>} : vector<2x32xf32>, vector<32x128xf32>, vector<2x128xf32> -> vector<2x128xf32>
    %16 = arith.addf %14, %15 : vector<2x128xf32>
    %17 = arith.negf %16 : vector<2x128xf32>
    %18 = math.exp %17 : vector<2x128xf32>
    %cst_11 = arith.constant 1.000000e+00 : f32
    %19 = vector.broadcast %cst_11 : f32 to vector<2x128xf32>
    %20 = arith.addf %19, %18 : vector<2x128xf32>
    %21 = arith.divf %19, %20 : vector<2x128xf32>
    %22 = math.tanh %16 : vector<2x128xf32>
    %23 = vector.extract_strided_slice %21 {offsets = [0, 0], sizes = [2, 32], strides = [1, 1]} : vector<2x128xf32> to vector<2x32xf32>
    %24 = vector.extract_strided_slice %21 {offsets = [0, 32], sizes = [2, 32], strides = [1, 1]} : vector<2x128xf32> to vector<2x32xf32>
    %25 = vector.extract_strided_slice %22 {offsets = [0, 64], sizes = [2, 32], strides = [1, 1]} : vector<2x128xf32> to vector<2x32xf32>
    %26 = vector.extract_strided_slice %21 {offsets = [0, 96], sizes = [2, 32], strides = [1, 1]} : vector<2x128xf32> to vector<2x32xf32>
    %27 = arith.mulf %24, %12 : vector<2x32xf32>
    %28 = arith.mulf %23, %25 : vector<2x32xf32>
    %29 = arith.addf %27, %28 : vector<2x32xf32>
    %30 = math.tanh %29 : vector<2x32xf32>
    %31 = arith.mulf %26, %30 : vector<2x32xf32>
    %32 = vector.extract_strided_slice %10 {offsets = [0, 1, 0], sizes = [2, 1, 128], strides = [1, 1, 1]} : vector<2x8x128xf32> to vector<2x1x128xf32>
    %33 = vector.shape_cast %32 : vector<2x1x128xf32> to vector<2x128xf32>
    %cst_12 = arith.constant dense<0.000000e+00> : vector<2x128xf32>
    %34 = tpu.matmul %31, %1, %cst_12 {dimension_numbers = #tpu.dot_dimension_numbers<[1], [0], [0], [1], [0, 0, 1, 1], [], []>, precision = #tpu.contract_precision<fp32>} : vector<2x32xf32>, vector<32x128xf32>, vector<2x128xf32> -> vector<2x128xf32>
    %35 = arith.addf %33, %34 : vector<2x128xf32>
    %36 = arith.negf %35 : vector<2x128xf32>
    %37 = math.exp %36 : vector<2x128xf32>
    %cst_13 = arith.constant 1.000000e+00 : f32
    %38 = vector.broadcast %cst_13 : f32 to vector<2x128xf32>
    %39 = arith.addf %38, %37 : vector<2x128xf32>
    %40 = arith.divf %38, %39 : vector<2x128xf32>
    %41 = math.tanh %35 : vector<2x128xf32>
    %42 = vector.extract_strided_slice %40 {offsets = [0, 0], sizes = [2, 32], strides = [1, 1]} : vector<2x128xf32> to vector<2x32xf32>
    %43 = vector.extract_strided_slice %40 {offsets = [0, 32], sizes = [2, 32], strides = [1, 1]} : vector<2x128xf32> to vector<2x32xf32>
    %44 = vector.extract_strided_slice %41 {offsets = [0, 64], sizes = [2, 32], strides = [1, 1]} : vector<2x128xf32> to vector<2x32xf32>
    %45 = vector.extract_strided_slice %40 {offsets = [0, 96], sizes = [2, 32], strides = [1, 1]} : vector<2x128xf32> to vector<2x32xf32>
    %46 = arith.mulf %43, %29 : vector<2x32xf32>
    %47 = arith.mulf %42, %44 : vector<2x32xf32>
    %48 = arith.addf %46, %47 : vector<2x32xf32>
    %49 = math.tanh %48 : vector<2x32xf32>
    %50 = arith.mulf %45, %49 : vector<2x32xf32>
    %51 = vector.extract_strided_slice %10 {offsets = [0, 2, 0], sizes = [2, 1, 128], strides = [1, 1, 1]} : vector<2x8x128xf32> to vector<2x1x128xf32>
    %52 = vector.shape_cast %51 : vector<2x1x128xf32> to vector<2x128xf32>
    %cst_14 = arith.constant dense<0.000000e+00> : vector<2x128xf32>
    %53 = tpu.matmul %50, %1, %cst_14 {dimension_numbers = #tpu.dot_dimension_numbers<[1], [0], [0], [1], [0, 0, 1, 1], [], []>, precision = #tpu.contract_precision<fp32>} : vector<2x32xf32>, vector<32x128xf32>, vector<2x128xf32> -> vector<2x128xf32>
    %54 = arith.addf %52, %53 : vector<2x128xf32>
    %55 = arith.negf %54 : vector<2x128xf32>
    %56 = math.exp %55 : vector<2x128xf32>
    %cst_15 = arith.constant 1.000000e+00 : f32
    %57 = vector.broadcast %cst_15 : f32 to vector<2x128xf32>
    %58 = arith.addf %57, %56 : vector<2x128xf32>
    %59 = arith.divf %57, %58 : vector<2x128xf32>
    %60 = math.tanh %54 : vector<2x128xf32>
    %61 = vector.extract_strided_slice %59 {offsets = [0, 0], sizes = [2, 32], strides = [1, 1]} : vector<2x128xf32> to vector<2x32xf32>
    %62 = vector.extract_strided_slice %59 {offsets = [0, 32], sizes = [2, 32], strides = [1, 1]} : vector<2x128xf32> to vector<2x32xf32>
    %63 = vector.extract_strided_slice %60 {offsets = [0, 64], sizes = [2, 32], strides = [1, 1]} : vector<2x128xf32> to vector<2x32xf32>
    %64 = vector.extract_strided_slice %59 {offsets = [0, 96], sizes = [2, 32], strides = [1, 1]} : vector<2x128xf32> to vector<2x32xf32>
    %65 = arith.mulf %62, %48 : vector<2x32xf32>
    %66 = arith.mulf %61, %63 : vector<2x32xf32>
    %67 = arith.addf %65, %66 : vector<2x32xf32>
    %68 = math.tanh %67 : vector<2x32xf32>
    %69 = arith.mulf %64, %68 : vector<2x32xf32>
    %70 = vector.extract_strided_slice %10 {offsets = [0, 3, 0], sizes = [2, 1, 128], strides = [1, 1, 1]} : vector<2x8x128xf32> to vector<2x1x128xf32>
    %71 = vector.shape_cast %70 : vector<2x1x128xf32> to vector<2x128xf32>
    %cst_16 = arith.constant dense<0.000000e+00> : vector<2x128xf32>
    %72 = tpu.matmul %69, %1, %cst_16 {dimension_numbers = #tpu.dot_dimension_numbers<[1], [0], [0], [1], [0, 0, 1, 1], [], []>, precision = #tpu.contract_precision<fp32>} : vector<2x32xf32>, vector<32x128xf32>, vector<2x128xf32> -> vector<2x128xf32>
    %73 = arith.addf %71, %72 : vector<2x128xf32>
    %74 = arith.negf %73 : vector<2x128xf32>
    %75 = math.exp %74 : vector<2x128xf32>
    %cst_17 = arith.constant 1.000000e+00 : f32
    %76 = vector.broadcast %cst_17 : f32 to vector<2x128xf32>
    %77 = arith.addf %76, %75 : vector<2x128xf32>
    %78 = arith.divf %76, %77 : vector<2x128xf32>
    %79 = math.tanh %73 : vector<2x128xf32>
    %80 = vector.extract_strided_slice %78 {offsets = [0, 0], sizes = [2, 32], strides = [1, 1]} : vector<2x128xf32> to vector<2x32xf32>
    %81 = vector.extract_strided_slice %78 {offsets = [0, 32], sizes = [2, 32], strides = [1, 1]} : vector<2x128xf32> to vector<2x32xf32>
    %82 = vector.extract_strided_slice %79 {offsets = [0, 64], sizes = [2, 32], strides = [1, 1]} : vector<2x128xf32> to vector<2x32xf32>
    %83 = vector.extract_strided_slice %78 {offsets = [0, 96], sizes = [2, 32], strides = [1, 1]} : vector<2x128xf32> to vector<2x32xf32>
    %84 = arith.mulf %81, %67 : vector<2x32xf32>
    %85 = arith.mulf %80, %82 : vector<2x32xf32>
    %86 = arith.addf %84, %85 : vector<2x32xf32>
    %87 = math.tanh %86 : vector<2x32xf32>
    %88 = arith.mulf %83, %87 : vector<2x32xf32>
    %89 = vector.extract_strided_slice %10 {offsets = [0, 4, 0], sizes = [2, 1, 128], strides = [1, 1, 1]} : vector<2x8x128xf32> to vector<2x1x128xf32>
    %90 = vector.shape_cast %89 : vector<2x1x128xf32> to vector<2x128xf32>
    %cst_18 = arith.constant dense<0.000000e+00> : vector<2x128xf32>
    %91 = tpu.matmul %88, %1, %cst_18 {dimension_numbers = #tpu.dot_dimension_numbers<[1], [0], [0], [1], [0, 0, 1, 1], [], []>, precision = #tpu.contract_precision<fp32>} : vector<2x32xf32>, vector<32x128xf32>, vector<2x128xf32> -> vector<2x128xf32>
    %92 = arith.addf %90, %91 : vector<2x128xf32>
    %93 = arith.negf %92 : vector<2x128xf32>
    %94 = math.exp %93 : vector<2x128xf32>
    %cst_19 = arith.constant 1.000000e+00 : f32
    %95 = vector.broadcast %cst_19 : f32 to vector<2x128xf32>
    %96 = arith.addf %95, %94 : vector<2x128xf32>
    %97 = arith.divf %95, %96 : vector<2x128xf32>
    %98 = math.tanh %92 : vector<2x128xf32>
    %99 = vector.extract_strided_slice %97 {offsets = [0, 0], sizes = [2, 32], strides = [1, 1]} : vector<2x128xf32> to vector<2x32xf32>
    %100 = vector.extract_strided_slice %97 {offsets = [0, 32], sizes = [2, 32], strides = [1, 1]} : vector<2x128xf32> to vector<2x32xf32>
    %101 = vector.extract_strided_slice %98 {offsets = [0, 64], sizes = [2, 32], strides = [1, 1]} : vector<2x128xf32> to vector<2x32xf32>
    %102 = vector.extract_strided_slice %97 {offsets = [0, 96], sizes = [2, 32], strides = [1, 1]} : vector<2x128xf32> to vector<2x32xf32>
    %103 = arith.mulf %100, %86 : vector<2x32xf32>
    %104 = arith.mulf %99, %101 : vector<2x32xf32>
    %105 = arith.addf %103, %104 : vector<2x32xf32>
    %106 = math.tanh %105 : vector<2x32xf32>
    %107 = arith.mulf %102, %106 : vector<2x32xf32>
    %108 = vector.extract_strided_slice %10 {offsets = [0, 5, 0], sizes = [2, 1, 128], strides = [1, 1, 1]} : vector<2x8x128xf32> to vector<2x1x128xf32>
    %109 = vector.shape_cast %108 : vector<2x1x128xf32> to vector<2x128xf32>
    %cst_20 = arith.constant dense<0.000000e+00> : vector<2x128xf32>
    %110 = tpu.matmul %107, %1, %cst_20 {dimension_numbers = #tpu.dot_dimension_numbers<[1], [0], [0], [1], [0, 0, 1, 1], [], []>, precision = #tpu.contract_precision<fp32>} : vector<2x32xf32>, vector<32x128xf32>, vector<2x128xf32> -> vector<2x128xf32>
    %111 = arith.addf %109, %110 : vector<2x128xf32>
    %112 = arith.negf %111 : vector<2x128xf32>
    %113 = math.exp %112 : vector<2x128xf32>
    %cst_21 = arith.constant 1.000000e+00 : f32
    %114 = vector.broadcast %cst_21 : f32 to vector<2x128xf32>
    %115 = arith.addf %114, %113 : vector<2x128xf32>
    %116 = arith.divf %114, %115 : vector<2x128xf32>
    %117 = math.tanh %111 : vector<2x128xf32>
    %118 = vector.extract_strided_slice %116 {offsets = [0, 0], sizes = [2, 32], strides = [1, 1]} : vector<2x128xf32> to vector<2x32xf32>
    %119 = vector.extract_strided_slice %116 {offsets = [0, 32], sizes = [2, 32], strides = [1, 1]} : vector<2x128xf32> to vector<2x32xf32>
    %120 = vector.extract_strided_slice %117 {offsets = [0, 64], sizes = [2, 32], strides = [1, 1]} : vector<2x128xf32> to vector<2x32xf32>
    %121 = vector.extract_strided_slice %116 {offsets = [0, 96], sizes = [2, 32], strides = [1, 1]} : vector<2x128xf32> to vector<2x32xf32>
    %122 = arith.mulf %119, %105 : vector<2x32xf32>
    %123 = arith.mulf %118, %120 : vector<2x32xf32>
    %124 = arith.addf %122, %123 : vector<2x32xf32>
    %125 = math.tanh %124 : vector<2x32xf32>
    %126 = arith.mulf %121, %125 : vector<2x32xf32>
    %127 = vector.extract_strided_slice %10 {offsets = [0, 6, 0], sizes = [2, 1, 128], strides = [1, 1, 1]} : vector<2x8x128xf32> to vector<2x1x128xf32>
    %128 = vector.shape_cast %127 : vector<2x1x128xf32> to vector<2x128xf32>
    %cst_22 = arith.constant dense<0.000000e+00> : vector<2x128xf32>
    %129 = tpu.matmul %126, %1, %cst_22 {dimension_numbers = #tpu.dot_dimension_numbers<[1], [0], [0], [1], [0, 0, 1, 1], [], []>, precision = #tpu.contract_precision<fp32>} : vector<2x32xf32>, vector<32x128xf32>, vector<2x128xf32> -> vector<2x128xf32>
    %130 = arith.addf %128, %129 : vector<2x128xf32>
    %131 = arith.negf %130 : vector<2x128xf32>
    %132 = math.exp %131 : vector<2x128xf32>
    %cst_23 = arith.constant 1.000000e+00 : f32
    %133 = vector.broadcast %cst_23 : f32 to vector<2x128xf32>
    %134 = arith.addf %133, %132 : vector<2x128xf32>
    %135 = arith.divf %133, %134 : vector<2x128xf32>
    %136 = math.tanh %130 : vector<2x128xf32>
    %137 = vector.extract_strided_slice %135 {offsets = [0, 0], sizes = [2, 32], strides = [1, 1]} : vector<2x128xf32> to vector<2x32xf32>
    %138 = vector.extract_strided_slice %135 {offsets = [0, 32], sizes = [2, 32], strides = [1, 1]} : vector<2x128xf32> to vector<2x32xf32>
    %139 = vector.extract_strided_slice %136 {offsets = [0, 64], sizes = [2, 32], strides = [1, 1]} : vector<2x128xf32> to vector<2x32xf32>
    %140 = vector.extract_strided_slice %135 {offsets = [0, 96], sizes = [2, 32], strides = [1, 1]} : vector<2x128xf32> to vector<2x32xf32>
    %141 = arith.mulf %138, %124 : vector<2x32xf32>
    %142 = arith.mulf %137, %139 : vector<2x32xf32>
    %143 = arith.addf %141, %142 : vector<2x32xf32>
    %144 = math.tanh %143 : vector<2x32xf32>
    %145 = arith.mulf %140, %144 : vector<2x32xf32>
    %146 = vector.extract_strided_slice %10 {offsets = [0, 7, 0], sizes = [2, 1, 128], strides = [1, 1, 1]} : vector<2x8x128xf32> to vector<2x1x128xf32>
    %147 = vector.shape_cast %146 : vector<2x1x128xf32> to vector<2x128xf32>
    %cst_24 = arith.constant dense<0.000000e+00> : vector<2x128xf32>
    %148 = tpu.matmul %145, %1, %cst_24 {dimension_numbers = #tpu.dot_dimension_numbers<[1], [0], [0], [1], [0, 0, 1, 1], [], []>, precision = #tpu.contract_precision<fp32>} : vector<2x32xf32>, vector<32x128xf32>, vector<2x128xf32> -> vector<2x128xf32>
    %149 = arith.addf %147, %148 : vector<2x128xf32>
    %150 = arith.negf %149 : vector<2x128xf32>
    %151 = math.exp %150 : vector<2x128xf32>
    %cst_25 = arith.constant 1.000000e+00 : f32
    %152 = vector.broadcast %cst_25 : f32 to vector<2x128xf32>
    %153 = arith.addf %152, %151 : vector<2x128xf32>
    %154 = arith.divf %152, %153 : vector<2x128xf32>
    %155 = math.tanh %149 : vector<2x128xf32>
    %156 = vector.extract_strided_slice %154 {offsets = [0, 0], sizes = [2, 32], strides = [1, 1]} : vector<2x128xf32> to vector<2x32xf32>
    %157 = vector.extract_strided_slice %154 {offsets = [0, 32], sizes = [2, 32], strides = [1, 1]} : vector<2x128xf32> to vector<2x32xf32>
    %158 = vector.extract_strided_slice %155 {offsets = [0, 64], sizes = [2, 32], strides = [1, 1]} : vector<2x128xf32> to vector<2x32xf32>
    %159 = vector.extract_strided_slice %154 {offsets = [0, 96], sizes = [2, 32], strides = [1, 1]} : vector<2x128xf32> to vector<2x32xf32>
    %160 = arith.mulf %157, %143 : vector<2x32xf32>
    %161 = arith.mulf %156, %158 : vector<2x32xf32>
    %162 = arith.addf %160, %161 : vector<2x32xf32>
    %163 = math.tanh %162 : vector<2x32xf32>
    %164 = arith.mulf %159, %163 : vector<2x32xf32>
    %165 = tpu.concatenate %31, %50, %69, %88, %107, %126, %145, %164 in 1 : vector<2x32xf32>, vector<2x32xf32>, vector<2x32xf32>, vector<2x32xf32>, vector<2x32xf32>, vector<2x32xf32>, vector<2x32xf32>, vector<2x32xf32> -> vector<2x256xf32>
    %cst_26 = arith.constant dense<0.000000e+00> : vector<2x256xf32>
    %166 = tpu.matmul %165, %4, %cst_26 {dimension_numbers = #tpu.dot_dimension_numbers<[1], [0], [0], [1], [0, 0, 1, 1], [], []>, precision = #tpu.contract_precision<fp32>} : vector<2x256xf32>, vector<256x256xf32>, vector<2x256xf32> -> vector<2x256xf32>
    %167 = vector.broadcast %3 : vector<1x256xf32> to vector<2x256xf32>
    %168 = arith.addf %166, %167 : vector<2x256xf32>
    %c0_27 = arith.constant 0 : index
    %c0_28 = arith.constant 0 : index
    %169 = vector.load %arg2[%c0_27, %c0_28] : memref<2x256xf32, #tpu.memory_space<vmem>>, vector<2x256xf32>
    tpu.vector_store %arg2[%c0_27, %c0_28], %168 {strides = array<i32>} : memref<2x256xf32, #tpu.memory_space<vmem>>, vector<2x256xf32>,
    return
  }
}

</mosaic_0001>

<bundles_post_ra>
// kernel: tpu_custom_call.1
= control target key start
LH: loop header
LB: loop body
LE: loop exit
PB: predicated region body
PF: predicated region fallthrough
CT: control target
= control target key end

     0   :  { %7 = vsyncpa [#allocation3], 0  ;;  %s9548_s0 = inlined_call_operand.hbm [shape: f32[2,8,32], index: 0, kind: input, shape index: {}]   ;;  %s9549_s1 = inlined_call_operand.hbm [shape: f32[304,256], index: 1, kind: input, shape index: {}]   ;;  %s9550_s2 = inlined_call_operand.hbm [shape: f32[2,256], index: 2, kind: output, shape index: {}]  }
   0x1   :  { %8 = vsyncpa [#allocation6], 0 }
   0x2   :  { %9 = vsyncpa [#allocation4], 0  ;;  %s8353_s9 = smov [#allocation2]   ;;  %s8281_s13 = scalar_lea.hbm %s9548_s0, 256 }
   0x3   :  { %s15_s10 = sshll.u32 %s8353_s9, 4  ;;  %p8282_p0 = scmp.ne.s32.totalorder %s9548_s0, %s8281_s13  ;;  %s16_s10 = int_to_ptr.vmem [resolvable:$true] %s15_s10 }
   0x4   :  { %p8285_p1 = scmp.lt.u32.totalorder %s8281_s13, %s9548_s0 }
   0x6   :  { %p8287_p2 = pnand %p8285_p1, %p8282_p0 }
   0x8   :  { %8290 = shalt.err (!%p8287_p2)
}
   0x9   :  { %s8291_s18 = scalar_lea.vmem %s16_s10, 256  ;;  %p8296_p4 = scmp.lt.s32.totalorder %s16_s10, %s16_s10 }
   0xa   :  { %p8292_p3 = scmp.ne.s32.totalorder %s16_s10, %s8291_s18  ;;  %p8297_p5 = scmp.lt.s32.totalorder %s8291_s18, %s8291_s18 }
   0xc   :  { %p8298_p6 = por %p8297_p5, %p8296_p4 }
   0xe   :  { %p8299_p7 = pnand %p8298_p6, %p8292_p3 }
  0x10   :  { %8302 = shalt.err (!%p8299_p7)
}
  0x11   :  { %s8354_s19 = smov 128   ;;  %s8355_s20 = smov 8  }
  0x12   :  { %21 = dma.hbm_to_vmem [thread:$0]  %s9548_s0, 256, %s16_s10, [#allocation3], %s8354_s19, %s8354_s19, %s8355_s20  }
  0x13   :  { %s8356_s23 = smov [#allocation5]   ;;  %s8303_s27 = scalar_lea.hbm %s9549_s1, 9728 }
  0x14   :  { %s27_s24 = sshll.u32 %s8356_s23, 4  ;;  %p8304_p8 = scmp.ne.s32.totalorder %s9549_s1, %s8303_s27  ;;  %s28_s24 = int_to_ptr.vmem [resolvable:$true] %s27_s24 }
  0x15   :  { %p8307_p9 = scmp.lt.u32.totalorder %s8303_s27, %s9549_s1 }
  0x17   :  { %p8309_p10 = pnand %p8307_p9, %p8304_p8 }
  0x19   :  { %8312 = shalt.err (!%p8309_p10)
}
  0x1a   :  { %s8313_s4 = scalar_lea.vmem %s28_s24, 9728  ;;  %p8318_p12 = scmp.lt.s32.totalorder %s28_s24, %s28_s24 }
  0x1b   :  { %p8314_p11 = scmp.ne.s32.totalorder %s28_s24, %s8313_s4  ;;  %p8319_p13 = scmp.lt.s32.totalorder %s8313_s4, %s8313_s4 }
  0x1d   :  { %p8320_p0 = por %p8319_p13, %p8318_p12 }
  0x1f   :  { %p8321_p1 = pnand %p8320_p0, %p8314_p11 }
  0x21   :  { %8324 = shalt.err (!%p8321_p1)
}
  0x22   :  { %s8357_s0 = smov 256   ;;  %s8358_s5 = smov 16  }
  0x23   :  { %33 = dma.hbm_to_vmem [thread:$0]  %s9549_s1, 9728, %s28_s24, [#allocation6], %s8357_s0, %s8357_s0, %s8358_s5  }
  0x24   :  { %8347 = dma.done.wait [#allocation3], 256  }
  0x25   :  { %8348 = vsyncadd [#allocation3], 4294967040 }
  0x26   :  { %8349 = dma.done.wait [#allocation6], 9728  }
  0x27   :  { %8350 = vsyncadd [#allocation6], 4294957568  ;;  %vm117_vm0 = vcmask 261120   ;;  %v40_v0 = vld [vmem:[#allocation5] sm:$0xff]  ;;  %v41_v1 = vld [vmem:[#allocation5 + $0x10] sm:$0xff]  ;;  %vm8360_vm1 = vmmov 0  }
  0x28   :  { %v42_v2 = vld [vmem:[#allocation5 + $0x20] sm:$0xff]  ;;  %v125_v3 = vand.u32 4294901760, %v40_v0  ;;  %v128_v4 = vand.u32 4294901760, %v41_v1  ;;  %v43_v5 = vld [vmem:[#allocation5 + $0x30] sm:$0xff]  ;;  %v116_v8 = vld [vmem:[#allocation2 + $0x8] sm:$0xff]  ;;  %s8362_s1 = smov 64  }
  0x29   :  { %v131_v6 = vand.u32 4294901760, %v42_v2  ;;  %v115_v7 = vld [vmem:[#allocation2] sm:$0xff]  ;;  %v134_v9 = vand.u32 4294901760, %v43_v5  ;;  %v122_v11 = vsel %vm117_vm0, %v116_v8, 0  ;;  %v44_v44 = vld [vmem:[#allocation5 + $0x8] sm:$0xff]  ;;  %v45_v45 = vld [vmem:[#allocation5 + $0x18] sm:$0xff] }
  0x2a   :  { %v119_v10 = vsel %vm117_vm0, %v115_v7, 0  ;;  %v8407_v12 = vpack.c.bf16 %v128_v4, %v125_v3  ;;  %v8411_v14 = vand.u32 4294901760, %v122_v11  ;;  %v215_v15 = vsub.f32 %v40_v0, %v125_v3  ;;  %v46_v49 = vld [vmem:[#allocation5 + $0x28] sm:$0xff]  ;;  %v47_v50 = vld [vmem:[#allocation5 + $0x38] sm:$0xff]  ;;  %s8363_s8 = smov 32   ;;  %s8364_s9 = smov 96  }
  0x2b   :  { %v8409_v13 = vand.u32 4294901760, %v119_v10  ;;  %v8413_v16 = vpack.c.bf16 %v134_v9, %v131_v6  ;;  %v222_v17 = vsub.f32 %v41_v1, %v128_v4  ;;  %v229_v18 = vsub.f32 %v42_v2, %v131_v6  ;;  %s8365_s10 = smov [#allocation7]  }
  0x2c   :  { %v236_v19 = vsub.f32 %v43_v5, %v134_v9  ;;  %7317 = vmatprep.subr.bf16.mxu1 %v8407_v12  ;;  %7341 = vmatprep.subr.bf16.mxu0 %v8407_v12  ;;  %v8421_v21 = vsub.f32 %v122_v11, %v8411_v14  ;;  %v216_v22 = vand.u32 4294901760, %v215_v15  ;;  %v656_v46 = vand.u32 4294901760, %v44_v44  ;;  %s6419_s11 = sshll.u32 %s8365_s10, 4  ;;  %s6420_s11 = int_to_ptr.vmem [resolvable:$true] %s6419_s11 }
  0x2d   :  { %v8418_v20 = vsub.f32 %v119_v10, %v8409_v13  ;;  %7319 = vmatpush3.bf16.msra.mxu1 %v8407_v12  ;;  %7343 = vmatpush3.bf16.msra.mxu0 %v8407_v12  ;;  %v223_v23 = vand.u32 4294901760, %v222_v17  ;;  %v230_v24 = vand.u32 4294901760, %v229_v18  ;;  %v659_v47 = vand.u32 4294901760, %v45_v45  ;;  %s8325_s12 = scalar_lea.vmem %s6420_s11, 64  ;;  %p8330_p3 = scmp.lt.s32.totalorder %s6420_s11, %s6420_s11 }
  0x2e   :  { %v237_v25 = vand.u32 4294901760, %v236_v19  ;;  %7321 = vmatprep.subr.bf16.mxu1 %v8413_v16  ;;  %7345 = vmatprep.subr.bf16.mxu0 %v8413_v16  ;;  %v205_v27 = vand.u32 4294901760, %v8421_v21  ;;  %v217_v28 = vsub.f32 %v215_v15, %v216_v22  ;;  %v7332_v48 = vpack.c.bf16 %v222_v17, %v215_v15  ;;  %p8326_p2 = scmp.ne.s32.totalorder %s6420_s11, %s8325_s12  ;;  %p8331_p4 = scmp.lt.s32.totalorder %s8325_s12, %s8325_s12 }
  0x2f   :  { %v195_v26 = vand.u32 4294901760, %v8418_v20  ;;  %v224_v29 = vsub.f32 %v222_v17, %v223_v23  ;;  %v7348_v30 = vpack.c.bf16 %v223_v23, %v216_v22  ;;  %v231_v31 = vsub.f32 %v229_v18, %v230_v24 }
  0x30   :  { %v238_v32 = vsub.f32 %v236_v19, %v237_v25  ;;  %v206_v34 = vsub.f32 %v8421_v21, %v205_v27  ;;  %v218_v35 = vand.u32 4294901760, %v217_v28  ;;  %v7352_v43 = vpack.c.bf16 %v237_v25, %v230_v24  ;;  %p8332_p5 = por %p8331_p4, %p8330_p3 }
  0x31   :  { %v196_v33 = vsub.f32 %v8418_v20, %v195_v26  ;;  %6763 = vmatprep.mubr.f32.mxu0 %v195_v26  ;;  %7323 = vmatpush3.bf16.msra.mxu1 %v8413_v16  ;;  %v225_v36 = vand.u32 4294901760, %v224_v29  ;;  %v232_v37 = vand.u32 4294901760, %v231_v31  ;;  %v662_v51 = vand.u32 4294901760, %v46_v49 }
  0x32   :  { %7347 = vmatpush3.bf16.msra.mxu0 %v8413_v16  ;;  %v239_v38 = vand.u32 4294901760, %v238_v32  ;;  %v207_v40 = vand.u32 4294901760, %v206_v34  ;;  %v665_v52 = vand.u32 4294901760, %v47_v50  ;;  %v8435_v53 = vsub.f32 %v44_v44, %v656_v46  ;;  %p8333_p6 = pnand %p8332_p5, %p8326_p2 }
  0x33   :  { %v197_v39 = vand.u32 4294901760, %v196_v33  ;;  %7349 = vmatprep.subr.bf16.mxu0 %v7348_v30  ;;  %v7324_v41 = vpack.c.bf16 %v225_v36, %v218_v35  ;;  %v8437_v54 = vsub.f32 %v45_v45, %v659_v47  ;;  %v7336_v55 = vpack.c.bf16 %v236_v19, %v229_v18 }
  0x34   :  { %v7328_v42 = vpack.c.bf16 %v239_v38, %v232_v37  ;;  %v737_v56 = vand.u32 4294901760, %v8435_v53  ;;  %v8445_v58 = vsub.f32 %v46_v49, %v662_v51  ;;  %v757_v59 = vsub.f32 %v47_v50, %v665_v52 }
  0x35   :  { %6730 = vmatprep.mubr.f32.mxu1 %v197_v39  ;;  %6764 = vmatmul.mubr.f32.vlgmr.msra.gmra.mrb[0].mxu0 %v205_v27  ;;  %v744_v57 = vand.u32 4294901760, %v8437_v54  ;;  %v8450_v60 = vpack.c.bf16 %v659_v47, %v656_v46  ;;  %v8359_v1 = vmov 0.0|0.0   ;;  %v8460_v2 = vpack.c.bf16 %v665_v52, %v662_v51 }
  0x36   :  { %6731 = vmatmul.mubr.f32.vlgmr.msra.gmra.mrb[0].mxu1 %v207_v40  ;;  %7325 = vmatprep.subr.bf16.mxu1 %v7324_v41  ;;  %v738_v61 = vsub.f32 %v8435_v53, %v737_v56  ;;  %v751_v63 = vand.u32 4294901760, %v8445_v58  ;;  %v758_v0 = vand.u32 4294901760, %v757_v59  ;;  %v8361_v3 = vmov 0.0  }
  0x37   :  { %7327 = vmatpush3.bf16.msra.mxu1 %v7324_v41  ;;  %7351 = vmatpush3.bf16.msra.mxu0 %v7348_v30  ;;  %v745_v62 = vsub.f32 %v8437_v54, %v744_v57  ;;  %vm1197_vm2 = vcmask 1041409   ;;  %vm5099_vm3 = vcmask 523264   ;;  %vm5101_vm4 = vcmask 785408  }
  0x38   :  { %7329 = vmatprep.subr.bf16.mxu1 %v7328_v42  ;;  %7353 = vmatprep.subr.bf16.mxu0 %v7352_v43  ;;  %v739_v4 = vand.u32 4294901760, %v738_v61  ;;  %v752_v6 = vsub.f32 %v8445_v58, %v751_v63  ;;  %v759_v7 = vsub.f32 %v757_v59, %v758_v0  ;;  %v8511_v15 = vpack.c.bf16 %v758_v0, %v751_v63 }
  0x39   :  { %6741 = vmatprep.mubr.f32.mxu1 %v8409_v13  ;;  %6774 = vmatprep.mubr.f32.mxu0 %v8409_v13  ;;  %v746_v5 = vand.u32 4294901760, %v745_v62 }
  0x3a   :  { %v753_v9 = vand.u32 4294901760, %v752_v6  ;;  %v760_v10 = vand.u32 4294901760, %v759_v7 }
  0x3b   :  { %7331 = vmatpush3.bf16.msra.mxu1 %v7328_v42  ;;  %7355 = vmatpush3.bf16.msra.mxu0 %v7352_v43  ;;  %v8472_v8 = vpack.c.bf16 %v746_v5, %v739_v4 }
  0x3c   :  { %7333 = vmatprep.subr.bf16.mxu1 %v7332_v48  ;;  %7357 = vmatprep.subr.bf16.mxu0 %v8407_v12  ;;  %v8479_v11 = vpack.c.bf16 %v760_v10, %v753_v9 }
  0x3e   :  { %6742 = vmatmul.mubr.f32.vlgmr.msra.gmra.mrb[0].mxu1 %v8411_v14  ;;  %6775 = vmatmul.mubr.f32.vlgmr.msra.gmra.mrb[0].mxu0 %v8411_v14 }
  0x3f   :  { %7335 = vmatpush3.bf16.msra.mxu1 %v7332_v48  ;;  %7359 = vmatpush3.bf16.msra.mxu0 %v8407_v12  ;;  %v8487_v12 = vpack.c.bf16 %v8437_v54, %v8435_v53 }
  0x40   :  { %7337 = vmatprep.subr.bf16.mxu1 %v7336_v55  ;;  %7361 = vmatprep.subr.bf16.mxu0 %v8413_v16 }
  0x41   :  { %6752 = vmatprep.mubr.f32.mxu1 %v8418_v20  ;;  %6785 = vmatprep.mubr.f32.mxu0 %v8409_v13  ;;  %v8493_v13 = vpack.c.bf16 %v757_v59, %v8445_v58 }
  0x43   :  { %7339 = vmatpush3.bf16.msra.mxu1 %v7336_v55  ;;  %7363 = vmatpush3.bf16.msra.mxu0 %v8413_v16  ;;  %v48_v16 = vld [vmem:[#allocation5 + $0x40] ss:$0 sm:$0xff] }
  0x44   :  { %7364 = vmatprep.subr.bf16.mxu1 %v8359_v1  ;;  %7400 = vmatprep.subr.bf16.mxu0 %v8359_v1 }
  0x46   :  { %6753 = vmatmul.mubr.f32.vlgmr.msra.gmra.mrb[0].mxu1 %v8421_v21  ;;  %6786 = vmatmul.mubr.f32.vlgmr.msra.gmra.mrb[0].mxu0 %v8411_v14  ;;  %v8506_v14 = vpack.c.bf16 %v744_v57, %v737_v56 }
  0x47   :  { %7366 = vmatpush3.bf16.msra.mxu1 %v8450_v60  ;;  %6796 = vmatprep.mubr.msk.f32.mxu1 %vm8360_vm1, %v8361_v3 }
  0x48   :  { %7367 = vmatprep.subr.bf16.mxu1 %v8359_v1  ;;  %7402 = vmatpush3.bf16.msra.mxu0 %v8450_v60 }
  0x49   :  { %7403 = vmatprep.subr.bf16.mxu0 %v8359_v1  ;;  %6862 = vmatprep.mubr.msk.f32.mxu0 %vm8360_vm1, %v8361_v3 }
  0x4b   :  { %7369 = vmatpush3.bf16.msra.mxu1 %v8460_v2 }
  0x4c   :  { %7370 = vmatprep.subr.bf16.mxu1 %v8359_v1  ;;  %7405 = vmatpush3.bf16.msra.mxu0 %v8460_v2 }
  0x4d   :  { %7406 = vmatprep.subr.bf16.mxu0 %v8359_v1 }
  0x4e   :  { %6797 = vmatmul.mubr.f32.vlgmr.msra.gmra.mrb[2].mxu1 %v8361_v3 }
  0x4f   :  { %7372 = vmatpush3.bf16.msra.mxu1 %v8472_v8  ;;  %6807 = vmatprep.mubr.msk.f32.mxu1 %vm8360_vm1, %v8361_v3 }
  0x50   :  { %7373 = vmatprep.subr.bf16.mxu1 %v8359_v1 }
  0x53   :  { %7375 = vmatpush3.bf16.msra.mxu1 %v8479_v11 }
  0x54   :  { %7376 = vmatprep.subr.bf16.mxu1 %v8359_v1 }
  0x56   :  { %6808 = vmatmul.mubr.f32.vlgmr.msra.gmra.mrb[2].mxu1 %v8361_v3 }
  0x57   :  { %7378 = vmatpush3.bf16.msra.mxu1 %v8487_v12  ;;  %6818 = vmatprep.mubr.msk.f32.mxu1 %vm8360_vm1, %v8361_v3 }
  0x58   :  { %7379 = vmatprep.subr.bf16.mxu1 %v8359_v1 }
  0x5b   :  { %7381 = vmatpush3.bf16.msra.mxu1 %v8493_v13 }
  0x5c   :  { %7382 = vmatprep.subr.bf16.mxu1 %v8359_v1 }
  0x5e   :  { %6819 = vmatmul.mubr.f32.vlgmr.msra.gmra.mrb[2].mxu1 %v8361_v3 }
  0x5f   :  { %7384 = vmatpush3.bf16.msra.mxu1 %v8450_v60  ;;  %6829 = vmatprep.mubr.msk.f32.mxu1 %vm8360_vm1, %v8361_v3 }
  0x60   :  { %7385 = vmatprep.subr.bf16.mxu1 %v8359_v1 }
  0x63   :  { %7387 = vmatpush3.bf16.msra.mxu1 %v8460_v2 }
  0x64   :  { %7388 = vmatprep.subr.bf16.mxu1 %v8359_v1 }
  0x66   :  { %6830 = vmatmul.mubr.f32.vlgmr.msra.gmra.mrb[2].mxu1 %v8361_v3 }
  0x67   :  { %7390 = vmatpush3.bf16.msra.mxu1 %v8506_v14  ;;  %6840 = vmatprep.mubr.msk.f32.mxu1 %vm8360_vm1, %v8361_v3 }
  0x68   :  { %7391 = vmatprep.subr.bf16.mxu1 %v8359_v1 }
  0x6b   :  { %7393 = vmatpush3.bf16.msra.mxu1 %v8511_v15 }
  0x6c   :  { %7394 = vmatprep.subr.bf16.mxu1 %v8359_v1 }
  0x6e   :  { %6841 = vmatmul.mubr.f32.vlgmr.msra.gmra.mrb[2].mxu1 %v8361_v3 }
  0x6f   :  { %7396 = vmatpush3.bf16.msra.mxu1 %v8450_v60  ;;  %6851 = vmatprep.mubr.msk.f32.mxu1 %vm8360_vm1, %v8361_v3 }
  0x70   :  { %7397 = vmatprep.subr.bf16.mxu1 %v8359_v1 }
  0x73   :  { %7399 = vmatpush3.bf16.msra.mxu1 %v8460_v2 }
  0x74   :  { %7436 = vmatprep.subr.bf16.mxu1 %v8359_v1 }
  0x76   :  { %6852 = vmatmul.mubr.f32.vlgmr.msra.gmra.mrb[2].mxu1 %v8361_v3 }
  0x77   :  { %7438 = vmatpush3.bf16.msra.mxu1 %v8450_v60  ;;  %6928 = vmatprep.mubr.msk.f32.mxu1 %vm8360_vm1, %v8361_v3 }
  0x78   :  { %7439 = vmatprep.subr.bf16.mxu1 %v8359_v1 }
  0x7b   :  { %7441 = vmatpush3.bf16.msra.mxu1 %v8460_v2 }
  0x7c   :  { %7442 = vmatprep.subr.bf16.mxu1 %v8359_v1 }
 0x119   :  { %v6754_v17 = vpop.f32.mrb[0].mxu1  ;;  %v6787_v18 = vpop.f32.mrb[0].mxu0 }
 0x11a   :  { %v8036_v19 = vadd.f32 %v6754_v17, %v48_v16  ;;  %v386_v20 = vpop.f32.mrb[1].mxu1  ;;  %v642_v21 = vpop.f32.mrb[1].mxu0 }
 0x11b   :  { %v8038_v22 = vadd.f32 %v386_v20, %v48_v16 }
 0x11c   :  { %v8532_v23 = vadd.f32 %v8036_v19, %v6787_v18 }
 0x11d   :  { %v8534_v24 = vadd.f32 %v8038_v22, %v642_v21 }
 0x149   :  { %v1136_v25 = vpop.f32.mrb[2].mxu1 }
 0x14a   :  { %v1141_v26 = vrot.slane %v1136_v25, 1  ;;  %v6853_v27 = vpop.f32.mrb[3].mxu1  ;;  %v1144_v29 = vadd.f32 %v8534_v24, %v1136_v25 }
 0x14c   :  { %v1145_v28 = vadd.f32 %v8532_v23, %v1141_v26  ;;  %v6429_v33 = vmul.f32 -1.442695, %v1144_v29 }
 0x14e   :  { %8153 = vtanh.f32 %v1145_v28  ;;  %v6430_v32 = vmul.f32 -1.442695, %v1145_v28 }
 0x14f   :  { %8155 = vtanh.f32 %v1144_v29 }
 0x150   :  { %8157 = vpow2.f32 %v6430_v32 }
 0x151   :  { %8159 = vpow2.f32 %v6429_v33 }
 0x158   :  { %v8154_v30 = vpop.eup %8153 }
 0x159   :  { %1166 = vrot.lane.b32.xlu0 %v8154_v30, %s8362_s1  ;;  %v8156_v31 = vpop.eup %8155 }
 0x15a   :  { %v8158_v34 = vpop.eup %8157 }
 0x15b   :  { %v1153_v35 = vadd.f32 1.0, %v8158_v34  ;;  %v8160_v36 = vpop.eup %8159 }
 0x15c   :  { %v1152_v37 = vadd.f32 1.0, %v8160_v36 }
 0x15d   :  { %1164 = vrot.lane.b32.xlu0 %v8156_v31, %s8362_s1  ;;  %8161 = vrcp.f32 %v1153_v35 }
 0x15e   :  { %8163 = vrcp.f32 %v1152_v37 }
 0x167   :  { %v8162_v38 = vpop.eup %8161 }
 0x168   :  { %v8164_v41 = vpop.eup %8163  ;;  %v1161_v44 = vmul.f32 0.0, %v8162_v38 }
 0x169   :  { %v1160_v47 = vmul.f32 0.0, %v8164_v41 }
 0x1cb   :  { %v1167_v39 = vpop.permute.xlu0 %1166 }
 0x1cc   :  { %v1171_v40 = vmul.f32 %v8162_v38, %v1167_v39 }
 0x1ce   :  { %1176 = vrot.lane.b32.xlu1 %v1171_v40, %s8363_s8 }
 0x1cf   :  { %v1165_v42 = vpop.permute.xlu0 %1164 }
 0x1d0   :  { %v1170_v43 = vmul.f32 %v8164_v41, %v1165_v42 }
 0x1d2   :  { %1174 = vrot.lane.b32.xlu1 %v1170_v43, %s8363_s8 }
 0x240   :  { %v1177_v45 = vpop.permute.xlu1 %1176 }
 0x241   :  { %v8542_v46 = vadd.f32 %v1177_v45, %v1161_v44 }
 0x243   :  { %8165 = vtanh.f32 %v8542_v46  ;;  %v1711_v32 = vrot.slane %v8542_v46, 7 }
 0x244   :  { %v1175_v48 = vpop.permute.xlu1 %1174 }
 0x245   :  { %v8545_v49 = vadd.f32 %v1175_v48, %v1160_v47 }
 0x247   :  { %8167 = vtanh.f32 %v8545_v49  ;;  %v1710_v34 = vrot.slane %v8545_v49, 7 }
 0x24d   :  { %v8166_v50 = vpop.eup %8165 }
 0x24e   :  { %1188 = vrot.lane.b32.xlu0 %v8166_v50, %s8362_s1 }
 0x251   :  { %v8168_v51 = vpop.eup %8167 }
 0x252   :  { %1186 = vrot.lane.b32.xlu1 %v8168_v51, %s8362_s1 }
 0x2c0   :  { %v1189_v52 = vpop.permute.xlu0 %1188 }
 0x2c1   :  { %v1193_v53 = vmul.f32 %v8162_v38, %v1189_v52 }
 0x2c3   :  { %v1196_v55 = vrot.slane %v1193_v53, 7 }
 0x2c4   :  { %v1187_v54 = vpop.permute.xlu1 %1186 }
 0x2c5   :  { %v1192_v56 = vmul.f32 %v8164_v41, %v1187_v54 }
 0x2c7   :  { %v1198_v57 = vsel %vm1197_vm2, %v1196_v55, %v1192_v56 }
 0x2c8   :  { %1199 = vrot.lane.b32.xlu0 %v1198_v57, %s8363_s8 }
 0x33a   :  { %v8552_v58 = vpop.permute.xlu0 %1199 }
 0x33b   :  { %v1201_v59 = vsel %vm117_vm0, %v8552_v58, 0 }
 0x33c   :  { %v1272_v61 = vand.u32 4294901760, %v1201_v59 }
 0x33e   :  { %v1273_v62 = vsub.f32 %v1201_v59, %v1272_v61 }
 0x340   :  { %v1274_v63 = vand.u32 4294901760, %v1273_v62 }
 0x342   :  { %v1275_v0 = vsub.f32 %v1273_v62, %v1274_v63 }
 0x344   :  { %v1276_v4 = vand.u32 4294901760, %v1275_v0 }
 0x346   :  { %6863 = vmatmul.mubr.f32.vlgmr.msra.gmra.mrb[2].mxu0 %v1276_v4 }
 0x347   :  { %7408 = vmatpush3.bf16.msra.mxu0 %v8472_v8  ;;  %6873 = vmatprep.mubr.msk.f32.mxu0 %vm8360_vm1, %v8361_v3 }
 0x348   :  { %7409 = vmatprep.subr.bf16.mxu0 %v8359_v1 }
 0x34b   :  { %7411 = vmatpush3.bf16.msra.mxu0 %v8479_v11 }
 0x34c   :  { %7412 = vmatprep.subr.bf16.mxu0 %v8359_v1 }
 0x34e   :  { %6874 = vmatmul.mubr.f32.vlgmr.msra.gmra.mrb[2].mxu0 %v1272_v61 }
 0x34f   :  { %7414 = vmatpush3.bf16.msra.mxu0 %v8487_v12  ;;  %6884 = vmatprep.mubr.msk.f32.mxu0 %vm8360_vm1, %v8361_v3 }
 0x350   :  { %7415 = vmatprep.subr.bf16.mxu0 %v8359_v1 }
 0x353   :  { %7417 = vmatpush3.bf16.msra.mxu0 %v8493_v13 }
 0x354   :  { %7418 = vmatprep.subr.bf16.mxu0 %v8359_v1 }
 0x356   :  { %6885 = vmatmul.mubr.f32.vlgmr.msra.gmra.mrb[2].mxu0 %v1273_v62 }
 0x357   :  { %7420 = vmatpush3.bf16.msra.mxu0 %v8450_v60  ;;  %6895 = vmatprep.mubr.msk.f32.mxu0 %vm8360_vm1, %v8361_v3 }
 0x358   :  { %7421 = vmatprep.subr.bf16.mxu0 %v8359_v1 }
 0x35b   :  { %7423 = vmatpush3.bf16.msra.mxu0 %v8460_v2 }
 0x35c   :  { %7424 = vmatprep.subr.bf16.mxu0 %v8359_v1 }
 0x35e   :  { %6896 = vmatmul.mubr.f32.vlgmr.msra.gmra.mrb[2].mxu0 %v1274_v63 }
 0x35f   :  { %7426 = vmatpush3.bf16.msra.mxu0 %v8506_v14  ;;  %6906 = vmatprep.mubr.msk.f32.mxu0 %vm8360_vm1, %v8361_v3 }
 0x360   :  { %7427 = vmatprep.subr.bf16.mxu0 %v8359_v1 }
 0x363   :  { %7429 = vmatpush3.bf16.msra.mxu0 %v8511_v15 }
 0x364   :  { %7430 = vmatprep.subr.bf16.mxu0 %v8359_v1 }
 0x366   :  { %6907 = vmatmul.mubr.f32.vlgmr.msra.gmra.mrb[2].mxu0 %v1272_v61 }
 0x367   :  { %7432 = vmatpush3.bf16.msra.mxu0 %v8450_v60  ;;  %6917 = vmatprep.mubr.msk.f32.mxu0 %vm8360_vm1, %v8361_v3 }
 0x368   :  { %7433 = vmatprep.subr.bf16.mxu0 %v8359_v1 }
 0x36b   :  { %7435 = vmatpush3.bf16.msra.mxu0 %v8460_v2 }
 0x36c   :  { %7472 = vmatprep.subr.bf16.mxu0 %v8359_v1 }
 0x36e   :  { %6918 = vmatmul.mubr.f32.vlgmr.msra.gmra.mrb[2].mxu0 %v1272_v61 }
 0x36f   :  { %7474 = vmatpush3.bf16.msra.mxu0 %v8450_v60  ;;  %6994 = vmatprep.mubr.msk.f32.mxu0 %vm8360_vm1, %v8361_v3 }
 0x370   :  { %7475 = vmatprep.subr.bf16.mxu0 %v8359_v1 }
 0x373   :  { %7477 = vmatpush3.bf16.msra.mxu0 %v8460_v2 }
 0x374   :  { %7478 = vmatprep.subr.bf16.mxu0 %v8359_v1 }
 0x441   :  { %v1684_v5 = vpop.f32.mrb[2].mxu0 }
 0x442   :  { %v1689_v6 = vrot.slane %v1684_v5, 7  ;;  %v1693_v7 = vadd.f32 %v8532_v23, %v1684_v5  ;;  %v6919_v9 = vpop.f32.mrb[3].mxu0 }
 0x444   :  { %v1692_v10 = vadd.f32 %v8534_v24, %v1689_v6  ;;  %8169 = vtanh.f32 %v1693_v7  ;;  %v6432_v18 = vmul.f32 -1.442695, %v1693_v7 }
 0x446   :  { %8171 = vtanh.f32 %v1692_v10  ;;  %v6431_v19 = vmul.f32 -1.442695, %v1692_v10 }
 0x447   :  { %8173 = vpow2.f32 %v6432_v18 }
 0x448   :  { %8175 = vpow2.f32 %v6431_v19 }
 0x44e   :  { %v8170_v16 = vpop.eup %8169 }
 0x44f   :  { %1720 = vrot.lane.b32.xlu0 %v8170_v16, %s8362_s1 }
 0x450   :  { %v8172_v17 = vpop.eup %8171 }
 0x451   :  { %1718 = vrot.lane.b32.xlu1 %v8172_v17, %s8362_s1  ;;  %v8174_v20 = vpop.eup %8173 }
 0x452   :  { %v8176_v21 = vpop.eup %8175  ;;  %v1701_v22 = vadd.f32 1.0, %v8174_v20 }
 0x453   :  { %v1700_v25 = vadd.f32 1.0, %v8176_v21 }
 0x454   :  { %8177 = vrcp.f32 %v1701_v22 }
 0x455   :  { %8179 = vrcp.f32 %v1700_v25 }
 0x45e   :  { %v8178_v26 = vpop.eup %8177 }
 0x45f   :  { %v8180_v29 = vpop.eup %8179  ;;  %v1715_v33 = vmul.f32 %v8178_v26, %v1711_v32 }
 0x460   :  { %v1714_v37 = vmul.f32 %v8180_v29, %v1710_v34 }
 0x4c1   :  { %v1721_v27 = vpop.permute.xlu0 %1720 }
 0x4c2   :  { %v1725_v28 = vmul.f32 %v8178_v26, %v1721_v27 }
 0x4c3   :  { %v1719_v30 = vpop.permute.xlu1 %1718 }
 0x4c4   :  { %1730 = vrot.lane.b32.xlu0 %v1725_v28, %s8363_s8  ;;  %v1724_v31 = vmul.f32 %v8180_v29, %v1719_v30 }
 0x4c6   :  { %1728 = vrot.lane.b32.xlu1 %v1724_v31, %s8363_s8 }
 0x536   :  { %v1731_v35 = vpop.permute.xlu0 %1730 }
 0x537   :  { %v8600_v36 = vadd.f32 %v1731_v35, %v1715_v33 }
 0x538   :  { %v1729_v38 = vpop.permute.xlu1 %1728 }
 0x539   :  { %8181 = vtanh.f32 %v8600_v36  ;;  %v8603_v39 = vadd.f32 %v1729_v38, %v1714_v37  ;;  %v2265_v25 = vrot.slane %v8600_v36, 7 }
 0x53b   :  { %8183 = vtanh.f32 %v8603_v39  ;;  %v2264_v22 = vrot.slane %v8603_v39, 7 }
 0x543   :  { %v8182_v40 = vpop.eup %8181 }
 0x544   :  { %1742 = vrot.lane.b32.xlu0 %v8182_v40, %s8362_s1 }
 0x545   :  { %v8184_v41 = vpop.eup %8183 }
 0x546   :  { %1740 = vrot.lane.b32.xlu1 %v8184_v41, %s8362_s1 }
 0x5b6   :  { %v1743_v42 = vpop.permute.xlu0 %1742 }
 0x5b7   :  { %v1747_v45 = vmul.f32 %v8178_v26, %v1743_v42 }
 0x5b8   :  { %v1741_v43 = vpop.permute.xlu1 %1740 }
 0x5b9   :  { %v1746_v44 = vmul.f32 %v8180_v29, %v1741_v43 }
 0x5bb   :  { %v1750_v46 = vrot.slane %v1746_v44, 1 }
 0x5bd   :  { %v8609_v47 = vsel %vm1197_vm2, %v1747_v45, %v1750_v46 }
 0x5be   :  { %1752 = vrot.lane.b32.xlu1 %v8609_v47, %s8363_s8 }
 0x630   :  { %v1753_v48 = vpop.permute.xlu1 %1752 }
 0x631   :  { %v1754_v49 = vsel %vm117_vm0, %v1753_v48, 0 }
 0x632   :  { %v1825_v50 = vand.u32 4294901760, %v1754_v49 }
 0x634   :  { %v1826_v51 = vsub.f32 %v1754_v49, %v1825_v50 }
 0x636   :  { %v1827_v52 = vand.u32 4294901760, %v1826_v51 }
 0x638   :  { %v1828_v53 = vsub.f32 %v1826_v51, %v1827_v52 }
 0x63a   :  { %v1829_v54 = vand.u32 4294901760, %v1828_v53 }
 0x63c   :  { %6929 = vmatmul.mubr.f32.vlgmr.msra.gmra.mrb[4].mxu1 %v1829_v54 }
 0x63d   :  { %7444 = vmatpush3.bf16.msra.mxu1 %v8472_v8  ;;  %6939 = vmatprep.mubr.msk.f32.mxu1 %vm8360_vm1, %v8361_v3 }
 0x63e   :  { %7445 = vmatprep.subr.bf16.mxu1 %v8359_v1 }
 0x641   :  { %7447 = vmatpush3.bf16.msra.mxu1 %v8479_v11 }
 0x642   :  { %7448 = vmatprep.subr.bf16.mxu1 %v8359_v1 }
 0x644   :  { %6940 = vmatmul.mubr.f32.vlgmr.msra.gmra.mrb[4].mxu1 %v1825_v50 }
 0x645   :  { %7450 = vmatpush3.bf16.msra.mxu1 %v8487_v12  ;;  %6950 = vmatprep.mubr.msk.f32.mxu1 %vm8360_vm1, %v8361_v3 }
 0x646   :  { %7451 = vmatprep.subr.bf16.mxu1 %v8359_v1 }
 0x649   :  { %7453 = vmatpush3.bf16.msra.mxu1 %v8493_v13 }
 0x64a   :  { %7454 = vmatprep.subr.bf16.mxu1 %v8359_v1 }
 0x64c   :  { %6951 = vmatmul.mubr.f32.vlgmr.msra.gmra.mrb[4].mxu1 %v1826_v51 }
 0x64d   :  { %7456 = vmatpush3.bf16.msra.mxu1 %v8450_v60  ;;  %6961 = vmatprep.mubr.msk.f32.mxu1 %vm8360_vm1, %v8361_v3 }
 0x64e   :  { %7457 = vmatprep.subr.bf16.mxu1 %v8359_v1 }
 0x651   :  { %7459 = vmatpush3.bf16.msra.mxu1 %v8460_v2 }
 0x652   :  { %7460 = vmatprep.subr.bf16.mxu1 %v8359_v1 }
 0x654   :  { %6962 = vmatmul.mubr.f32.vlgmr.msra.gmra.mrb[4].mxu1 %v1827_v52 }
 0x655   :  { %7462 = vmatpush3.bf16.msra.mxu1 %v8506_v14  ;;  %6972 = vmatprep.mubr.msk.f32.mxu1 %vm8360_vm1, %v8361_v3 }
 0x656   :  { %7463 = vmatprep.subr.bf16.mxu1 %v8359_v1 }
 0x659   :  { %7465 = vmatpush3.bf16.msra.mxu1 %v8511_v15 }
 0x65a   :  { %7466 = vmatprep.subr.bf16.mxu1 %v8359_v1 }
 0x65c   :  { %6973 = vmatmul.mubr.f32.vlgmr.msra.gmra.mrb[4].mxu1 %v1825_v50 }
 0x65d   :  { %7468 = vmatpush3.bf16.msra.mxu1 %v8450_v60  ;;  %6983 = vmatprep.mubr.msk.f32.mxu1 %vm8360_vm1, %v8361_v3 }
 0x65e   :  { %7469 = vmatprep.subr.bf16.mxu1 %v8359_v1 }
 0x661   :  { %7471 = vmatpush3.bf16.msra.mxu1 %v8460_v2 }
 0x662   :  { %7508 = vmatprep.subr.bf16.mxu1 %v8359_v1 }
 0x664   :  { %6984 = vmatmul.mubr.f32.vlgmr.msra.gmra.mrb[4].mxu1 %v1825_v50 }
 0x665   :  { %7510 = vmatpush3.bf16.msra.mxu1 %v8450_v60  ;;  %7060 = vmatprep.mubr.msk.f32.mxu1 %vm8360_vm1, %v8361_v3 }
 0x666   :  { %7511 = vmatprep.subr.bf16.mxu1 %v8359_v1 }
 0x669   :  { %7513 = vmatpush3.bf16.msra.mxu1 %v8460_v2 }
 0x66a   :  { %7514 = vmatprep.subr.bf16.mxu1 %v8359_v1 }
 0x737   :  { %v2237_v55 = vpop.f32.mrb[4].mxu1 }
 0x738   :  { %v2242_v56 = vrot.slane %v2237_v55, 6  ;;  %v2243_v57 = vrot.slane %v2237_v55, 7  ;;  %v6985_v59 = vpop.f32.mrb[5].mxu1 }
 0x73a   :  { %v2246_v61 = vadd.f32 %v8534_v24, %v2242_v56  ;;  %v2247_v62 = vadd.f32 %v8532_v23, %v2243_v57 }
 0x73c   :  { %8185 = vtanh.f32 %v2246_v61  ;;  %v6433_v4 = vmul.f32 -1.442695, %v2246_v61  ;;  %v6434_v5 = vmul.f32 -1.442695, %v2247_v62 }
 0x73d   :  { %8187 = vtanh.f32 %v2247_v62 }
 0x73e   :  { %8189 = vpow2.f32 %v6433_v4 }
 0x73f   :  { %8191 = vpow2.f32 %v6434_v5 }
 0x746   :  { %v8186_v63 = vpop.eup %8185 }
 0x747   :  { %v8188_v0 = vpop.eup %8187  ;;  %2272 = vrot.lane.b32.xlu0 %v8186_v63, %s8362_s1 }
 0x748   :  { %2274 = vrot.lane.b32.xlu1 %v8188_v0, %s8362_s1  ;;  %v8190_v6 = vpop.eup %8189 }
 0x749   :  { %v8192_v7 = vpop.eup %8191  ;;  %v2254_v9 = vadd.f32 1.0, %v8190_v6 }
 0x74a   :  { %v2255_v10 = vadd.f32 1.0, %v8192_v7 }
 0x74b   :  { %8193 = vrcp.f32 %v2254_v9 }
 0x74c   :  { %8195 = vrcp.f32 %v2255_v10 }
 0x755   :  { %v8194_v16 = vpop.eup %8193 }
 0x756   :  { %v8196_v18 = vpop.eup %8195  ;;  %v2268_v26 = vmul.f32 %v8194_v16, %v2264_v22 }
 0x757   :  { %v2269_v27 = vmul.f32 %v8196_v18, %v2265_v25 }
 0x7b9   :  { %v2273_v17 = vpop.permute.xlu0 %2272 }
 0x7ba   :  { %v2275_v19 = vpop.permute.xlu1 %2274  ;;  %v2278_v20 = vmul.f32 %v8194_v16, %v2273_v17 }
 0x7bb   :  { %v2279_v21 = vmul.f32 %v8196_v18, %v2275_v19 }
 0x7bc   :  { %2282 = vrot.lane.b32.xlu0 %v2278_v20, %s8363_s8 }
 0x7bd   :  { %2284 = vrot.lane.b32.xlu1 %v2279_v21, %s8363_s8 }
 0x82e   :  { %v2283_v28 = vpop.permute.xlu0 %2282 }
 0x82f   :  { %v2285_v29 = vpop.permute.xlu1 %2284  ;;  %v8658_v30 = vadd.f32 %v2283_v28, %v2268_v26 }
 0x830   :  { %v8660_v31 = vadd.f32 %v2285_v29, %v2269_v27 }
 0x831   :  { %8197 = vtanh.f32 %v8658_v30 }
 0x832   :  { %8199 = vtanh.f32 %v8660_v31  ;;  %v2820_v17 = vrot.slane %v8660_v31, 7 }
 0x83b   :  { %v8198_v32 = vpop.eup %8197 }
 0x83c   :  { %v8200_v33 = vpop.eup %8199  ;;  %2294 = vrot.lane.b32.xlu0 %v8198_v32, %s8362_s1 }
 0x83d   :  { %2296 = vrot.lane.b32.xlu1 %v8200_v33, %s8362_s1 }
 0x8ae   :  { %v2295_v34 = vpop.permute.xlu0 %2294 }
 0x8af   :  { %v2297_v35 = vpop.permute.xlu1 %2296  ;;  %v2300_v36 = vmul.f32 %v8194_v16, %v2295_v34  ;;  %v2819_v16 = vrot.slane %v8658_v30, 7 }
 0x8b0   :  { %v2301_v37 = vmul.f32 %v8196_v18, %v2297_v35 }
 0x8b1   :  { %v2304_v38 = vrot.slane %v2300_v36, 2 }
 0x8b2   :  { %v2305_v39 = vrot.slane %v2301_v37, 1 }
 0x8b4   :  { %v8667_v40 = vsel %vm1197_vm2, %v2305_v39, %v2304_v38 }
 0x8b5   :  { %2307 = vrot.lane.b32.xlu0 %v8667_v40, %s8363_s8 }
 0x927   :  { %v2308_v41 = vpop.permute.xlu0 %2307 }
 0x928   :  { %v2309_v42 = vsel %vm117_vm0, %v2308_v41, 0 }
 0x929   :  { %v2380_v43 = vand.u32 4294901760, %v2309_v42 }
 0x92b   :  { %v2381_v44 = vsub.f32 %v2309_v42, %v2380_v43 }
 0x92d   :  { %v2382_v45 = vand.u32 4294901760, %v2381_v44 }
 0x92f   :  { %v2383_v46 = vsub.f32 %v2381_v44, %v2382_v45 }
 0x931   :  { %v2384_v48 = vand.u32 4294901760, %v2383_v46 }
 0x933   :  { %6995 = vmatmul.mubr.f32.vlgmr.msra.gmra.mrb[4].mxu0 %v2384_v48 }
 0x934   :  { %7480 = vmatpush3.bf16.msra.mxu0 %v8472_v8  ;;  %7005 = vmatprep.mubr.msk.f32.mxu0 %vm8360_vm1, %v8361_v3 }
 0x935   :  { %7481 = vmatprep.subr.bf16.mxu0 %v8359_v1 }
 0x938   :  { %7483 = vmatpush3.bf16.msra.mxu0 %v8479_v11 }
 0x939   :  { %7484 = vmatprep.subr.bf16.mxu0 %v8359_v1 }
 0x93b   :  { %7006 = vmatmul.mubr.f32.vlgmr.msra.gmra.mrb[4].mxu0 %v2380_v43 }
 0x93c   :  { %7486 = vmatpush3.bf16.msra.mxu0 %v8487_v12  ;;  %7016 = vmatprep.mubr.msk.f32.mxu0 %vm8360_vm1, %v8361_v3 }
 0x93d   :  { %7487 = vmatprep.subr.bf16.mxu0 %v8359_v1 }
 0x940   :  { %7489 = vmatpush3.bf16.msra.mxu0 %v8493_v13 }
 0x941   :  { %7490 = vmatprep.subr.bf16.mxu0 %v8359_v1 }
 0x943   :  { %7017 = vmatmul.mubr.f32.vlgmr.msra.gmra.mrb[4].mxu0 %v2381_v44 }
 0x944   :  { %7492 = vmatpush3.bf16.msra.mxu0 %v8450_v60  ;;  %7027 = vmatprep.mubr.msk.f32.mxu0 %vm8360_vm1, %v8361_v3 }
 0x945   :  { %7493 = vmatprep.subr.bf16.mxu0 %v8359_v1 }
 0x948   :  { %7495 = vmatpush3.bf16.msra.mxu0 %v8460_v2 }
 0x949   :  { %7496 = vmatprep.subr.bf16.mxu0 %v8359_v1 }
 0x94b   :  { %7028 = vmatmul.mubr.f32.vlgmr.msra.gmra.mrb[4].mxu0 %v2382_v45 }
 0x94c   :  { %7498 = vmatpush3.bf16.msra.mxu0 %v8506_v14  ;;  %7038 = vmatprep.mubr.msk.f32.mxu0 %vm8360_vm1, %v8361_v3 }
 0x94d   :  { %7499 = vmatprep.subr.bf16.mxu0 %v8359_v1 }
 0x950   :  { %7501 = vmatpush3.bf16.msra.mxu0 %v8511_v15 }
 0x951   :  { %7502 = vmatprep.subr.bf16.mxu0 %v8359_v1 }
 0x953   :  { %7039 = vmatmul.mubr.f32.vlgmr.msra.gmra.mrb[4].mxu0 %v2380_v43 }
 0x954   :  { %7504 = vmatpush3.bf16.msra.mxu0 %v8450_v60  ;;  %7049 = vmatprep.mubr.msk.f32.mxu0 %vm8360_vm1, %v8361_v3 }
 0x955   :  { %7505 = vmatprep.subr.bf16.mxu0 %v8359_v1 }
 0x958   :  { %7507 = vmatpush3.bf16.msra.mxu0 %v8460_v2 }
 0x959   :  { %7544 = vmatprep.subr.bf16.mxu0 %v8359_v1 }
 0x95b   :  { %7050 = vmatmul.mubr.f32.vlgmr.msra.gmra.mrb[4].mxu0 %v2380_v43 }
 0x95c   :  { %7546 = vmatpush3.bf16.msra.mxu0 %v8450_v60  ;;  %7126 = vmatprep.mubr.msk.f32.mxu0 %vm8360_vm1, %v8361_v3 }
 0x95d   :  { %7547 = vmatprep.subr.bf16.mxu0 %v8359_v1 }
 0x960   :  { %7549 = vmatpush3.bf16.msra.mxu0 %v8460_v2 }
 0x961   :  { %7550 = vmatprep.subr.bf16.mxu0 %v8359_v1 }
 0xa2e   :  { %v2792_v49 = vpop.f32.mrb[4].mxu0 }
 0xa2f   :  { %v2797_v50 = vrot.slane %v2792_v49, 5  ;;  %v2798_v51 = vrot.slane %v2792_v49, 6  ;;  %v7051_v52 = vpop.f32.mrb[5].mxu0 }
 0xa31   :  { %v2801_v53 = vadd.f32 %v8534_v24, %v2797_v50  ;;  %v2802_v54 = vadd.f32 %v8532_v23, %v2798_v51 }
 0xa33   :  { %8201 = vtanh.f32 %v2801_v53  ;;  %v6435_v57 = vmul.f32 -1.442695, %v2801_v53  ;;  %v6436_v59 = vmul.f32 -1.442695, %v2802_v54 }
 0xa34   :  { %8203 = vtanh.f32 %v2802_v54 }
 0xa35   :  { %8205 = vpow2.f32 %v6435_v57 }
 0xa36   :  { %8207 = vpow2.f32 %v6436_v59 }
 0xa3d   :  { %v8202_v55 = vpop.eup %8201 }
 0xa3e   :  { %v8204_v56 = vpop.eup %8203  ;;  %2827 = vrot.lane.b32.xlu1 %v8202_v55, %s8362_s1 }
 0xa3f   :  { %2829 = vrot.lane.b32.xlu0 %v8204_v56, %s8362_s1  ;;  %v8206_v61 = vpop.eup %8205 }
 0xa40   :  { %v8208_v62 = vpop.eup %8207  ;;  %v2809_v63 = vadd.f32 1.0, %v8206_v61 }
 0xa41   :  { %v2810_v0 = vadd.f32 1.0, %v8208_v62 }
 0xa42   :  { %8209 = vrcp.f32 %v2809_v63 }
 0xa43   :  { %8211 = vrcp.f32 %v2810_v0 }
 0xa4c   :  { %v8210_v4 = vpop.eup %8209 }
 0xa4d   :  { %v8212_v6 = vpop.eup %8211  ;;  %v2823_v18 = vmul.f32 %v8210_v4, %v2819_v16 }
 0xa4e   :  { %v2824_v19 = vmul.f32 %v8212_v6, %v2820_v17 }
 0xab0   :  { %v2828_v5 = vpop.permute.xlu1 %2827 }
 0xab1   :  { %v2830_v7 = vpop.permute.xlu0 %2829  ;;  %v2833_v9 = vmul.f32 %v8210_v4, %v2828_v5 }
 0xab2   :  { %v2834_v10 = vmul.f32 %v8212_v6, %v2830_v7 }
 0xab3   :  { %2837 = vrot.lane.b32.xlu1 %v2833_v9, %s8363_s8 }
 0xab4   :  { %2839 = vrot.lane.b32.xlu0 %v2834_v10, %s8363_s8 }
 0xb25   :  { %v2838_v20 = vpop.permute.xlu1 %2837 }
 0xb26   :  { %v2840_v21 = vpop.permute.xlu0 %2839  ;;  %v8716_v22 = vadd.f32 %v2838_v20, %v2823_v18 }
 0xb27   :  { %v8718_v25 = vadd.f32 %v2840_v21, %v2824_v19 }
 0xb28   :  { %8213 = vtanh.f32 %v8716_v22  ;;  %v3374_v5 = vrot.slane %v8716_v22, 7 }
 0xb29   :  { %8215 = vtanh.f32 %v8718_v25 }
 0xb32   :  { %v8214_v26 = vpop.eup %8213 }
 0xb33   :  { %v8216_v27 = vpop.eup %8215  ;;  %2849 = vrot.lane.b32.xlu1 %v8214_v26, %s8362_s1 }
 0xb34   :  { %2851 = vrot.lane.b32.xlu0 %v8216_v27, %s8362_s1 }
 0xba5   :  { %v2850_v28 = vpop.permute.xlu1 %2849 }
 0xba6   :  { %v2852_v29 = vpop.permute.xlu0 %2851  ;;  %v2855_v30 = vmul.f32 %v8210_v4, %v2850_v28 }
 0xba7   :  { %v2856_v31 = vmul.f32 %v8212_v6, %v2852_v29  ;;  %v3375_v6 = vrot.slane %v8718_v25, 7 }
 0xba8   :  { %v2859_v32 = vrot.slane %v2855_v30, 3 }
 0xba9   :  { %v2860_v33 = vrot.slane %v2856_v31, 2 }
 0xbab   :  { %v8725_v34 = vsel %vm1197_vm2, %v2860_v33, %v2859_v32 }
 0xbac   :  { %2862 = vrot.lane.b32.xlu1 %v8725_v34, %s8363_s8 }
 0xc1e   :  { %v2863_v35 = vpop.permute.xlu1 %2862 }
 0xc1f   :  { %v2864_v36 = vsel %vm117_vm0, %v2863_v35, 0 }
 0xc20   :  { %v2935_v37 = vand.u32 4294901760, %v2864_v36 }
 0xc22   :  { %v2936_v38 = vsub.f32 %v2864_v36, %v2935_v37 }
 0xc24   :  { %v2937_v39 = vand.u32 4294901760, %v2936_v38 }
 0xc26   :  { %v2938_v41 = vsub.f32 %v2936_v38, %v2937_v39 }
 0xc28   :  { %v2939_v42 = vand.u32 4294901760, %v2938_v41 }
 0xc2a   :  { %7061 = vmatmul.mubr.f32.vlgmr.msra.gmra.mrb[6].mxu1 %v2939_v42 }
 0xc2b   :  { %7516 = vmatpush3.bf16.msra.mxu1 %v8472_v8  ;;  %7071 = vmatprep.mubr.msk.f32.mxu1 %vm8360_vm1, %v8361_v3 }
 0xc2c   :  { %7517 = vmatprep.subr.bf16.mxu1 %v8359_v1 }
 0xc2f   :  { %7519 = vmatpush3.bf16.msra.mxu1 %v8479_v11 }
 0xc30   :  { %7520 = vmatprep.subr.bf16.mxu1 %v8359_v1 }
 0xc32   :  { %7072 = vmatmul.mubr.f32.vlgmr.msra.gmra.mrb[6].mxu1 %v2935_v37 }
 0xc33   :  { %7522 = vmatpush3.bf16.msra.mxu1 %v8487_v12  ;;  %7082 = vmatprep.mubr.msk.f32.mxu1 %vm8360_vm1, %v8361_v3 }
 0xc34   :  { %7523 = vmatprep.subr.bf16.mxu1 %v8359_v1 }
 0xc37   :  { %7525 = vmatpush3.bf16.msra.mxu1 %v8493_v13 }
 0xc38   :  { %7526 = vmatprep.subr.bf16.mxu1 %v8359_v1 }
 0xc3a   :  { %7083 = vmatmul.mubr.f32.vlgmr.msra.gmra.mrb[6].mxu1 %v2936_v38 }
 0xc3b   :  { %7528 = vmatpush3.bf16.msra.mxu1 %v8450_v60  ;;  %7093 = vmatprep.mubr.msk.f32.mxu1 %vm8360_vm1, %v8361_v3 }
 0xc3c   :  { %7529 = vmatprep.subr.bf16.mxu1 %v8359_v1 }
 0xc3f   :  { %7531 = vmatpush3.bf16.msra.mxu1 %v8460_v2 }
 0xc40   :  { %7532 = vmatprep.subr.bf16.mxu1 %v8359_v1 }
 0xc42   :  { %7094 = vmatmul.mubr.f32.vlgmr.msra.gmra.mrb[6].mxu1 %v2937_v39 }
 0xc43   :  { %7534 = vmatpush3.bf16.msra.mxu1 %v8506_v14  ;;  %7104 = vmatprep.mubr.msk.f32.mxu1 %vm8360_vm1, %v8361_v3 }
 0xc44   :  { %7535 = vmatprep.subr.bf16.mxu1 %v8359_v1 }
 0xc47   :  { %7537 = vmatpush3.bf16.msra.mxu1 %v8511_v15 }
 0xc48   :  { %7538 = vmatprep.subr.bf16.mxu1 %v8359_v1 }
 0xc4a   :  { %7105 = vmatmul.mubr.f32.vlgmr.msra.gmra.mrb[6].mxu1 %v2935_v37 }
 0xc4b   :  { %7540 = vmatpush3.bf16.msra.mxu1 %v8450_v60  ;;  %7115 = vmatprep.mubr.msk.f32.mxu1 %vm8360_vm1, %v8361_v3 }
 0xc4c   :  { %7541 = vmatprep.subr.bf16.mxu1 %v8359_v1 }
 0xc4f   :  { %7543 = vmatpush3.bf16.msra.mxu1 %v8460_v2 }
 0xc50   :  { %7580 = vmatprep.subr.bf16.mxu1 %v8359_v1 }
 0xc52   :  { %7116 = vmatmul.mubr.f32.vlgmr.msra.gmra.mrb[6].mxu1 %v2935_v37 }
 0xc53   :  { %7582 = vmatpush3.bf16.msra.mxu1 %v8450_v60  ;;  %7192 = vmatprep.mubr.msk.f32.mxu1 %vm8360_vm1, %v8361_v3 }
 0xc54   :  { %7583 = vmatprep.subr.bf16.mxu1 %v8359_v1 }
 0xc57   :  { %7585 = vmatpush3.bf16.msra.mxu1 %v8460_v2 }
 0xc58   :  { %7586 = vmatprep.subr.bf16.mxu1 %v8359_v1 }
 0xd25   :  { %v3347_v43 = vpop.f32.mrb[6].mxu1 }
 0xd26   :  { %v3352_v44 = vrot.slane %v3347_v43, 4  ;;  %v3353_v45 = vrot.slane %v3347_v43, 5  ;;  %v7117_v46 = vpop.f32.mrb[7].mxu1 }
 0xd28   :  { %v3356_v48 = vadd.f32 %v8534_v24, %v3352_v44  ;;  %v3357_v49 = vadd.f32 %v8532_v23, %v3353_v45 }
 0xd2a   :  { %8217 = vtanh.f32 %v3356_v48  ;;  %v6437_v52 = vmul.f32 -1.442695, %v3356_v48  ;;  %v6438_v53 = vmul.f32 -1.442695, %v3357_v49 }
 0xd2b   :  { %8219 = vtanh.f32 %v3357_v49 }
 0xd2c   :  { %8221 = vpow2.f32 %v6437_v52 }
 0xd2d   :  { %8223 = vpow2.f32 %v6438_v53 }
 0xd34   :  { %v8218_v50 = vpop.eup %8217 }
 0xd35   :  { %v8220_v51 = vpop.eup %8219  ;;  %3382 = vrot.lane.b32.xlu0 %v8218_v50, %s8362_s1 }
 0xd36   :  { %3384 = vrot.lane.b32.xlu1 %v8220_v51, %s8362_s1  ;;  %v8222_v54 = vpop.eup %8221 }
 0xd37   :  { %v8224_v55 = vpop.eup %8223  ;;  %v3364_v56 = vadd.f32 1.0, %v8222_v54 }
 0xd38   :  { %v3365_v57 = vadd.f32 1.0, %v8224_v55 }
 0xd39   :  { %8225 = vrcp.f32 %v3364_v56 }
 0xd3a   :  { %8227 = vrcp.f32 %v3365_v57 }
 0xd43   :  { %v8226_v59 = vpop.eup %8225 }
 0xd44   :  { %v8228_v62 = vpop.eup %8227  ;;  %v3378_v7 = vmul.f32 %v8226_v59, %v3374_v5 }
 0xd45   :  { %v3379_v9 = vmul.f32 %v8228_v62, %v3375_v6 }
 0xda7   :  { %v3383_v61 = vpop.permute.xlu0 %3382 }
 0xda8   :  { %v3385_v63 = vpop.permute.xlu1 %3384  ;;  %v3388_v0 = vmul.f32 %v8226_v59, %v3383_v61 }
 0xda9   :  { %v3389_v4 = vmul.f32 %v8228_v62, %v3385_v63 }
 0xdaa   :  { %3392 = vrot.lane.b32.xlu0 %v3388_v0, %s8363_s8 }
 0xdab   :  { %3394 = vrot.lane.b32.xlu1 %v3389_v4, %s8363_s8 }
 0xe1c   :  { %v3393_v10 = vpop.permute.xlu0 %3392 }
 0xe1d   :  { %v3395_v16 = vpop.permute.xlu1 %3394  ;;  %v8774_v17 = vadd.f32 %v3393_v10, %v3378_v7 }
 0xe1e   :  { %v8776_v18 = vadd.f32 %v3395_v16, %v3379_v9 }
 0xe1f   :  { %8229 = vtanh.f32 %v8774_v17 }
 0xe20   :  { %8231 = vtanh.f32 %v8776_v18  ;;  %v3930_v63 = vrot.slane %v8776_v18, 7 }
 0xe29   :  { %v8230_v19 = vpop.eup %8229 }
 0xe2a   :  { %v8232_v20 = vpop.eup %8231  ;;  %3404 = vrot.lane.b32.xlu0 %v8230_v19, %s8362_s1 }
 0xe2b   :  { %3406 = vrot.lane.b32.xlu1 %v8232_v20, %s8362_s1 }
 0xe9c   :  { %v3405_v21 = vpop.permute.xlu0 %3404 }
 0xe9d   :  { %v3407_v22 = vpop.permute.xlu1 %3406  ;;  %v3410_v25 = vmul.f32 %v8226_v59, %v3405_v21 }
 0xe9e   :  { %v3411_v26 = vmul.f32 %v8228_v62, %v3407_v22  ;;  %v3929_v62 = vrot.slane %v8774_v17, 7 }
 0xe9f   :  { %v3414_v27 = vrot.slane %v3410_v25, 4 }
 0xea0   :  { %v3415_v28 = vrot.slane %v3411_v26, 3 }
 0xea2   :  { %v3416_v29 = vsel %vm1197_vm2, %v3415_v28, %v3414_v27 }
 0xea3   :  { %3417 = vrot.lane.b32.xlu0 %v3416_v29, %s8363_s8 }
 0xf15   :  { %v8784_v30 = vpop.permute.xlu0 %3417 }
 0xf16   :  { %v3419_v31 = vsel %vm117_vm0, %v8784_v30, 0 }
 0xf17   :  { %v3490_v32 = vand.u32 4294901760, %v3419_v31 }
 0xf19   :  { %v3491_v33 = vsub.f32 %v3419_v31, %v3490_v32 }
 0xf1b   :  { %v3492_v35 = vand.u32 4294901760, %v3491_v33 }
 0xf1d   :  { %v3493_v36 = vsub.f32 %v3491_v33, %v3492_v35 }
 0xf1f   :  { %v3494_v37 = vand.u32 4294901760, %v3493_v36 }
 0xf21   :  { %7127 = vmatmul.mubr.f32.vlgmr.msra.gmra.mrb[6].mxu0 %v3494_v37 }
 0xf22   :  { %7552 = vmatpush3.bf16.msra.mxu0 %v8472_v8  ;;  %7137 = vmatprep.mubr.msk.f32.mxu0 %vm8360_vm1, %v8361_v3 }
 0xf23   :  { %7553 = vmatprep.subr.bf16.mxu0 %v8359_v1 }
 0xf26   :  { %7555 = vmatpush3.bf16.msra.mxu0 %v8479_v11 }
 0xf27   :  { %7556 = vmatprep.subr.bf16.mxu0 %v8359_v1 }
 0xf29   :  { %7138 = vmatmul.mubr.f32.vlgmr.msra.gmra.mrb[6].mxu0 %v3490_v32 }
 0xf2a   :  { %7558 = vmatpush3.bf16.msra.mxu0 %v8487_v12  ;;  %7148 = vmatprep.mubr.msk.f32.mxu0 %vm8360_vm1, %v8361_v3 }
 0xf2b   :  { %7559 = vmatprep.subr.bf16.mxu0 %v8359_v1 }
 0xf2e   :  { %7561 = vmatpush3.bf16.msra.mxu0 %v8493_v13 }
 0xf2f   :  { %7562 = vmatprep.subr.bf16.mxu0 %v8359_v1 }
 0xf31   :  { %7149 = vmatmul.mubr.f32.vlgmr.msra.gmra.mrb[6].mxu0 %v3491_v33 }
 0xf32   :  { %7564 = vmatpush3.bf16.msra.mxu0 %v8450_v60  ;;  %7159 = vmatprep.mubr.msk.f32.mxu0 %vm8360_vm1, %v8361_v3 }
 0xf33   :  { %7565 = vmatprep.subr.bf16.mxu0 %v8359_v1 }
 0xf36   :  { %7567 = vmatpush3.bf16.msra.mxu0 %v8460_v2 }
 0xf37   :  { %7568 = vmatprep.subr.bf16.mxu0 %v8359_v1 }
 0xf39   :  { %7160 = vmatmul.mubr.f32.vlgmr.msra.gmra.mrb[6].mxu0 %v3492_v35 }
 0xf3a   :  { %7570 = vmatpush3.bf16.msra.mxu0 %v8506_v14  ;;  %7170 = vmatprep.mubr.msk.f32.mxu0 %vm8360_vm1, %v8361_v3 }
 0xf3b   :  { %7571 = vmatprep.subr.bf16.mxu0 %v8359_v1 }
 0xf3e   :  { %7573 = vmatpush3.bf16.msra.mxu0 %v8511_v15 }
 0xf3f   :  { %7574 = vmatprep.subr.bf16.mxu0 %v8359_v1 }
 0xf41   :  { %7171 = vmatmul.mubr.f32.vlgmr.msra.gmra.mrb[6].mxu0 %v3490_v32 }
 0xf42   :  { %7576 = vmatpush3.bf16.msra.mxu0 %v8450_v60  ;;  %7181 = vmatprep.mubr.msk.f32.mxu0 %vm8360_vm1, %v8361_v3 }
 0xf43   :  { %7577 = vmatprep.subr.bf16.mxu0 %v8359_v1 }
 0xf46   :  { %7579 = vmatpush3.bf16.msra.mxu0 %v8460_v2 }
 0xf47   :  { %7616 = vmatprep.subr.bf16.mxu0 %v8359_v1 }
 0xf49   :  { %7182 = vmatmul.mubr.f32.vlgmr.msra.gmra.mrb[6].mxu0 %v3490_v32 }
 0xf4a   :  { %7618 = vmatpush3.bf16.msra.mxu0 %v8450_v60  ;;  %7258 = vmatprep.mubr.msk.f32.mxu0 %vm8360_vm1, %v8361_v3 }
 0xf4b   :  { %7619 = vmatprep.subr.bf16.mxu0 %v8359_v1 }
 0xf4e   :  { %7621 = vmatpush3.bf16.msra.mxu0 %v8460_v2 }
 0xf4f   :  { %7622 = vmatprep.subr.bf16.mxu0 %v8359_v1 }
0x101c   :  { %v3902_v38 = vpop.f32.mrb[6].mxu0 }
0x101d   :  { %v3907_v39 = vrot.slane %v3902_v38, 3  ;;  %v3908_v41 = vrot.slane %v3902_v38, 4  ;;  %v7183_v42 = vpop.f32.mrb[7].mxu0 }
0x101f   :  { %v3911_v43 = vadd.f32 %v8534_v24, %v3907_v39  ;;  %v3912_v44 = vadd.f32 %v8532_v23, %v3908_v41 }
0x1021   :  { %8233 = vtanh.f32 %v3911_v43  ;;  %v6439_v48 = vmul.f32 -1.442695, %v3911_v43  ;;  %v6440_v49 = vmul.f32 -1.442695, %v3912_v44 }
0x1022   :  { %8235 = vtanh.f32 %v3912_v44 }
0x1023   :  { %8237 = vpow2.f32 %v6439_v48 }
0x1024   :  { %8239 = vpow2.f32 %v6440_v49 }
0x102b   :  { %v8234_v45 = vpop.eup %8233 }
0x102c   :  { %v8236_v46 = vpop.eup %8235  ;;  %3937 = vrot.lane.b32.xlu1 %v8234_v45, %s8362_s1 }
0x102d   :  { %3939 = vrot.lane.b32.xlu0 %v8236_v46, %s8362_s1  ;;  %v8238_v50 = vpop.eup %8237 }
0x102e   :  { %v8240_v51 = vpop.eup %8239  ;;  %v3919_v52 = vadd.f32 1.0, %v8238_v50 }
0x102f   :  { %v3920_v53 = vadd.f32 1.0, %v8240_v51 }
0x1030   :  { %8241 = vrcp.f32 %v3919_v52 }
0x1031   :  { %8243 = vrcp.f32 %v3920_v53 }
0x103a   :  { %v8242_v54 = vpop.eup %8241 }
0x103b   :  { %v8244_v56 = vpop.eup %8243  ;;  %v3933_v0 = vmul.f32 %v8242_v54, %v3929_v62 }
0x103c   :  { %v3934_v4 = vmul.f32 %v8244_v56, %v3930_v63 }
0x109e   :  { %v3938_v55 = vpop.permute.xlu1 %3937 }
0x109f   :  { %v3940_v57 = vpop.permute.xlu0 %3939  ;;  %v3943_v59 = vmul.f32 %v8242_v54, %v3938_v55 }
0x10a0   :  { %v3944_v61 = vmul.f32 %v8244_v56, %v3940_v57 }
0x10a1   :  { %3947 = vrot.lane.b32.xlu1 %v3943_v59, %s8363_s8 }
0x10a2   :  { %3949 = vrot.lane.b32.xlu0 %v3944_v61, %s8363_s8 }
0x1113   :  { %v3948_v5 = vpop.permute.xlu1 %3947 }
0x1114   :  { %v3950_v6 = vpop.permute.xlu0 %3949  ;;  %v8832_v7 = vadd.f32 %v3948_v5, %v3933_v0 }
0x1115   :  { %v8834_v9 = vadd.f32 %v3950_v6, %v3934_v4 }
0x1116   :  { %8245 = vtanh.f32 %v8832_v7  ;;  %v4484_v57 = vrot.slane %v8832_v7, 7 }
0x1117   :  { %8247 = vtanh.f32 %v8834_v9  ;;  %v4485_v59 = vrot.slane %v8834_v9, 7 }
0x1120   :  { %v8246_v10 = vpop.eup %8245 }
0x1121   :  { %v8248_v16 = vpop.eup %8247  ;;  %3959 = vrot.lane.b32.xlu1 %v8246_v10, %s8362_s1 }
0x1122   :  { %3961 = vrot.lane.b32.xlu0 %v8248_v16, %s8362_s1 }
0x1193   :  { %v3960_v17 = vpop.permute.xlu1 %3959 }
0x1194   :  { %v3962_v18 = vpop.permute.xlu0 %3961  ;;  %v3965_v19 = vmul.f32 %v8242_v54, %v3960_v17 }
0x1195   :  { %v3966_v20 = vmul.f32 %v8244_v56, %v3962_v18 }
0x1196   :  { %v3969_v21 = vrot.slane %v3965_v19, 5 }
0x1197   :  { %v3970_v22 = vrot.slane %v3966_v20, 4 }
0x1199   :  { %v8841_v25 = vsel %vm1197_vm2, %v3970_v22, %v3969_v21 }
0x119a   :  { %3972 = vrot.lane.b32.xlu1 %v8841_v25, %s8363_s8 }
0x120c   :  { %v3973_v26 = vpop.permute.xlu1 %3972 }
0x120d   :  { %v3974_v27 = vsel %vm117_vm0, %v3973_v26, 0 }
0x120e   :  { %v4045_v28 = vand.u32 4294901760, %v3974_v27 }
0x1210   :  { %v4046_v29 = vsub.f32 %v3974_v27, %v4045_v28 }
0x1212   :  { %v4047_v31 = vand.u32 4294901760, %v4046_v29 }
0x1214   :  { %v4048_v32 = vsub.f32 %v4046_v29, %v4047_v31 }
0x1216   :  { %v4049_v33 = vand.u32 4294901760, %v4048_v32 }
0x1218   :  { %7193 = vmatmul.mubr.f32.vlgmr.msra.gmra.mrb[8].mxu1 %v4049_v33 }
0x1219   :  { %7588 = vmatpush3.bf16.msra.mxu1 %v8472_v8  ;;  %7203 = vmatprep.mubr.msk.f32.mxu1 %vm8360_vm1, %v8361_v3 }
0x121a   :  { %7589 = vmatprep.subr.bf16.mxu1 %v8359_v1 }
0x121d   :  { %7591 = vmatpush3.bf16.msra.mxu1 %v8479_v11 }
0x121e   :  { %7592 = vmatprep.subr.bf16.mxu1 %v8359_v1 }
0x1220   :  { %7204 = vmatmul.mubr.f32.vlgmr.msra.gmra.mrb[8].mxu1 %v4045_v28 }
0x1221   :  { %7594 = vmatpush3.bf16.msra.mxu1 %v8487_v12  ;;  %7214 = vmatprep.mubr.msk.f32.mxu1 %vm8360_vm1, %v8361_v3 }
0x1222   :  { %7595 = vmatprep.subr.bf16.mxu1 %v8359_v1 }
0x1225   :  { %7597 = vmatpush3.bf16.msra.mxu1 %v8493_v13 }
0x1226   :  { %7598 = vmatprep.subr.bf16.mxu1 %v8359_v1 }
0x1228   :  { %7215 = vmatmul.mubr.f32.vlgmr.msra.gmra.mrb[8].mxu1 %v4046_v29 }
0x1229   :  { %7600 = vmatpush3.bf16.msra.mxu1 %v8450_v60  ;;  %7225 = vmatprep.mubr.msk.f32.mxu1 %vm8360_vm1, %v8361_v3 }
0x122a   :  { %7601 = vmatprep.subr.bf16.mxu1 %v8359_v1 }
0x122d   :  { %7603 = vmatpush3.bf16.msra.mxu1 %v8460_v2 }
0x122e   :  { %7604 = vmatprep.subr.bf16.mxu1 %v8359_v1 }
0x1230   :  { %7226 = vmatmul.mubr.f32.vlgmr.msra.gmra.mrb[8].mxu1 %v4047_v31 }
0x1231   :  { %7606 = vmatpush3.bf16.msra.mxu1 %v8506_v14  ;;  %7236 = vmatprep.mubr.msk.f32.mxu1 %vm8360_vm1, %v8361_v3 }
0x1232   :  { %7607 = vmatprep.subr.bf16.mxu1 %v8359_v1 }
0x1235   :  { %7609 = vmatpush3.bf16.msra.mxu1 %v8511_v15 }
0x1236   :  { %7610 = vmatprep.subr.bf16.mxu1 %v8359_v1 }
0x1238   :  { %7237 = vmatmul.mubr.f32.vlgmr.msra.gmra.mrb[8].mxu1 %v4045_v28 }
0x1239   :  { %7612 = vmatpush3.bf16.msra.mxu1 %v8450_v60  ;;  %7247 = vmatprep.mubr.msk.f32.mxu1 %vm8360_vm1, %v8361_v3 }
0x123a   :  { %7613 = vmatprep.subr.bf16.mxu1 %v8359_v1 }
0x123d   :  { %7615 = vmatpush3.bf16.msra.mxu1 %v8460_v2 }
0x1240   :  { %7248 = vmatmul.mubr.f32.vlgmr.msra.gmra.mrb[8].mxu1 %v4045_v28 }
0x1313   :  { %v4457_v35 = vpop.f32.mrb[8].mxu1 }
0x1314   :  { %v4462_v36 = vrot.slane %v4457_v35, 2  ;;  %v4463_v37 = vrot.slane %v4457_v35, 3  ;;  %v7249_v38 = vpop.f32.mrb[9].mxu1 }
0x1316   :  { %v4466_v39 = vadd.f32 %v8534_v24, %v4462_v36  ;;  %v4467_v41 = vadd.f32 %v8532_v23, %v4463_v37 }
0x1318   :  { %8249 = vtanh.f32 %v4466_v39  ;;  %v6441_v44 = vmul.f32 -1.442695, %v4466_v39  ;;  %v6442_v45 = vmul.f32 -1.442695, %v4467_v41 }
0x1319   :  { %8251 = vtanh.f32 %v4467_v41 }
0x131a   :  { %8253 = vpow2.f32 %v6441_v44  ;;  %v51_v44 = vld [vmem:[#allocation5 + $0x60] sm:$0xff] }
0x131b   :  { %8255 = vpow2.f32 %v6442_v45 }
0x1322   :  { %v8250_v42 = vpop.eup %8249 }
0x1323   :  { %v8252_v43 = vpop.eup %8251  ;;  %4492 = vrot.lane.b32.xlu0 %v8250_v42, %s8362_s1  ;;  %v52_v42 = vld [vmem:[#allocation5 + $0x68] sm:$0xff] }
0x1324   :  { %4494 = vrot.lane.b32.xlu1 %v8252_v43, %s8362_s1  ;;  %v8254_v46 = vpop.eup %8253  ;;  %v54_v43 = vld [vmem:[#allocation5 + $0x78] sm:$0xff]  ;;  %v5117_v45 = vand.u32 4294901760, %v52_v42 }
0x1325   :  { %v8256_v48 = vpop.eup %8255  ;;  %v4474_v49 = vadd.f32 1.0, %v8254_v46  ;;  %v5121_v46 = vand.u32 4294901760, %v54_v43 }
0x1326   :  { %v4475_v50 = vadd.f32 1.0, %v8256_v48  ;;  %v53_v48 = vld [vmem:[#allocation5 + $0x70] sm:$0xff] }
0x1327   :  { %8257 = vrcp.f32 %v4474_v49  ;;  %v5119_v49 = vand.u32 4294901760, %v51_v44 }
0x1328   :  { %8259 = vrcp.f32 %v4475_v50  ;;  %v56_v50 = vld [vmem:[#allocation5 + $0x88] sm:$0xff] }
0x1331   :  { %v8258_v51 = vpop.eup %8257 }
0x1332   :  { %v8260_v53 = vpop.eup %8259  ;;  %v4488_v61 = vmul.f32 %v8258_v51, %v4484_v57  ;;  %v60_v57 = vld [vmem:[#allocation5 + $0xa8] sm:$0xff] }
0x1333   :  { %v4489_v62 = vmul.f32 %v8260_v53, %v4485_v59  ;;  %v8940_v59 = vpack.c.bf16 %v5121_v46, %v5117_v45 }
0x1335   :  { %9655 = vst [vmem:[#allocation11_spill] sm:$0xff] %v8940_v59  ;;  %7845 = vmatprep.subr.bf16.mxu1 %v8940_v59 }
0x1395   :  { %v4493_v52 = vpop.permute.xlu0 %4492 }
0x1396   :  { %v4495_v54 = vpop.permute.xlu1 %4494  ;;  %v4498_v55 = vmul.f32 %v8258_v51, %v4493_v52  ;;  %v5123_v52 = vand.u32 4294901760, %v53_v48 }
0x1397   :  { %v4499_v56 = vmul.f32 %v8260_v53, %v4495_v54 }
0x1398   :  { %4502 = vrot.lane.b32.xlu0 %v4498_v55, %s8363_s8  ;;  %v55_v55 = vld [vmem:[#allocation5 + $0x80] sm:$0xff] }
0x1399   :  { %4504 = vrot.lane.b32.xlu1 %v4499_v56, %s8363_s8  ;;  %v57_v56 = vld [vmem:[#allocation5 + $0x90] sm:$0xff] }
0x140a   :  { %v4503_v63 = vpop.permute.xlu0 %4502 }
0x140b   :  { %v4505_v0 = vpop.permute.xlu1 %4504  ;;  %v8883_v4 = vadd.f32 %v4503_v63, %v4488_v61  ;;  %v8942_v61 = vsub.f32 %v52_v42, %v5117_v45  ;;  %v62_v63 = vld [vmem:[#allocation5 + $0xb8] sm:$0xff] }
0x140c   :  { %v8885_v5 = vadd.f32 %v4505_v0, %v4489_v62  ;;  %v8946_v62 = vsub.f32 %v51_v44, %v5119_v49  ;;  %v59_v0 = vld [vmem:[#allocation5 + $0xa0] sm:$0xff] }
0x140d   :  { %8261 = vtanh.f32 %v8883_v4 }
0x140e   :  { %8263 = vtanh.f32 %v8885_v5  ;;  %9657 = vst [vmem:[#allocation13_spill] sm:$0xff] %v8946_v62 }
0x1417   :  { %v8262_v6 = vpop.eup %8261 }
0x1418   :  { %v8264_v10 = vpop.eup %8263  ;;  %4514 = vrot.lane.b32.xlu0 %v8262_v6, %s8362_s1  ;;  %v61_v6 = vld [vmem:[#allocation5 + $0xb0] sm:$0xff] }
0x1419   :  { %4516 = vrot.lane.b32.xlu1 %v8264_v10, %s8362_s1  ;;  %v8948_v10 = vpack.c.bf16 %v5123_v52, %v5119_v49 }
0x141b   :  { %9658 = vst [vmem:[#allocation14_spill] sm:$0xff] %v8948_v10  ;;  %7847 = vmatpush1.bf16.msra.mxu1 %v8948_v10 }
0x148a   :  { %v4515_v7 = vpop.permute.xlu0 %4514 }
0x148b   :  { %v4517_v9 = vpop.permute.xlu1 %4516  ;;  %v4520_v16 = vmul.f32 %v8258_v51, %v4515_v7  ;;  %v58_v51 = vld [vmem:[#allocation5 + $0x98] sm:$0xff]  ;;  %v8950_v7 = vsub.f32 %v53_v48, %v5123_v52  ;;  %v71_v52 = vld [vmem:[#allocation5 + $0x100] sm:$0xff] }
0x148c   :  { %v4521_v17 = vmul.f32 %v8260_v53, %v4517_v9  ;;  %v5125_v53 = vand.u32 4294901760, %v56_v50  ;;  %v5129_v54 = vand.u32 4294901760, %v58_v51 }
0x148d   :  { %v4524_v18 = vrot.slane %v4520_v16, 6  ;;  %9659 = vst [vmem:[#allocation15_spill] sm:$0xff] %v8950_v7 }
0x148e   :  { %v4525_v19 = vrot.slane %v4521_v17, 5  ;;  %v8952_v9 = vpack.c.bf16 %v5129_v54, %v5125_v53  ;;  %v8954_v16 = vsub.f32 %v56_v50, %v5125_v53  ;;  %v64_v17 = vld [vmem:[#allocation5 + $0xc8] sm:$0xff] }
0x1490   :  { %v8892_v20 = vsel %vm1197_vm2, %v4525_v19, %v4524_v18  ;;  %9660 = vst [vmem:[#allocation16_spill] sm:$0xff] %v8952_v9  ;;  %9661 = vst [vmem:[#allocation17_spill] sm:$0xff] %v8954_v16  ;;  %v66_v18 = vld [vmem:[#allocation5 + $0xd8] sm:$0xff]  ;;  %v8958_v19 = vsub.f32 %v58_v51, %v5129_v54  ;;  %7849 = vmatprep.subr.bf16.mxu1 %v8952_v9 }
0x1491   :  { %4527 = vrot.lane.b32.xlu0 %v8892_v20, %s8363_s8  ;;  %v74_v51 = vld [vmem:[#allocation5 + $0x118] sm:$0xff] }
0x1492   :  { %9662 = vst [vmem:[#allocation18_spill] sm:$0xff] %v8958_v19 }
0x1503   :  { %v4528_v21 = vpop.permute.xlu0 %4527 }
0x1504   :  { %v4529_v22 = vsel %vm117_vm0, %v4528_v21, 0  ;;  %v5127_v21 = vand.u32 4294901760, %v55_v55 }
0x1505   :  { %v4600_v26 = vand.u32 4294901760, %v4529_v22 }
0x1507   :  { %v4601_v27 = vsub.f32 %v4529_v22, %v4600_v26  ;;  %v5131_v22 = vand.u32 4294901760, %v57_v56 }
0x1509   :  { %v4602_v28 = vand.u32 4294901760, %v4601_v27 }
0x150b   :  { %v4603_v29 = vsub.f32 %v4601_v27, %v4602_v28 }
0x150d   :  { %v4604_v31 = vand.u32 4294901760, %v4603_v29  ;;  %v5139_v29 = vand.u32 4294901760, %v61_v6 }
0x150f   :  { %7259 = vmatmul.mubr.f32.vlgmr.msra.gmra.mrb[8].mxu0 %v4604_v31  ;;  %v5141_v31 = vand.u32 4294901760, %v64_v17 }
0x1510   :  { %7624 = vmatpush3.bf16.msra.mxu0 %v8472_v8  ;;  %7269 = vmatprep.mubr.msk.f32.mxu0 %vm8360_vm1, %v8361_v3 }
0x1511   :  { %7625 = vmatprep.subr.bf16.mxu0 %v8359_v1 }
0x1514   :  { %7627 = vmatpush3.bf16.msra.mxu0 %v8479_v11 }
0x1515   :  { %7628 = vmatprep.subr.bf16.mxu0 %v8359_v1 }
0x1517   :  { %7270 = vmatmul.mubr.f32.vlgmr.msra.gmra.mrb[8].mxu0 %v4600_v26 }
0x1518   :  { %7630 = vmatpush3.bf16.msra.mxu0 %v8487_v12  ;;  %7280 = vmatprep.mubr.msk.f32.mxu0 %vm8360_vm1, %v8361_v3 }
0x1519   :  { %7631 = vmatprep.subr.bf16.mxu0 %v8359_v1 }
0x151c   :  { %7633 = vmatpush3.bf16.msra.mxu0 %v8493_v13 }
0x151d   :  { %7634 = vmatprep.subr.bf16.mxu0 %v8359_v1 }
0x151f   :  { %7281 = vmatmul.mubr.f32.vlgmr.msra.gmra.mrb[8].mxu0 %v4601_v27  ;;  %v5137_v27 = vand.u32 4294901760, %v62_v63 }
0x1520   :  { %7636 = vmatpush3.bf16.msra.mxu0 %v8450_v60  ;;  %7291 = vmatprep.mubr.msk.f32.mxu0 %vm8360_vm1, %v8361_v3 }
0x1521   :  { %7637 = vmatprep.subr.bf16.mxu0 %v8359_v1 }
0x1524   :  { %7639 = vmatpush3.bf16.msra.mxu0 %v8460_v2 }
0x1525   :  { %7640 = vmatprep.subr.bf16.mxu0 %v8359_v1 }
0x1527   :  { %7292 = vmatmul.mubr.f32.vlgmr.msra.gmra.mrb[8].mxu0 %v4602_v28  ;;  %v5135_v28 = vand.u32 4294901760, %v59_v0 }
0x1528   :  { %7642 = vmatpush3.bf16.msra.mxu0 %v8506_v14  ;;  %7302 = vmatprep.mubr.msk.f32.mxu0 %vm8360_vm1, %v8361_v3 }
0x1529   :  { %7643 = vmatprep.subr.bf16.mxu0 %v8359_v1 }
0x152c   :  { %7645 = vmatpush3.bf16.msra.mxu0 %v8511_v15 }
0x152d   :  { %7646 = vmatprep.subr.bf16.mxu0 %v8359_v1 }
0x152f   :  { %7303 = vmatmul.mubr.f32.vlgmr.msra.gmra.mrb[8].mxu0 %v4600_v26 }
0x1530   :  { %7648 = vmatpush3.bf16.msra.mxu0 %v8450_v60  ;;  %7313 = vmatprep.mubr.msk.f32.mxu0 %vm8360_vm1, %v8361_v3 }
0x1531   :  { %7649 = vmatprep.subr.bf16.mxu0 %v8359_v1 }
0x1534   :  { %7651 = vmatpush3.bf16.msra.mxu0 %v8460_v2 }
0x1535   :  { %7653 = vmatprep.subr.bf16.mxu0 %v8940_v59 }
0x1537   :  { %7314 = vmatmul.mubr.f32.vlgmr.msra.gmra.mrb[8].mxu0 %v4600_v26  ;;  %v5133_v26 = vand.u32 4294901760, %v60_v57 }
0x1538   :  { %7655 = vmatpush1.bf16.msra.mxu0 %v8948_v10 }
0x1539   :  { %7657 = vmatprep.subr.bf16.mxu0 %v8952_v9 }
0x160a   :  { %v5012_v8 = vpop.f32.mrb[8].mxu0 }
0x160b   :  { %v5017_v11 = vrot.slane %v5012_v8, 1  ;;  %v5018_v12 = vrot.slane %v5012_v8, 2  ;;  %v7315_v13 = vpop.f32.mrb[9].mxu0  ;;  %v8963_v8 = vpack.c.bf16 %v5131_v22, %v5127_v21 }
0x160c   :  { %v5145_v13 = vand.u32 4294901760, %v66_v18 }
0x160d   :  { %v5021_v14 = vadd.f32 %v8534_v24, %v5017_v11  ;;  %v5022_v15 = vadd.f32 %v8532_v23, %v5018_v12  ;;  %9663 = vst [vmem:[#allocation19_spill] sm:$0xff] %v8963_v8  ;;  %v8965_v11 = vsub.f32 %v55_v55, %v5127_v21  ;;  %v8967_v12 = vsub.f32 %v57_v56, %v5131_v22  ;;  %v9004_v21 = vld [vmem:[#allocation5 + $0x120] sm:$0xff] }
0x160e   :  { %7851 = vmatpush1.bf16.msra.mxu1 %v8963_v8  ;;  %7659 = vmatpush1.bf16.msra.mxu0 %v8963_v8  ;;  %v8986_v42 = vsub.f32 %v66_v18, %v5145_v13  ;;  %v78_v18 = vld [vmem:[#allocation5 + $0x138] sm:$0xff]  ;;  %v9050_v8 = vld [vmem:[#allocation5 + $0x160] sm:$0xff] }
0x160f   :  { %8265 = vtanh.f32 %v5021_v14  ;;  %v6443_v1 = vmul.f32 -1.442695, %v5021_v14  ;;  %v6444_v3 = vmul.f32 -1.442695, %v5022_v15  ;;  %9664 = vst [vmem:[#allocation20_spill] sm:$0xff] %v8965_v11  ;;  %9665 = vst [vmem:[#allocation21_spill] sm:$0xff] %v8967_v12 }
0x1610   :  { %8267 = vtanh.f32 %v5022_v15  ;;  %v63_v14 = vld [vmem:[#allocation5 + $0xc0] sm:$0xff]  ;;  %v65_v15 = vld [vmem:[#allocation5 + $0xd0] sm:$0xff]  ;;  %9673 = vst [vmem:[#allocation29_spill] sm:$0xff] %v8986_v42 }
0x1611   :  { %8269 = vpow2.f32 %v6443_v1  ;;  %v8972_v1 = vsub.f32 %v60_v57, %v5133_v26  ;;  %v5147_v44 = vand.u32 4294901760, %v65_v15  ;;  %v73_v57 = vld [vmem:[#allocation5 + $0x110] sm:$0xff] }
0x1612   :  { %8271 = vpow2.f32 %v6444_v3  ;;  %v8974_v3 = vsub.f32 %v62_v63, %v5137_v27  ;;  %v76_v63 = vld [vmem:[#allocation5 + $0x128] sm:$0xff] }
0x1613   :  { %9667 = vst [vmem:[#allocation23_spill] sm:$0xff] %v8972_v1  ;;  %v8994_v54 = vsub.f32 %v65_v15, %v5147_v44  ;;  %v9018_v15 = vld [vmem:[#allocation5 + $0x148] sm:$0xff] }
0x1614   :  { %9668 = vst [vmem:[#allocation24_spill] sm:$0xff] %v8974_v3 }
0x1615   :  { %9676 = vst [vmem:[#allocation32_spill] sm:$0xff] %v8994_v54 }
0x1619   :  { %v8266_v32 = vpop.eup %8265 }
0x161a   :  { %v8268_v60 = vpop.eup %8267  ;;  %5047 = vrot.lane.b32.xlu1 %v8266_v32, %s8362_s1  ;;  %v68_v32 = vld [vmem:[#allocation5 + $0xe8] sm:$0xff] }
0x161b   :  { %5049 = vrot.lane.b32.xlu0 %v8268_v60, %s8362_s1  ;;  %v8270_v2 = vpop.eup %8269  ;;  %v8970_v60 = vpack.c.bf16 %v5137_v27, %v5133_v26  ;;  %v5149_v45 = vand.u32 4294901760, %v68_v32  ;;  %v5161_v26 = vand.u32 4294901760, %v74_v51 }
0x161c   :  { %v8272_v33 = vpop.eup %8271  ;;  %v5029_v35 = vadd.f32 1.0, %v8270_v2  ;;  %v70_v2 = vld [vmem:[#allocation5 + $0xf8] sm:$0xff] }
0x161d   :  { %v5030_v36 = vadd.f32 1.0, %v8272_v33  ;;  %9666 = vst [vmem:[#allocation22_spill] sm:$0xff] %v8970_v60  ;;  %v67_v33 = vld [vmem:[#allocation5 + $0xe0] sm:$0xff]  ;;  %7853 = vmatprep.subr.bf16.mxu1 %v8970_v60  ;;  %7661 = vmatprep.subr.bf16.mxu0 %v8970_v60  ;;  %v5153_v48 = vand.u32 4294901760, %v70_v2  ;;  %v8996_v55 = vsub.f32 %v68_v32, %v5149_v45  ;;  %v9020_v32 = vsub.f32 %v74_v51, %v5161_v26 }
0x161e   :  { %8273 = vrcp.f32 %v5029_v35  ;;  %v69_v35 = vld [vmem:[#allocation5 + $0xf0] sm:$0xff]  ;;  %v5151_v49 = vand.u32 4294901760, %v67_v33 }
0x161f   :  { %8275 = vrcp.f32 %v5030_v36  ;;  %v8976_v36 = vpack.c.bf16 %v5139_v29, %v5135_v28  ;;  %v5155_v50 = vand.u32 4294901760, %v69_v35  ;;  %9677 = vst [vmem:[#allocation33_spill] sm:$0xff] %v8996_v55  ;;  %9684 = vst [vmem:[#allocation40_spill] sm:$0xff] %v9020_v32 }
0x1621   :  { %9669 = vst [vmem:[#allocation25_spill] sm:$0xff] %v8976_v36  ;;  %7855 = vmatpush1.bf16.msra.mxu1 %v8976_v36  ;;  %7663 = vmatpush1.bf16.msra.mxu0 %v8976_v36  ;;  %v9008_v22 = vsub.f32 %v69_v35, %v5155_v50  ;;  %v5167_v35 = vand.u32 4294901760, %v9004_v21  ;;  %v9036_v36 = vld [vmem:[#allocation5 + $0x168] sm:$0xff]  ;;  %v9040_v51 = vpack.c.bf16 %v5155_v50, %v5151_v49 }
0x1623   :  { %9681 = vst [vmem:[#allocation37_spill] sm:$0xff] %v9008_v22  ;;  %9688 = vst [vmem:[#allocation44_spill] sm:$0xff] %v9040_v51  ;;  %v9045_v60 = vsub.f32 %v9004_v21, %v5167_v35  ;;  %v9061_v21 = vld [vmem:[#allocation5 + $0x170] sm:$0xff] }
0x1625   :  { %9690 = vst [vmem:[#allocation46_spill] sm:$0xff] %v9045_v60 }
0x1628   :  { %v8930_v24 = vpop.eup %8273 }
0x1629   :  { %v8932_v37 = vpop.eup %8275 }
0x168c   :  { %v5048_v23 = vpop.permute.xlu1 %5047 }
0x168d   :  { %v5050_v38 = vpop.permute.xlu0 %5049  ;;  %v5053_v39 = vmul.f32 %v8930_v24, %v5048_v23  ;;  %v8978_v23 = vsub.f32 %v59_v0, %v5135_v28  ;;  %v5159_v28 = vand.u32 4294901760, %v71_v52 }
0x168e   :  { %v5054_v41 = vmul.f32 %v8932_v37, %v5050_v38  ;;  %v8980_v38 = vsub.f32 %v61_v6, %v5139_v29  ;;  %v9000_v6 = vsub.f32 %v70_v2, %v5153_v48  ;;  %v9012_v29 = vld [vmem:[#allocation5 + $0x130] sm:$0xff] }
0x168f   :  { %5057 = vrot.lane.b32.xlu1 %v5053_v39, %s8363_s8  ;;  %9670 = vst [vmem:[#allocation26_spill] sm:$0xff] %v8978_v23  ;;  %v8982_v39 = vsub.f32 %v64_v17, %v5141_v31  ;;  %v9002_v17 = vsub.f32 %v67_v33, %v5151_v49  ;;  %v9022_v2 = vsub.f32 %v71_v52, %v5159_v28  ;;  %v5169_v33 = vand.u32 4294901760, %v78_v18 }
0x1690   :  { %5059 = vrot.lane.b32.xlu0 %v5054_v41, %s8363_s8  ;;  %9671 = vst [vmem:[#allocation27_spill] sm:$0xff] %v8980_v38  ;;  %v72_v41 = vld [vmem:[#allocation5 + $0x108] sm:$0xff]  ;;  %9679 = vst [vmem:[#allocation35_spill] sm:$0xff] %v9000_v6 }
0x1691   :  { %9672 = vst [vmem:[#allocation28_spill] sm:$0xff] %v8982_v39  ;;  %v5157_v56 = vand.u32 4294901760, %v72_v41  ;;  %9680 = vst [vmem:[#allocation36_spill] sm:$0xff] %v9002_v17  ;;  %v9042_v52 = vsub.f32 %v78_v18, %v5169_v33 }
0x1692   :  { %9685 = vst [vmem:[#allocation41_spill] sm:$0xff] %v9022_v2  ;;  %v98_v2 = vld [vmem:[#allocation5 + $0x1d8] sm:$0xff] }
0x1693   :  { %5086 = vrot.lane.b32.xlu1 %v8841_v25, %s8362_s1  ;;  %v8944_v25 = vsub.f32 %v54_v43, %v5121_v46  ;;  %v5143_v43 = vand.u32 4294901760, %v63_v14  ;;  %v8990_v46 = vpack.c.bf16 %v5145_v13, %v5141_v31  ;;  %v9010_v27 = vsub.f32 %v72_v41, %v5157_v56  ;;  %v9025_v41 = vld [vmem:[#allocation5 + $0x158] sm:$0xff]  ;;  %9689 = vst [vmem:[#allocation45_spill] sm:$0xff] %v9042_v52  ;;  %v91_v52 = vld [vmem:[#allocation5 + $0x1a0] sm:$0xff] }
0x1694   :  { %v9016_v31 = vpack.c.bf16 %v5153_v48, %v5149_v45  ;;  %v5163_v13 = vand.u32 4294901760, %v73_v57  ;;  %v5171_v45 = vand.u32 4294901760, %v9012_v29  ;;  %v9034_v48 = vld [vmem:[#allocation5 + $0x150] sm:$0xff]  ;;  %v9054_v9 = vpack.c.bf16 %v5161_v26, %v5157_v56  ;;  %v9070_v56 = vld [vmem:[#allocation5 + $0x188] sm:$0xff]  ;;  %v9072_v26 = vld [vmem:[#allocation5 + $0x198] sm:$0xff] }
0x1695   :  { %9656 = vst [vmem:[#allocation12_spill] sm:$0xff] %v8944_v25  ;;  %9674 = vst [vmem:[#allocation30_spill] sm:$0xff] %v8990_v46  ;;  %v8992_v53 = vsub.f32 %v63_v14, %v5143_v43  ;;  %v8998_v0 = vpack.c.bf16 %v5147_v44, %v5143_v43  ;;  %7857 = vmatprep.subr.bf16.mxu1 %v8990_v46  ;;  %7665 = vmatprep.subr.bf16.mxu0 %v8990_v46  ;;  %v5165_v14 = vand.u32 4294901760, %v76_v63  ;;  %v9027_v43 = vld [vmem:[#allocation5 + $0x140] sm:$0xff] }
0x1696   :  { %9682 = vst [vmem:[#allocation38_spill] sm:$0xff] %v9010_v27  ;;  %9683 = vst [vmem:[#allocation39_spill] sm:$0xff] %v9016_v31  ;;  %v9029_v44 = vsub.f32 %v73_v57, %v5163_v13  ;;  %v5173_v57 = vand.u32 4294901760, %v9018_v15  ;;  %v9057_v49 = vsub.f32 %v9012_v29, %v5171_v45  ;;  %v5177_v50 = vand.u32 4294901760, %v9025_v41  ;;  %v102_v27 = vld [vmem:[#allocation5 + $0x1f8] sm:$0xff] }
0x1697   :  { %9675 = vst [vmem:[#allocation31_spill] sm:$0xff] %v8992_v53  ;;  %9678 = vst [vmem:[#allocation34_spill] sm:$0xff] %v8998_v0  ;;  %v9031_v46 = vsub.f32 %v76_v63, %v5165_v14  ;;  %7859 = vmatpush1.bf16.msra.mxu1 %v8998_v0  ;;  %7667 = vmatpush1.bf16.msra.mxu0 %v8998_v0  ;;  %v9048_v63 = vld [vmem:[#allocation5 + $0x178] sm:$0xff]  ;;  %v9562_v18 = vand.u32 4294901760, %v9027_v43  ;;  %v9063_v0 = vpack.c.bf16 %v5163_v13, %v5159_v28 }
0x1698   :  { %9686 = vst [vmem:[#allocation42_spill] sm:$0xff] %v9029_v44  ;;  %7861 = vmatprep.subr.bf16.mxu1 %v9016_v31  ;;  %7669 = vmatprep.subr.bf16.mxu0 %v9016_v31  ;;  %9691 = vst [vmem:[#allocation47_spill] sm:$0xff] %v9054_v9  ;;  %v9066_v10 = vsub.f32 %v9018_v15, %v5173_v57  ;;  %v5179_v59 = vand.u32 4294901760, %v9034_v48  ;;  %v9075_v29 = vsub.f32 %v9025_v41, %v5177_v50  ;;  %v9084_v15 = vld [vmem:[#allocation5 + $0x180] sm:$0xff] }
0x1699   :  { %9687 = vst [vmem:[#allocation43_spill] sm:$0xff] %v9031_v46  ;;  %9692 = vst [vmem:[#allocation48_spill] sm:$0xff] %v9057_v49  ;;  %v9080_v49 = vsub.f32 %v9027_v43, %v9562_v18  ;;  %v5185_v28 = vand.u32 4294901760, %v9048_v63  ;;  %v9090_v31 = vpack.c.bf16 %v5169_v33, %v5165_v14  ;;  %v9699_v18 = vand.u32 4294901760, %v9036_v36 }
0x169a   :  { %9693 = vst [vmem:[#allocation49_spill] sm:$0xff] %v9063_v0  ;;  %9694 = vst [vmem:[#allocation50_spill] sm:$0xff] %v9066_v10  ;;  %v9086_v10 = vld [vmem:[#allocation5 + $0x190] sm:$0xff]  ;;  %v9093_v41 = vsub.f32 %v9034_v48, %v5179_v59  ;;  %v5187_v13 = vand.u32 4294901760, %v9061_v21  ;;  %v9702_v14 = vand.u32 4294901760, %v9050_v8  ;;  %v5189_v48 = vand.u32 4294901760, %v9070_v56 }
0x169b   :  { %9695 = vst [vmem:[#allocation51_spill] sm:$0xff] %v9075_v29  ;;  %9696 = vst [vmem:[#allocation52_spill] sm:$0xff] %v9080_v49  ;;  %7863 = vmatpush1.bf16.msra.mxu1 %v9040_v51  ;;  %7671 = vmatpush1.bf16.msra.mxu0 %v9040_v51  ;;  %v9098_v49 = vsub.f32 %v9036_v36, %v9699_v18  ;;  %v9101_v29 = vld [vmem:[#allocation5 + $0x1a8] sm:$0xff]  ;;  %v9106_v51 = vsub.f32 %v9048_v63, %v5185_v28  ;;  %v5193_v18 = vand.u32 4294901760, %v9072_v26  ;;  %v93_v63 = vld [vmem:[#allocation5 + $0x1b0] sm:$0xff] }
0x169c   :  { %9697 = vst [vmem:[#allocation53_spill] sm:$0xff] %v9090_v31  ;;  %9698 = vst [vmem:[#allocation54_spill] sm:$0xff] %v9093_v41  ;;  %7865 = vmatprep.subr.bf16.mxu1 %v9054_v9  ;;  %7673 = vmatprep.subr.bf16.mxu0 %v9054_v9  ;;  %v9111_v33 = vsub.f32 %v9050_v8, %v9702_v14  ;;  %v9116_v41 = vsub.f32 %v9061_v21, %v5187_v13  ;;  %v5191_v60 = vand.u32 4294901760, %v9084_v15  ;;  %v95_v21 = vld [vmem:[#allocation5 + $0x1c0] sm:$0xff] }
0x169d   :  { %9700 = vst [vmem:[#allocation55_spill] sm:$0xff] %v9098_v49  ;;  %9701 = vst [vmem:[#allocation56_spill] sm:$0xff] %v9106_v51  ;;  %v94_v49 = vld [vmem:[#allocation5 + $0x1b8] sm:$0xff]  ;;  %v5195_v9 = vand.u32 4294901760, %v9086_v10  ;;  %v96_v51 = vld [vmem:[#allocation5 + $0x1c8] sm:$0xff]  ;;  %v9120_v46 = vpack.c.bf16 %v5171_v45, %v5167_v35  ;;  %v9123_v14 = vsub.f32 %v9070_v56, %v5189_v48  ;;  %v5197_v44 = vand.u32 4294901760, %v9101_v29 }
0x169e   :  { %9703 = vst [vmem:[#allocation57_spill] sm:$0xff] %v9111_v33  ;;  %9704 = vst [vmem:[#allocation58_spill] sm:$0xff] %v9116_v41  ;;  %v9126_v33 = vsub.f32 %v9072_v26, %v5193_v18  ;;  %v9131_v41 = vpack.c.bf16 %v5177_v50, %v5173_v57  ;;  %v9134_v32 = vsub.f32 %v9084_v15, %v5191_v60  ;;  %v5201_v45 = vand.u32 4294901760, %v94_v49 }
0x169f   :  { %9705 = vst [vmem:[#allocation59_spill] sm:$0xff] %v9120_v46  ;;  %9706 = vst [vmem:[#allocation60_spill] sm:$0xff] %v9123_v14  ;;  %7867 = vmatpush1.bf16.msra.mxu1 %v9063_v0  ;;  %7675 = vmatpush1.bf16.msra.mxu0 %v9063_v0  ;;  %v9137_v35 = vsub.f32 %v9086_v10, %v5195_v9  ;;  %v9142_v56 = vsub.f32 %v9101_v29, %v5197_v44  ;;  %v5199_v26 = vand.u32 4294901760, %v91_v52  ;;  %v97_v0 = vld [vmem:[#allocation5 + $0x1d0] sm:$0xff] }
0x16a0   :  { %9707 = vst [vmem:[#allocation61_spill] sm:$0xff] %v9126_v33  ;;  %9708 = vst [vmem:[#allocation62_spill] sm:$0xff] %v9131_v41  ;;  %7869 = vmatprep.subr.bf16.mxu1 %v9090_v31  ;;  %7677 = vmatprep.subr.bf16.mxu0 %v9090_v31  ;;  %v5203_v33 = vand.u32 4294901760, %v93_v63  ;;  %v5205_v14 = vand.u32 4294901760, %v96_v51  ;;  %v9144_v57 = vsub.f32 %v94_v49, %v5201_v45  ;;  %v5209_v50 = vand.u32 4294901760, %v98_v2 }
0x16a1   :  { %9709 = vst [vmem:[#allocation63_spill] sm:$0xff] %v9134_v32  ;;  %9710 = vst [vmem:[#allocation64_spill] sm:$0xff] %v9137_v35  ;;  %v5207_v15 = vand.u32 4294901760, %v95_v21  ;;  %v100_v32 = vld [vmem:[#allocation5 + $0x1e8] sm:$0xff]  ;;  %v9146_v10 = vsub.f32 %v91_v52, %v5199_v26  ;;  %v9714_v29 = vand.u32 4294901760, %v9027_v43 }
0x16a2   :  { %9711 = vst [vmem:[#allocation65_spill] sm:$0xff] %v9142_v56  ;;  %9712 = vst [vmem:[#allocation66_spill] sm:$0xff] %v9144_v57  ;;  %v9148_v35 = vsub.f32 %v93_v63, %v5203_v33  ;;  %v9150_v22 = vsub.f32 %v96_v51, %v5205_v14  ;;  %v9158_v49 = vsub.f32 %v98_v2, %v5209_v50  ;;  %v5211_v57 = vand.u32 4294901760, %v97_v0 }
0x16a3   :  { %7871 = vmatpush1.bf16.msra.mxu1 %v9120_v46  ;;  %7679 = vmatpush1.bf16.msra.mxu0 %v9120_v46  ;;  %v9156_v31 = vpack.c.bf16 %v5179_v59, %v9714_v29  ;;  %v9160_v56 = vsub.f32 %v95_v21, %v5207_v15  ;;  %v9716_v51 = vand.u32 4294901760, %v9036_v36  ;;  %v5213_v63 = vand.u32 4294901760, %v100_v32 }
0x16a4   :  { %9713 = vst [vmem:[#allocation67_spill] sm:$0xff] %v9150_v22  ;;  %7873 = vmatprep.subr.bf16.mxu1 %v9131_v41  ;;  %7681 = vmatprep.subr.bf16.mxu0 %v9131_v41  ;;  %v5217_v22 = vand.u32 4294901760, %v102_v27  ;;  %v9168_v46 = vsub.f32 %v97_v0, %v5211_v57  ;;  %v9718_v2 = vand.u32 4294901760, %v9050_v8  ;;  %v9182_v36 = vpack.c.bf16 %v5193_v18, %v5189_v48 }
0x16a5   :  { %9715 = vst [vmem:[#allocation68_spill] sm:$0xff] %v9156_v31  ;;  %v9166_v52 = vpack.c.bf16 %v5185_v28, %v9716_v51  ;;  %v9170_v43 = vsub.f32 %v100_v32, %v5213_v63  ;;  %v9186_v0 = vpack.c.bf16 %v5195_v9, %v5191_v60  ;;  %v9194_v8 = vpack.c.bf16 %v5203_v33, %v5199_v26  ;;  %v99_v28 = vld [vmem:[#allocation5 + $0x1e0] sm:$0xff] }
0x16a6   :  { %v9172_v59 = vsub.f32 %v102_v27, %v5217_v22  ;;  %v9178_v21 = vpack.c.bf16 %v5187_v13, %v9718_v2  ;;  %9720 = vst [vmem:[#allocation71_spill] sm:$0xff] %v9182_v36  ;;  %v9190_v27 = vpack.c.bf16 %v5201_v45, %v5197_v44  ;;  %v9198_v32 = vpack.c.bf16 %v5209_v50, %v5205_v14  ;;  %v101_v13 = vld [vmem:[#allocation5 + $0x1f0] sm:$0xff]  ;;  %v106_v50 = vld [vmem:[#allocation5 + $0x218] sm:$0xff] }
0x16a7   :  { %9717 = vst [vmem:[#allocation69_spill] sm:$0xff] %v9166_v52  ;;  %7875 = vmatpush1.bf16.msra.mxu1 %v9156_v31  ;;  %7683 = vmatpush1.bf16.msra.mxu0 %v9156_v31  ;;  %9721 = vst [vmem:[#allocation72_spill] sm:$0xff] %v9186_v0  ;;  %v9202_v9 = vpack.c.bf16 %v5211_v57, %v5207_v15  ;;  %v9206_v60 = vpack.c.bf16 %v5217_v22, %v5213_v63  ;;  %v5039_v44 = vrot.slane %v8883_v4, 7  ;;  %v104_v57 = vld [vmem:[#allocation5 + $0x208] sm:$0xff]  ;;  %v103_v4 = vld [vmem:[#allocation5 + $0x200] sm:$0xff] }
0x16a8   :  { %9719 = vst [vmem:[#allocation70_spill] sm:$0xff] %v9178_v21  ;;  %7877 = vmatprep.subr.bf16.mxu1 %v9166_v52  ;;  %7685 = vmatprep.subr.bf16.mxu0 %v9166_v52  ;;  %9722 = vst [vmem:[#allocation73_spill] sm:$0xff] %v9190_v27  ;;  %v5040_v33 = vrot.slane %v8885_v5, 7  ;;  %v5215_v48 = vand.u32 4294901760, %v99_v28  ;;  %v5219_v18 = vand.u32 4294901760, %v101_v13  ;;  %v5221_v51 = vand.u32 4294901760, %v104_v57 }
0x16a9   :  { %9723 = vst [vmem:[#allocation74_spill] sm:$0xff] %v9194_v8  ;;  %9724 = vst [vmem:[#allocation75_spill] sm:$0xff] %v9198_v32  ;;  %v5043_v14 = vmul.f32 %v8930_v24, %v5039_v44  ;;  %v5225_v63 = vand.u32 4294901760, %v106_v50  ;;  %v105_v2 = vld [vmem:[#allocation5 + $0x210] sm:$0xff]  ;;  %v5223_v5 = vand.u32 4294901760, %v103_v4  ;;  %v114_v52 = vld [vmem:[#allocation5 + $0x258] sm:$0xff] }
0x16aa   :  { %9725 = vst [vmem:[#allocation76_spill] sm:$0xff] %v9202_v9  ;;  %9726 = vst [vmem:[#allocation77_spill] sm:$0xff] %v9206_v60  ;;  %v5044_v22 = vmul.f32 %v8932_v37, %v5040_v33  ;;  %v9216_v26 = vpack.c.bf16 %v5219_v18, %v5215_v48  ;;  %v5227_v44 = vand.u32 4294901760, %v105_v2 }
0x16ab   :  { %7879 = vmatpush1.bf16.msra.mxu1 %v9178_v21  ;;  %7687 = vmatpush1.bf16.msra.mxu0 %v9178_v21  ;;  %v9220_v33 = vpack.c.bf16 %v5225_v63, %v5221_v51  ;;  %v112_v21 = vld [vmem:[#allocation5 + $0x248] sm:$0xff] }
0x16ac   :  { %7881 = vmatprep.subr.bf16.mxu1 %v9182_v36  ;;  %7689 = vmatprep.subr.bf16.mxu0 %v9182_v36  ;;  %9727 = vst [vmem:[#allocation78_spill] sm:$0xff] %v9216_v26 }
0x16ad   :  { %9728 = vst [vmem:[#allocation79_spill] sm:$0xff] %v9220_v33 }
0x16af   :  { %7883 = vmatpush1.bf16.msra.mxu1 %v9186_v0  ;;  %7691 = vmatpush1.bf16.msra.mxu0 %v9186_v0  ;;  %v9232_v0 = vsub.f32 %v106_v50, %v5225_v63  ;;  %v9242_v50 = vsub.f32 %v103_v4, %v5223_v5 }
0x16b0   :  { %7885 = vmatprep.subr.bf16.mxu1 %v9190_v27  ;;  %7693 = vmatprep.subr.bf16.mxu0 %v9190_v27  ;;  %v9226_v27 = vsub.f32 %v99_v28, %v5215_v48  ;;  %v5241_v48 = vand.u32 4294901760, %v114_v52 }
0x16b1   :  { %9732 = vst [vmem:[#allocation83_spill] sm:$0xff] %v9232_v0 }
0x16b3   :  { %7887 = vmatpush1.bf16.msra.mxu1 %v9194_v8  ;;  %7695 = vmatpush1.bf16.msra.mxu0 %v9194_v8  ;;  %v110_v8 = vld [vmem:[#allocation5 + $0x238] sm:$0xff] }
0x16b4   :  { %7889 = vmatprep.subr.bf16.mxu1 %v9198_v32  ;;  %7697 = vmatprep.subr.bf16.mxu0 %v9198_v32  ;;  %v108_v32 = vld [vmem:[#allocation5 + $0x228] sm:$0xff] }
0x16b7   :  { %7891 = vmatpush1.bf16.msra.mxu1 %v9202_v9  ;;  %7699 = vmatpush1.bf16.msra.mxu0 %v9202_v9  ;;  %v9222_v9 = vpack.c.bf16 %v5227_v44, %v5223_v5 }
0x16b8   :  { %7893 = vmatprep.subr.bf16.mxu1 %v9206_v60  ;;  %7701 = vmatprep.subr.bf16.mxu0 %v9206_v60 }
0x16b9   :  { %9729 = vst [vmem:[#allocation80_spill] sm:$0xff] %v9222_v9 }
0x16bb   :  { %7895 = vmatpush1.bf16.msra.mxu1 %v9216_v26  ;;  %7703 = vmatpush1.bf16.msra.mxu0 %v9216_v26  ;;  %v9228_v26 = vsub.f32 %v101_v13, %v5219_v18  ;;  %v5237_v13 = vand.u32 4294901760, %v112_v21  ;;  %v111_v18 = vld [vmem:[#allocation5 + $0x240] sm:$0xff] }
0x16bc   :  { %7897 = vmatprep.subr.bf16.mxu1 %v9220_v33  ;;  %7705 = vmatprep.subr.bf16.mxu0 %v9220_v33  ;;  %v5239_v41 = vand.u32 4294901760, %v111_v18 }
0x16bd   :  { %9730 = vst [vmem:[#allocation81_spill] sm:$0xff] %v9228_v26  ;;  %v9251_v31 = vpack.c.bf16 %v5241_v48, %v5237_v13 }
0x16bf   :  { %7899 = vmatpush1.bf16.msra.mxu1 %v9222_v9  ;;  %7707 = vmatpush1.bf16.msra.mxu0 %v9222_v9  ;;  %9735 = vst [vmem:[#allocation86_spill] sm:$0xff] %v9251_v31 }
0x1701   :  { %v5058_v45 = vpop.permute.xlu1 %5057 }
0x1702   :  { %v5060_v15 = vpop.permute.xlu0 %5059  ;;  %v5063_v29 = vadd.f32 %v5058_v45, %v5043_v14  ;;  %v5229_v14 = vand.u32 4294901760, %v108_v32  ;;  %v107_v45 = vld [vmem:[#allocation5 + $0x220] sm:$0xff] }
0x1703   :  { %v5064_v60 = vadd.f32 %v5060_v15, %v5044_v22  ;;  %v5233_v22 = vand.u32 4294901760, %v110_v8  ;;  %v109_v15 = vld [vmem:[#allocation5 + $0x230] sm:$0xff]  ;;  %v5231_v36 = vand.u32 4294901760, %v107_v45 }
0x1704   :  { %8277 = vtanh.f32 %v5063_v29  ;;  %v9230_v29 = vsub.f32 %v104_v57, %v5221_v51  ;;  %v5235_v33 = vand.u32 4294901760, %v109_v15  ;;  %v113_v57 = vld [vmem:[#allocation5 + $0x250] sm:$0xff]  ;;  %v9244_v51 = vsub.f32 %v105_v2, %v5227_v44 }
0x1705   :  { %8279 = vtanh.f32 %v5064_v60  ;;  %v9235_v60 = vpack.c.bf16 %v5233_v22, %v5229_v14  ;;  %v9246_v63 = vsub.f32 %v108_v32, %v5229_v14  ;;  %v9248_v9 = vsub.f32 %v110_v8, %v5233_v22 }
0x1706   :  { %9731 = vst [vmem:[#allocation82_spill] sm:$0xff] %v9230_v29  ;;  %v9239_v28 = vpack.c.bf16 %v5235_v33, %v5231_v36  ;;  %v5264_v32 = vand.u32 4294901760, %v8942_v61  ;;  %v5276_v8 = vand.u32 4294901760, %v8944_v25  ;;  %v9261_v2 = vsub.f32 %v107_v45, %v5231_v36 }
0x1707   :  { %9733 = vst [vmem:[#allocation84_spill] sm:$0xff] %v9235_v60  ;;  %7901 = vmatprep.subr.bf16.mxu1 %v9235_v60  ;;  %7709 = vmatprep.subr.bf16.mxu0 %v9235_v60  ;;  %v5243_v60 = vand.u32 4294901760, %v113_v57  ;;  %v9263_v5 = vsub.f32 %v109_v15, %v5235_v33  ;;  %v9265_v44 = vsub.f32 %v112_v21, %v5237_v13  ;;  %v5087_v33 = vpop.permute.xlu1 %5086 }
0x1708   :  { %9734 = vst [vmem:[#allocation85_spill] sm:$0xff] %v9239_v28  ;;  %7903 = vmatpush1.bf16.msra.mxu1 %v9239_v28  ;;  %7711 = vmatpush1.bf16.msra.mxu0 %v9239_v28  ;;  %v9267_v14 = vsub.f32 %v114_v52, %v5241_v48  ;;  %v9270_v22 = vsub.f32 %v111_v18, %v5239_v41  ;;  %v5282_v48 = vand.u32 4294901760, %v8950_v7 }
0x1709   :  { %7905 = vmatprep.subr.bf16.mxu1 %v9251_v31  ;;  %v9255_v29 = vpack.c.bf16 %v5243_v60, %v5239_v41  ;;  %7713 = vmatprep.subr.bf16.mxu0 %v9251_v31  ;;  %v9272_v31 = vsub.f32 %v113_v57, %v5243_v60  ;;  %v7908_v28 = vpack.c.bf16 %v5276_v8, %v5264_v32 }
0x170a   :  { %v5265_v36 = vsub.f32 %v8942_v61, %v5264_v32 }
0x170b   :  { %9736 = vst [vmem:[#allocation87_spill] sm:$0xff] %v9255_v29 }
0x170c   :  { %7907 = vmatpush1.bf16.msra.mxu1 %v9255_v29  ;;  %7715 = vmatpush1.bf16.msra.mxu0 %v9255_v29  ;;  %v5266_v52 = vand.u32 4294901760, %v5265_v36 }
0x170d   :  { %7909 = vmatprep.subr.bf16.mxu1 %v7908_v28 }
0x170e   :  { %v8278_v0 = vpop.eup %8277 }
0x170f   :  { %v8280_v4 = vpop.eup %8279  ;;  %5069 = vrot.lane.b32.xlu1 %v8278_v0, %s8362_s1  ;;  %v5277_v0 = vsub.f32 %v8944_v25, %v5276_v8  ;;  %v5288_v8 = vand.u32 4294901760, %v8954_v16 }
0x1710   :  { %5071 = vrot.lane.b32.xlu0 %v8280_v4, %s8362_s1 }
0x1711   :  { %v5278_v21 = vand.u32 4294901760, %v5277_v0  ;;  %v5283_v0 = vsub.f32 %v8950_v7, %v5282_v48  ;;  %v5318_v7 = vand.u32 4294901760, %v8978_v23 }
0x1713   :  { %5089 = vrot.lane.b32.xlu1 %v8892_v20, %s8364_s9  ;;  %v7716_v41 = vpack.c.bf16 %v5278_v21, %v5266_v52  ;;  %v5270_v20 = vand.u32 4294901760, %v8946_v62 }
0x1714   :  { %5078 = vrot.lane.b32.xlu0 %v8609_v47, %s8362_s1  ;;  %v5103_v47 = vsel %vm117_vm0, %v8784_v30, %v5087_v33  ;;  %v5294_v30 = vand.u32 4294901760, %v8965_v11  ;;  %v5306_v33 = vand.u32 4294901760, %v8967_v12 }
0x1715   :  { %7717 = vmatprep.subr.bf16.mxu0 %v7716_v41  ;;  %v5271_v36 = vsub.f32 %v8946_v62, %v5270_v20 }
0x1718   :  { %5081 = vrot.lane.b32.xlu0 %v8667_v40, %s8364_s9 }
0x1781   :  { %v5070_v45 = vpop.permute.xlu1 %5069 }
0x1782   :  { %v5072_v15 = vpop.permute.xlu0 %5071  ;;  %v5075_v60 = vmul.f32 %v8930_v24, %v5070_v45  ;;  %v5300_v24 = vand.u32 4294901760, %v8958_v19  ;;  %v5289_v45 = vsub.f32 %v8954_v16, %v5288_v8 }
0x1783   :  { %v5076_v13 = vmul.f32 %v8932_v37, %v5072_v15 }
0x1784   :  { %v5094_v28 = vrot.slane %v5075_v60, 7  ;;  %v5301_v15 = vsub.f32 %v8958_v19, %v5300_v24  ;;  %v7912_v29 = vpack.c.bf16 %v5300_v24, %v5288_v8  ;;  %v7914_v19 = vpack.c.bf16 %v5306_v33, %v5294_v30 }
0x1785   :  { %v5095_v18 = vrot.slane %v5076_v13, 6  ;;  %v5090_v57 = vpop.permute.xlu1 %5089 }
0x1786   :  { %v5079_v40 = vpop.permute.xlu0 %5078  ;;  %v5104_v32 = vsel %vm5099_vm3, %v5103_v47, %v5090_v57  ;;  %v5284_v57 = vand.u32 4294901760, %v5283_v0  ;;  %v5302_v16 = vand.u32 4294901760, %v5301_v15 }
0x1787   :  { %v5096_v37 = vsel %vm1197_vm2, %v5095_v18, %v5094_v28  ;;  %v5098_v21 = vsel %vm117_vm0, %v8552_v58, %v5079_v40  ;;  %v5312_v28 = vand.u32 4294901760, %v8972_v1  ;;  %v5272_v18 = vand.u32 4294901760, %v5271_v36 }
0x1788   :  { %v5105_v4 = vsel %vm5101_vm4, %v5104_v32, %v5096_v37  ;;  %v5324_v58 = vand.u32 4294901760, %v8974_v3  ;;  %v7910_v37 = vpack.c.bf16 %v5282_v48, %v5270_v20  ;;  %v5307_v36 = vsub.f32 %v8967_v12, %v5306_v33 }
0x1789   :  { %v9295_v52 = vand.u32 4294901760, %v5105_v4  ;;  %v5313_v0 = vsub.f32 %v8972_v1, %v5312_v28  ;;  %v5330_v20 = vand.u32 4294901760, %v8980_v38  ;;  %v5342_v33 = vand.u32 4294901760, %v8992_v53 }
0x178a   :  { %v5082_v41 = vpop.permute.xlu0 %5081  ;;  %v5325_v48 = vsub.f32 %v8974_v3, %v5324_v58  ;;  %v7916_v15 = vpack.c.bf16 %v5324_v58, %v5312_v28  ;;  %v5308_v1 = vand.u32 4294901760, %v5307_v36  ;;  %v5360_v28 = vand.u32 4294901760, %v8996_v55 }
0x178b   :  { %9737 = vst [vmem:[#allocation88_spill] sm:$0xff] %v9295_v52  ;;  %v9304_v60 = vsub.f32 %v5105_v4, %v9295_v52  ;;  %v5100_v13 = vsel %vm5099_vm3, %v5098_v21, %v5082_v41  ;;  %v5290_v4 = vand.u32 4294901760, %v5289_v45  ;;  %v5295_v21 = vsub.f32 %v8965_v11, %v5294_v30 }
0x178c   :  { %v5102_v47 = vsel %vm5101_vm4, %v5100_v13, %v8725_v34  ;;  %v7718_v13 = vpack.c.bf16 %v5284_v57, %v5272_v18  ;;  %v5336_v30 = vand.u32 4294901760, %v8982_v39  ;;  %v5348_v45 = vand.u32 4294901760, %v8986_v42 }
0x178d   :  { %9738 = vst [vmem:[#allocation89_spill] sm:$0xff] %v9304_v60  ;;  %v9311_v40 = vand.u32 4294901760, %v5102_v47  ;;  %v5247_v32 = vand.u32 4294901760, %v9304_v60  ;;  %v7720_v57 = vpack.c.bf16 %v5302_v16, %v5290_v4  ;;  %v5314_v3 = vand.u32 4294901760, %v5313_v0  ;;  %v9741_v0 = vld [vmem:[#allocation37_spill] sm:$0xff] }
0x178e   :  { %v5331_v12 = vsub.f32 %v8980_v38, %v5330_v20  ;;  %v5372_v58 = vand.u32 4294901760, %v9000_v6  ;;  %v5337_v11 = vsub.f32 %v8982_v39, %v5336_v30  ;;  %v5349_v16 = vsub.f32 %v8986_v42, %v5348_v45 }
0x178f   :  { %9739 = vst [vmem:[#allocation90_spill] sm:$0xff] %v9311_v40  ;;  %v9316_v41 = vsub.f32 %v5102_v47, %v9311_v40  ;;  %5989 = vmatprep.mubr.f32.mxu1 %v5247_v32  ;;  %v5248_v34 = vsub.f32 %v9304_v60, %v5247_v32  ;;  %v5296_v47 = vand.u32 4294901760, %v5295_v21  ;;  %v5354_v32 = vand.u32 4294901760, %v8994_v54 }
0x1790   :  { %v5343_v4 = vsub.f32 %v8992_v53, %v5342_v33  ;;  %v5366_v36 = vand.u32 4294901760, %v9002_v17  ;;  %v7918_v38 = vpack.c.bf16 %v5330_v20, %v5318_v7  ;;  %v5332_v39 = vand.u32 4294901760, %v5331_v12 }
0x1791   :  { %9740 = vst [vmem:[#allocation91_spill] sm:$0xff] %v9316_v41  ;;  %v5249_v8 = vand.u32 4294901760, %v5248_v34  ;;  %v5253_v24 = vand.u32 4294901760, %v9316_v41  ;;  %v5319_v34 = vsub.f32 %v8978_v23, %v5318_v7  ;;  %v9742_v23 = vld [vmem:[#allocation38_spill] sm:$0xff]  ;;  %v5361_v42 = vsub.f32 %v8996_v55, %v5360_v28 }
0x1792   :  { %v5384_v60 = vand.u32 4294901760, %v9742_v23  ;;  %v5373_v53 = vsub.f32 %v9000_v6, %v5372_v58  ;;  %v7920_v62 = vpack.c.bf16 %v5348_v45, %v5336_v30  ;;  %v5344_v7 = vand.u32 4294901760, %v5343_v4  ;;  %v9747_v4 = vld [vmem:[#allocation45_spill] sm:$0xff] }
0x1793   :  { %5250 = vmatprep.mubr.f32.mxu0 %v5249_v8  ;;  %5993 = vmatmul.mubr.f32.vlgmr.msra.gmra.mrb[10].mxu1 %v5253_v24  ;;  %v5254_v18 = vsub.f32 %v9316_v41, %v5253_v24  ;;  %v5326_v8 = vand.u32 4294901760, %v5325_v48  ;;  %v5378_v24 = vand.u32 4294901760, %v9741_v0  ;;  %v7722_v41 = vpack.c.bf16 %v5308_v1, %v5296_v47 }
0x1794   :  { %7911 = vmatpush1.bf16.msra.mxu1 %v7910_v37  ;;  %6256 = vmatprep.mubr.f32.mxu1 %v9295_v52  ;;  %v5355_v37 = vsub.f32 %v8994_v54, %v5354_v32  ;;  %v5320_v48 = vand.u32 4294901760, %v5319_v34  ;;  %v5350_v1 = vand.u32 4294901760, %v5349_v16  ;;  %v5367_v47 = vsub.f32 %v9002_v17, %v5366_v36  ;;  %v9745_v34 = vld [vmem:[#allocation42_spill] sm:$0xff] }
0x1795   :  { %7913 = vmatprep.subr.bf16.mxu1 %v7912_v29  ;;  %v5255_v21 = vand.u32 4294901760, %v5254_v18  ;;  %v9743_v29 = vld [vmem:[#allocation40_spill] sm:$0xff]  ;;  %v7724_v54 = vpack.c.bf16 %v5326_v8, %v5314_v3  ;;  %v5402_v55 = vand.u32 4294901760, %v9745_v34  ;;  %v5385_v6 = vsub.f32 %v9742_v23, %v5384_v60  ;;  %v9746_v8 = vld [vmem:[#allocation43_spill] sm:$0xff] }
0x1796   :  { %v5396_v18 = vand.u32 4294901760, %v9743_v29  ;;  %v5356_v20 = vand.u32 4294901760, %v5355_v37  ;;  %v7726_v3 = vpack.c.bf16 %v5332_v39, %v5320_v48  ;;  %v5362_v30 = vand.u32 4294901760, %v5361_v42 }
0x1797   :  { %5256 = vmatmul.mubr.f32.vlgmr.msra.gmra.mrb[10].mxu0 %v5255_v21  ;;  %v5338_v21 = vand.u32 4294901760, %v5337_v11  ;;  %v7922_v11 = vpack.c.bf16 %v5354_v32, %v5342_v33  ;;  %v5374_v45 = vand.u32 4294901760, %v5373_v53  ;;  %v5408_v16 = vand.u32 4294901760, %v9746_v8  ;;  %v9748_v53 = vld [vmem:[#allocation46_spill] sm:$0xff] }
0x1798   :  { %7719 = vmatpush1.bf16.msra.mxu0 %v7718_v13  ;;  %7915 = vmatpush1.bf16.msra.mxu1 %v7914_v19  ;;  %v5379_v19 = vsub.f32 %v9741_v0, %v5378_v24  ;;  %v9744_v13 = vld [vmem:[#allocation41_spill] sm:$0xff]  ;;  %v5420_v37 = vand.u32 4294901760, %v9747_v4  ;;  %v7730_v0 = vpack.c.bf16 %v5356_v20, %v5344_v7  ;;  %v7926_v17 = vpack.c.bf16 %v5378_v24, %v5366_v36  ;;  %v9753_v7 = vld [vmem:[#allocation54_spill] sm:$0xff] }
0x1799   :  { %5647 = vmatprep.mubr.f32.mxu0 %v9295_v52  ;;  %7721 = vmatprep.subr.bf16.mxu0 %v7720_v57  ;;  %v5390_v12 = vand.u32 4294901760, %v9744_v13  ;;  %v5397_v52 = vsub.f32 %v9743_v29, %v5396_v18  ;;  %v7924_v57 = vpack.c.bf16 %v5372_v58, %v5360_v28  ;;  %v5368_v40 = vand.u32 4294901760, %v5367_v47  ;;  %v9751_v58 = vld [vmem:[#allocation51_spill] sm:$0xff] }
0x179a   :  { %7917 = vmatprep.subr.bf16.mxu1 %v7916_v15  ;;  %v7728_v15 = vpack.c.bf16 %v5350_v1, %v5338_v21  ;;  %v5380_v23 = vand.u32 4294901760, %v5379_v19  ;;  %v5386_v25 = vand.u32 4294901760, %v5385_v6  ;;  %v5403_v39 = vsub.f32 %v9745_v34, %v5402_v55  ;;  %v9750_v6 = vld [vmem:[#allocation50_spill] sm:$0xff]  ;;  %v9752_v21 = vld [vmem:[#allocation52_spill] sm:$0xff] }
0x179b   :  { %v5398_v29 = vand.u32 4294901760, %v5397_v52  ;;  %v7732_v42 = vpack.c.bf16 %v5374_v45, %v5362_v30  ;;  %v5409_v32 = vsub.f32 %v9746_v8, %v5408_v16  ;;  %v5421_v28 = vsub.f32 %v9747_v4, %v5420_v37  ;;  %v9754_v30 = vld [vmem:[#allocation55_spill] sm:$0xff] }
0x179c   :  { %7723 = vmatpush1.bf16.msra.mxu0 %v7722_v41  ;;  %7919 = vmatpush1.bf16.msra.mxu1 %v7918_v38  ;;  %v5391_v38 = vsub.f32 %v9744_v13, %v5390_v12  ;;  %v9749_v41 = vld [vmem:[#allocation48_spill] sm:$0xff]  ;;  %v5432_v52 = vand.u32 4294901760, %v9750_v6  ;;  %v5444_v36 = vand.u32 4294901760, %v9751_v58  ;;  %v7734_v24 = vpack.c.bf16 %v5380_v23, %v5368_v40 }
0x179d   :  { %7725 = vmatprep.subr.bf16.mxu0 %v7724_v54  ;;  %7921 = vmatprep.subr.bf16.mxu1 %v7920_v62  ;;  %v7928_v62 = vpack.c.bf16 %v5396_v18, %v5384_v60  ;;  %v5414_v54 = vand.u32 4294901760, %v9748_v53  ;;  %v5426_v33 = vand.u32 4294901760, %v9749_v41  ;;  %v7930_v48 = vpack.c.bf16 %v5402_v55, %v5390_v12 }
0x179e   :  { %v5438_v1 = vand.u32 4294901760, %v9752_v21  ;;  %v5450_v60 = vand.u32 4294901760, %v9753_v7  ;;  %v7736_v18 = vpack.c.bf16 %v5398_v29, %v5386_v25  ;;  %v7932_v20 = vpack.c.bf16 %v5420_v37, %v5408_v16  ;;  %v9757_v16 = vld [vmem:[#allocation58_spill] sm:$0xff] }
0x179f   :  { %v5392_v47 = vand.u32 4294901760, %v5391_v38  ;;  %v5404_v19 = vand.u32 4294901760, %v5403_v39  ;;  %v5456_v45 = vand.u32 4294901760, %v9754_v30  ;;  %v5410_v23 = vand.u32 4294901760, %v5409_v32 }
0x17a0   :  { %7727 = vmatpush1.bf16.msra.mxu0 %v7726_v3  ;;  %7923 = vmatpush1.bf16.msra.mxu1 %v7922_v11  ;;  %v5415_v3 = vsub.f32 %v9748_v53, %v5414_v54  ;;  %v5427_v11 = vsub.f32 %v9749_v41, %v5426_v33  ;;  %v5422_v55 = vand.u32 4294901760, %v5421_v28  ;;  %v5433_v40 = vsub.f32 %v9750_v6, %v5432_v52  ;;  %v9758_v41 = vld [vmem:[#allocation60_spill] sm:$0xff] }
0x17a1   :  { %7729 = vmatprep.subr.bf16.mxu0 %v7728_v15  ;;  %7925 = vmatprep.subr.bf16.mxu1 %v7924_v57  ;;  %v9755_v15 = vld [vmem:[#allocation56_spill] sm:$0xff]  ;;  %v5445_v25 = vsub.f32 %v9751_v58, %v5444_v36  ;;  %v5439_v29 = vsub.f32 %v9752_v21, %v5438_v1  ;;  %v5474_v37 = vand.u32 4294901760, %v9757_v16  ;;  %v7738_v38 = vpack.c.bf16 %v5404_v19, %v5392_v47 }
0x17a2   :  { %v5468_v57 = vand.u32 4294901760, %v9755_v15  ;;  %v7934_v39 = vpack.c.bf16 %v5426_v33, %v5414_v54  ;;  %v5480_v53 = vand.u32 4294901760, %v9758_v41  ;;  %v5416_v32 = vand.u32 4294901760, %v5415_v3  ;;  %v9761_v3 = vld [vmem:[#allocation64_spill] sm:$0xff] }
0x17a3   :  { %v5428_v28 = vand.u32 4294901760, %v5427_v11  ;;  %v5457_v58 = vsub.f32 %v9754_v30, %v5456_v45  ;;  %v7936_v6 = vpack.c.bf16 %v5444_v36, %v5432_v52  ;;  %v5434_v4 = vand.u32 4294901760, %v5433_v40  ;;  %v9762_v40 = vld [vmem:[#allocation65_spill] sm:$0xff] }
0x17a4   :  { %7731 = vmatpush1.bf16.msra.mxu0 %v7730_v0  ;;  %7927 = vmatpush1.bf16.msra.mxu1 %v7926_v17  ;;  %v5451_v17 = vsub.f32 %v9753_v7, %v5450_v60  ;;  %v9756_v0 = vld [vmem:[#allocation57_spill] sm:$0xff]  ;;  %v5469_v21 = vsub.f32 %v9755_v15, %v5468_v57  ;;  %v7740_v7 = vpack.c.bf16 %v5422_v55, %v5410_v23  ;;  %v5446_v8 = vand.u32 4294901760, %v5445_v25 }
0x17a5   :  { %7733 = vmatprep.subr.bf16.mxu0 %v7732_v42  ;;  %7929 = vmatprep.subr.bf16.mxu1 %v7928_v62  ;;  %v5462_v12 = vand.u32 4294901760, %v9756_v0  ;;  %v9759_v42 = vld [vmem:[#allocation61_spill] sm:$0xff]  ;;  %v5440_v47 = vand.u32 4294901760, %v5439_v29  ;;  %v5475_v19 = vsub.f32 %v9757_v16, %v5474_v37  ;;  %v5498_v11 = vand.u32 4294901760, %v9761_v3  ;;  %v9763_v29 = vld [vmem:[#allocation66_spill] sm:$0xff] }
0x17a6   :  { %v5492_v62 = vand.u32 4294901760, %v9759_v42  ;;  %v5452_v54 = vand.u32 4294901760, %v5451_v17  ;;  %v5481_v30 = vsub.f32 %v9758_v41, %v5480_v53  ;;  %v7938_v52 = vpack.c.bf16 %v5450_v60, %v5438_v1  ;;  %v9764_v60 = vld [vmem:[#allocation67_spill] sm:$0xff] }
0x17a7   :  { %v5463_v33 = vsub.f32 %v9756_v0, %v5462_v12  ;;  %v5458_v36 = vand.u32 4294901760, %v5457_v58  ;;  %v7744_v23 = vpack.c.bf16 %v5446_v8, %v5434_v4  ;;  %v7940_v55 = vpack.c.bf16 %v5468_v57, %v5456_v45 }
0x17a8   :  { %7735 = vmatpush1.bf16.msra.mxu0 %v7734_v24  ;;  %7931 = vmatpush1.bf16.msra.mxu1 %v7930_v48  ;;  %v9760_v24 = vld [vmem:[#allocation63_spill] sm:$0xff]  ;;  %v5493_v15 = vsub.f32 %v9759_v42, %v5492_v62  ;;  %v5504_v25 = vand.u32 4294901760, %v9762_v40  ;;  %v5516_v17 = vand.u32 4294901760, %v9763_v29  ;;  %v7746_v16 = vpack.c.bf16 %v5452_v54, %v5440_v47 }
0x17a9   :  { %7737 = vmatprep.subr.bf16.mxu0 %v7736_v18  ;;  %7933 = vmatprep.subr.bf16.mxu1 %v7932_v20  ;;  %v5486_v48 = vand.u32 4294901760, %v9760_v24  ;;  %v7742_v18 = vpack.c.bf16 %v5428_v28, %v5416_v32  ;;  %v5470_v20 = vand.u32 4294901760, %v5469_v21  ;;  %v7942_v0 = vpack.c.bf16 %v5474_v37, %v5462_v12 }
0x17aa   :  { %v5464_v34 = vand.u32 4294901760, %v5463_v33  ;;  %v5476_v41 = vand.u32 4294901760, %v5475_v19  ;;  %v5482_v13 = vand.u32 4294901760, %v5481_v30  ;;  %v5494_v42 = vand.u32 4294901760, %v5493_v15 }
0x17ab   :  { %v5499_v1 = vsub.f32 %v9761_v3, %v5498_v11  ;;  %v7748_v58 = vpack.c.bf16 %v5470_v20, %v5458_v36  ;;  %v5510_v8 = vand.u32 4294901760, %v9146_v10  ;;  %v5522_v4 = vand.u32 4294901760, %v9148_v35  ;;  %v9766_v20 = vld [vmem:[#allocation83_spill] sm:$0xff] }
0x17ac   :  { %7739 = vmatpush1.bf16.msra.mxu0 %v7738_v38  ;;  %7935 = vmatpush1.bf16.msra.mxu1 %v7934_v39  ;;  %v5487_v38 = vsub.f32 %v9760_v24, %v5486_v48  ;;  %v5505_v21 = vsub.f32 %v9762_v40, %v5504_v25  ;;  %v5528_v30 = vand.u32 4294901760, %v9764_v60  ;;  %v5540_v45 = vand.u32 4294901760, %v9158_v49 }
0x17ad   :  { %7741 = vmatprep.subr.bf16.mxu0 %v7740_v7  ;;  %7937 = vmatprep.subr.bf16.mxu1 %v7936_v6  ;;  %v7944_v6 = vpack.c.bf16 %v5492_v62, %v5480_v53  ;;  %v5517_v7 = vsub.f32 %v9763_v29, %v5516_v17  ;;  %v7750_v15 = vpack.c.bf16 %v5476_v41, %v5464_v34  ;;  %v5534_v12 = vand.u32 4294901760, %v9160_v56 }
0x17ae   :  { %v7946_v57 = vpack.c.bf16 %v5498_v11, %v5486_v48  ;;  %v5546_v53 = vand.u32 4294901760, %v9168_v46  ;;  %v7752_v37 = vpack.c.bf16 %v5494_v42, %v5482_v13  ;;  %v7948_v39 = vpack.c.bf16 %v5516_v17, %v5504_v25 }
0x17af   :  { %v5488_v62 = vand.u32 4294901760, %v5487_v38  ;;  %v5500_v32 = vand.u32 4294901760, %v5499_v1  ;;  %v5511_v28 = vsub.f32 %v9146_v10, %v5510_v8  ;;  %v5523_v47 = vsub.f32 %v9148_v35, %v5522_v4 }
0x17b0   :  { %7743 = vmatpush1.bf16.msra.mxu0 %v7742_v18  ;;  %7939 = vmatpush1.bf16.msra.mxu1 %v7938_v52  ;;  %v5552_v54 = vand.u32 4294901760, %v9170_v43  ;;  %v5564_v33 = vand.u32 4294901760, %v9172_v59  ;;  %v5506_v34 = vand.u32 4294901760, %v5505_v21  ;;  %v5518_v41 = vand.u32 4294901760, %v5517_v7  ;;  %v9765_v52 = vld [vmem:[#allocation82_spill] sm:$0xff] }
0x17b1   :  { %7745 = vmatprep.subr.bf16.mxu0 %v7744_v23  ;;  %7941 = vmatprep.subr.bf16.mxu1 %v7940_v55  ;;  %v5529_v19 = vsub.f32 %v9764_v60, %v5528_v30  ;;  %v5541_v13 = vsub.f32 %v9158_v49, %v5540_v45  ;;  %v5535_v42 = vsub.f32 %v9160_v56, %v5534_v12  ;;  %v5570_v48 = vand.u32 4294901760, %v9228_v26 }
0x17b2   :  { %v7754_v11 = vpack.c.bf16 %v5500_v32, %v5488_v62  ;;  %v7950_v18 = vpack.c.bf16 %v5522_v4, %v5510_v8  ;;  %v5576_v36 = vand.u32 4294901760, %v9765_v52  ;;  %v5588_v23 = vand.u32 4294901760, %v9766_v20 }
0x17b3   :  { %v5512_v55 = vand.u32 4294901760, %v5511_v28  ;;  %v5524_v25 = vand.u32 4294901760, %v5523_v47  ;;  %v5553_v17 = vsub.f32 %v9170_v43, %v5552_v54  ;;  %v5565_v38 = vsub.f32 %v9172_v59, %v5564_v33 }
0x17b4   :  { %7747 = vmatpush1.bf16.msra.mxu0 %v7746_v16  ;;  %7943 = vmatpush1.bf16.msra.mxu1 %v7942_v0  ;;  %v5547_v0 = vsub.f32 %v9168_v46, %v5546_v53  ;;  %v5558_v16 = vand.u32 4294901760, %v9226_v27  ;;  %v7756_v1 = vpack.c.bf16 %v5518_v41, %v5506_v34  ;;  %v5542_v21 = vand.u32 4294901760, %v5541_v13 }
0x17b5   :  { %7749 = vmatprep.subr.bf16.mxu0 %v7748_v58  ;;  %7945 = vmatprep.subr.bf16.mxu1 %v7944_v6  ;;  %v7952_v58 = vpack.c.bf16 %v5540_v45, %v5528_v30  ;;  %v5530_v6 = vand.u32 4294901760, %v5529_v19  ;;  %v5536_v7 = vand.u32 4294901760, %v5535_v42  ;;  %v5571_v62 = vsub.f32 %v9228_v26, %v5570_v48 }
0x17b6   :  { %v5548_v8 = vand.u32 4294901760, %v5547_v0  ;;  %v5559_v4 = vsub.f32 %v9226_v27, %v5558_v16  ;;  %v5577_v32 = vsub.f32 %v9765_v52, %v5576_v36  ;;  %v5589_v28 = vsub.f32 %v9766_v20, %v5588_v23 }
0x17b7   :  { %v7954_v30 = vpack.c.bf16 %v5546_v53, %v5534_v12  ;;  %v5554_v45 = vand.u32 4294901760, %v5553_v17  ;;  %v7760_v47 = vpack.c.bf16 %v5542_v21, %v5530_v6  ;;  %v7956_v34 = vpack.c.bf16 %v5564_v33, %v5552_v54 }
0x17b8   :  { %7751 = vmatpush1.bf16.msra.mxu0 %v7750_v15  ;;  %7947 = vmatpush1.bf16.msra.mxu1 %v7946_v57  ;;  %v5582_v15 = vand.u32 4294901760, %v9242_v50  ;;  %v5594_v57 = vand.u32 4294901760, %v9244_v51  ;;  %v5600_v41 = vand.u32 4294901760, %v9246_v63  ;;  %v5612_v19 = vand.u32 4294901760, %v9248_v9 }
0x17b9   :  { %7753 = vmatprep.subr.bf16.mxu0 %v7752_v37  ;;  %7949 = vmatprep.subr.bf16.mxu1 %v7948_v39  ;;  %v7758_v37 = vpack.c.bf16 %v5524_v25, %v5512_v55  ;;  %v5566_v39 = vand.u32 4294901760, %v5565_v38  ;;  %v7762_v13 = vpack.c.bf16 %v5548_v8, %v5536_v7  ;;  %v7958_v42 = vpack.c.bf16 %v5570_v48, %v5558_v16 }
0x17ba   :  { %v5560_v0 = vand.u32 4294901760, %v5559_v4  ;;  %v5572_v52 = vand.u32 4294901760, %v5571_v62  ;;  %v5578_v26 = vand.u32 4294901760, %v5577_v32  ;;  %v5590_v20 = vand.u32 4294901760, %v5589_v28 }
0x17bb   :  { %v5595_v12 = vsub.f32 %v9244_v51, %v5594_v57  ;;  %v7764_v53 = vpack.c.bf16 %v5566_v39, %v5554_v45  ;;  %v5606_v54 = vand.u32 4294901760, %v9261_v2  ;;  %v5618_v33 = vand.u32 4294901760, %v9263_v5 }
0x17bc   :  { %7755 = vmatpush1.bf16.msra.mxu0 %v7754_v11  ;;  %7951 = vmatpush1.bf16.msra.mxu1 %v7950_v18  ;;  %v5583_v11 = vsub.f32 %v9242_v50, %v5582_v15  ;;  %v7960_v18 = vpack.c.bf16 %v5588_v23, %v5576_v36  ;;  %v5601_v16 = vsub.f32 %v9246_v63, %v5600_v41  ;;  %v5624_v55 = vand.u32 4294901760, %v9265_v44 }
0x17bd   :  { %7757 = vmatprep.subr.bf16.mxu0 %v7756_v1  ;;  %7953 = vmatprep.subr.bf16.mxu1 %v7952_v58  ;;  %v5613_v48 = vsub.f32 %v9248_v9, %v5612_v19  ;;  %v5636_v25 = vand.u32 4294901760, %v9267_v14  ;;  %v7766_v17 = vpack.c.bf16 %v5572_v52, %v5560_v0  ;;  %v7962_v38 = vpack.c.bf16 %v5594_v57, %v5582_v15 }
0x17be   :  { %v7768_v1 = vpack.c.bf16 %v5590_v20, %v5578_v26  ;;  %v7964_v58 = vpack.c.bf16 %v5612_v19, %v5600_v41  ;;  %v5584_v6 = vand.u32 4294901760, %v5583_v11  ;;  %v5596_v36 = vand.u32 4294901760, %v5595_v12  ;;  %v9767_v11 = vld [vmem:[#allocation11_spill] sm:$0xff]  ;;  %v9768_v12 = vld [vmem:[#allocation12_spill] sm:$0xff] }
0x17bf   :  { %v5607_v23 = vsub.f32 %v9261_v2, %v5606_v54  ;;  %v5619_v21 = vsub.f32 %v9263_v5, %v5618_v33  ;;  %v5630_v7 = vand.u32 4294901760, %v9270_v22  ;;  %v5642_v8 = vand.u32 4294901760, %v9272_v31 }
0x17c0   :  { %7759 = vmatpush1.bf16.msra.mxu0 %v7758_v37  ;;  %7955 = vmatpush1.bf16.msra.mxu1 %v7954_v30  ;;  %v5602_v4 = vand.u32 4294901760, %v5601_v16  ;;  %v5614_v62 = vand.u32 4294901760, %v5613_v48  ;;  %v5625_v52 = vsub.f32 %v9265_v44, %v5624_v55  ;;  %v5637_v26 = vsub.f32 %v9267_v14, %v5636_v25  ;;  %v9772_v16 = vld [vmem:[#allocation15_spill] sm:$0xff] }
0x17c1   :  { %7761 = vmatprep.subr.bf16.mxu0 %v7760_v47  ;;  %7957 = vmatprep.subr.bf16.mxu1 %v7956_v34  ;;  %v7770_v20 = vpack.c.bf16 %v5596_v36, %v5584_v6  ;;  %v7966_v15 = vpack.c.bf16 %v5618_v33, %v5606_v54  ;;  %v5608_v57 = vand.u32 4294901760, %v5607_v23  ;;  %v5620_v32 = vand.u32 4294901760, %v5619_v21  ;;  %v9770_v54 = vld [vmem:[#allocation14_spill] sm:$0xff]  ;;  %v9771_v33 = vld [vmem:[#allocation13_spill] sm:$0xff]  ;;  %v9780_v23 = vld [vmem:[#allocation19_spill] sm:$0xff] }
0x17c2   :  { %v5631_v28 = vsub.f32 %v9270_v22, %v5630_v7  ;;  %v5643_v37 = vsub.f32 %v9272_v31, %v5642_v8  ;;  %v7772_v30 = vpack.c.bf16 %v5614_v62, %v5602_v4  ;;  %v7968_v45 = vpack.c.bf16 %v5636_v25, %v5624_v55  ;;  %v9773_v55 = vld [vmem:[#allocation88_spill] sm:$0xff]  ;;  %v9774_v25 = vld [vmem:[#allocation17_spill] sm:$0xff]  ;;  %v9781_v21 = vld [vmem:[#allocation23_spill] sm:$0xff] }
0x17c3   :  { %v5626_v39 = vand.u32 4294901760, %v5625_v52  ;;  %v5638_v47 = vand.u32 4294901760, %v5637_v26  ;;  %v7774_v34 = vpack.c.bf16 %v5620_v32, %v5608_v57  ;;  %v7970_v41 = vpack.c.bf16 %v5642_v8, %v5630_v7  ;;  %v9779_v6 = vld [vmem:[#allocation21_spill] sm:$0xff]  ;;  %v9782_v7 = vld [vmem:[#allocation24_spill] sm:$0xff]  ;;  %v9783_v4 = vld [vmem:[#allocation22_spill] sm:$0xff] }
0x17c4   :  { %7763 = vmatpush1.bf16.msra.mxu0 %v7762_v13  ;;  %7959 = vmatpush1.bf16.msra.mxu1 %v7958_v42  ;;  %v5632_v19 = vand.u32 4294901760, %v5631_v28  ;;  %v5644_v13 = vand.u32 4294901760, %v5643_v37  ;;  %v7782_v48 = vpack.c.bf16 %v9772_v16, %v9771_v33  ;;  %v7788_v8 = vpack.c.bf16 %v9782_v7, %v9781_v21  ;;  %v9784_v62 = vld [vmem:[#allocation26_spill] sm:$0xff]  ;;  %v9785_v52 = vld [vmem:[#allocation27_spill] sm:$0xff]  ;;  %v9788_v57 = vld [vmem:[#allocation29_spill] sm:$0xff] }
0x17c5   :  { %7765 = vmatprep.subr.bf16.mxu0 %v7764_v53  ;;  %7961 = vmatprep.subr.bf16.mxu1 %v7960_v18  ;;  %v7776_v42 = vpack.c.bf16 %v5638_v47, %v5626_v39  ;;  %v7780_v53 = vpack.c.bf16 %v9768_v12, %v8942_v61  ;;  %v9769_v18 = vld [vmem:[#allocation90_spill] sm:$0xff]  ;;  %v9777_v61 = vld [vmem:[#allocation89_spill] sm:$0xff]  ;;  %v7790_v26 = vpack.c.bf16 %v9785_v52, %v9784_v62  ;;  %v9790_v37 = vld [vmem:[#allocation31_spill] sm:$0xff] }
0x17c6   :  { %v7778_v0 = vpack.c.bf16 %v5644_v13, %v5632_v19  ;;  %v9789_v28 = vld [vmem:[#allocation30_spill] sm:$0xff]  ;;  %v9793_v47 = vld [vmem:[#allocation33_spill] sm:$0xff]  ;;  %v9795_v19 = vld [vmem:[#allocation39_spill] sm:$0xff] }
0x17c7   :  { %v9792_v39 = vld [vmem:[#allocation34_spill] sm:$0xff]  ;;  %v9796_v13 = vld [vmem:[#allocation36_spill] sm:$0xff]  ;;  %v9801_v33 = vld [vmem:[#allocation47_spill] sm:$0xff] }
0x17c8   :  { %7767 = vmatpush1.bf16.msra.mxu0 %v7766_v17  ;;  %7963 = vmatpush1.bf16.msra.mxu1 %v7962_v38  ;;  %v9775_v17 = vld [vmem:[#allocation18_spill] sm:$0xff]  ;;  %v9802_v16 = vld [vmem:[#allocation41_spill] sm:$0xff]  ;;  %v9812_v7 = vld [vmem:[#allocation51_spill] sm:$0xff] }
0x17c9   :  { %7769 = vmatprep.subr.bf16.mxu0 %v7768_v1  ;;  %7965 = vmatprep.subr.bf16.mxu1 %v7964_v58  ;;  %v7784_v38 = vpack.c.bf16 %v9775_v17, %v9774_v25  ;;  %v9776_v1 = vld [vmem:[#allocation16_spill] sm:$0xff]  ;;  %v9799_v12 = vld [vmem:[#allocation38_spill] sm:$0xff]  ;;  %v9804_v25 = vld [vmem:[#allocation49_spill] sm:$0xff] }
0x17ca   :  { %v9778_v58 = vld [vmem:[#allocation20_spill] sm:$0xff]  ;;  %v9805_v17 = vld [vmem:[#allocation43_spill] sm:$0xff]  ;;  %v9811_v21 = vld [vmem:[#allocation50_spill] sm:$0xff] }
0x17cb   :  { %v7786_v36 = vpack.c.bf16 %v9779_v6, %v9778_v58  ;;  %v9808_v58 = vld [vmem:[#allocation46_spill] sm:$0xff]  ;;  %v9809_v6 = vld [vmem:[#allocation48_spill] sm:$0xff] }
0x17cc   :  { %7771 = vmatpush1.bf16.msra.mxu0 %v7770_v20  ;;  %7967 = vmatpush1.bf16.msra.mxu1 %v7966_v15  ;;  %v9786_v20 = vld [vmem:[#allocation25_spill] sm:$0xff]  ;;  %v9787_v15 = vld [vmem:[#allocation28_spill] sm:$0xff]  ;;  %v9815_v52 = vld [vmem:[#allocation54_spill] sm:$0xff] }
0x17cd   :  { %7773 = vmatprep.subr.bf16.mxu0 %v7772_v30  ;;  %7969 = vmatprep.subr.bf16.mxu1 %v7968_v45  ;;  %v7792_v32 = vpack.c.bf16 %v9788_v57, %v9787_v15  ;;  %v9791_v30 = vld [vmem:[#allocation32_spill] sm:$0xff]  ;;  %v9817_v15 = vld [vmem:[#allocation55_spill] sm:$0xff] }
0x17ce   :  { %v7794_v45 = vpack.c.bf16 %v9791_v30, %v9790_v37  ;;  %v9814_v62 = vld [vmem:[#allocation52_spill] sm:$0xff]  ;;  %v9820_v37 = vld [vmem:[#allocation57_spill] sm:$0xff]  ;;  %v9821_v30 = vld [vmem:[#allocation58_spill] sm:$0xff] }
0x17cf   :  { %v9818_v57 = vld [vmem:[#allocation56_spill] sm:$0xff] }
0x17d0   :  { %7775 = vmatpush1.bf16.msra.mxu0 %v7774_v34  ;;  %7971 = vmatpush1.bf16.msra.mxu1 %v7970_v41  ;;  %v9794_v34 = vld [vmem:[#allocation35_spill] sm:$0xff] }
0x17d1   :  { %7777 = vmatprep.subr.bf16.mxu0 %v7776_v42  ;;  %7973 = vmatprep.subr.bf16.mxu1 %v9767_v11  ;;  %v7796_v41 = vpack.c.bf16 %v9794_v34, %v9793_v47  ;;  %v9797_v42 = vld [vmem:[#allocation37_spill] sm:$0xff]  ;;  %v9798_v11 = vld [vmem:[#allocation44_spill] sm:$0xff] }
0x17d2   :  { %v9823_v47 = vld [vmem:[#allocation60_spill] sm:$0xff]  ;;  %v9824_v34 = vld [vmem:[#allocation61_spill] sm:$0xff] }
0x17d3   :  { %6258 = vmatmul.mubr.f32.vlgmr.msra.gmra.mrb[10].mxu1 %v9769_v18 }
0x17d4   :  { %7779 = vmatpush1.bf16.msra.mxu0 %v7778_v0  ;;  %7975 = vmatpush1.bf16.msra.mxu1 %v9770_v54  ;;  %v7798_v0 = vpack.c.bf16 %v9797_v42, %v9796_v13  ;;  %v7818_v13 = vpack.c.bf16 %v9761_v3, %v9760_v24  ;;  %v9826_v42 = vld [vmem:[#allocation72_spill] sm:$0xff]  ;;  %v7826_v24 = vpack.c.bf16 %v9168_v46, %v9160_v56 }
0x17d5   :  { %6393 = vmatprep.mubr.f32.mxu1 %v9773_v55  ;;  %7781 = vmatprep.subr.bf16.mxu0 %v7780_v53  ;;  %v9800_v53 = vld [vmem:[#allocation40_spill] sm:$0xff]  ;;  %v7834_v46 = vpack.c.bf16 %v9244_v51, %v9242_v50  ;;  %v7842_v50 = vpack.c.bf16 %v9272_v31, %v9270_v22  ;;  %v9841_v51 = vld [vmem:[#allocation87_spill] sm:$0xff] }
0x17d6   :  { %7977 = vmatprep.subr.bf16.mxu1 %v9776_v1  ;;  %v7800_v54 = vpack.c.bf16 %v9800_v53, %v9799_v12  ;;  %v7822_v12 = vpack.c.bf16 %v9148_v35, %v9146_v10  ;;  %v9828_v53 = vld [vmem:[#allocation74_spill] sm:$0xff]  ;;  %v9830_v3 = vld [vmem:[#allocation76_spill] sm:$0xff]  ;;  %v9832_v35 = vld [vmem:[#allocation81_spill] sm:$0xff] }
0x17d7   :  { %5649 = vmatmul.mubr.f32.vlgmr.msra.gmra.mrb[10].mxu0 %v9769_v18  ;;  %v7830_v10 = vpack.c.bf16 %v9832_v35, %v9226_v27  ;;  %v9837_v56 = vld [vmem:[#allocation80_spill] sm:$0xff]  ;;  %v7838_v27 = vpack.c.bf16 %v9263_v5, %v9261_v2 }
0x17d8   :  { %7783 = vmatpush1.bf16.msra.mxu0 %v7782_v48  ;;  %5849 = vmatprep.mubr.f32.mxu0 %v9777_v61  ;;  %v9803_v48 = vld [vmem:[#allocation42_spill] sm:$0xff]  ;;  %v9807_v61 = vld [vmem:[#allocation53_spill] sm:$0xff] }
0x17d9   :  { %7979 = vmatpush1.bf16.msra.mxu1 %v9780_v23  ;;  %7785 = vmatprep.subr.bf16.mxu0 %v7784_v38  ;;  %v7802_v55 = vpack.c.bf16 %v9803_v48, %v9802_v16  ;;  %v9806_v38 = vld [vmem:[#allocation45_spill] sm:$0xff]  ;;  %v9810_v23 = vld [vmem:[#allocation59_spill] sm:$0xff]  ;;  %v9833_v16 = vld [vmem:[#allocation78_spill] sm:$0xff] }
0x17da   :  { %7981 = vmatprep.subr.bf16.mxu1 %v9783_v4  ;;  %v7804_v1 = vpack.c.bf16 %v9806_v38, %v9805_v17  ;;  %v9813_v4 = vld [vmem:[#allocation62_spill] sm:$0xff]  ;;  %v7840_v17 = vpack.c.bf16 %v9267_v14, %v9265_v44 }
0x17db   :  { %v9840_v38 = vld [vmem:[#allocation86_spill] sm:$0xff] }
0x17dc   :  { %7787 = vmatpush1.bf16.msra.mxu0 %v7786_v36  ;;  %v7806_v36 = vpack.c.bf16 %v9809_v6, %v9808_v58 }
0x17dd   :  { %7983 = vmatpush1.bf16.msra.mxu1 %v9786_v20  ;;  %7789 = vmatprep.subr.bf16.mxu0 %v7788_v8  ;;  %v7808_v8 = vpack.c.bf16 %v9812_v7, %v9811_v21  ;;  %v9816_v20 = vld [vmem:[#allocation68_spill] sm:$0xff] }
0x17de   :  { %7985 = vmatprep.subr.bf16.mxu1 %v9789_v28  ;;  %v9819_v28 = vld [vmem:[#allocation69_spill] sm:$0xff] }
0x17e0   :  { %7791 = vmatpush1.bf16.msra.mxu0 %v7790_v26  ;;  %v7810_v26 = vpack.c.bf16 %v9815_v52, %v9814_v62 }
0x17e1   :  { %7987 = vmatpush1.bf16.msra.mxu1 %v9792_v39  ;;  %7793 = vmatprep.subr.bf16.mxu0 %v7792_v32  ;;  %v7812_v32 = vpack.c.bf16 %v9818_v57, %v9817_v15  ;;  %v9822_v39 = vld [vmem:[#allocation70_spill] sm:$0xff] }
0x17e2   :  { %7989 = vmatprep.subr.bf16.mxu1 %v9795_v19  ;;  %v9825_v19 = vld [vmem:[#allocation71_spill] sm:$0xff] }
0x17e4   :  { %7795 = vmatpush1.bf16.msra.mxu0 %v7794_v45  ;;  %v7814_v45 = vpack.c.bf16 %v9821_v30, %v9820_v37 }
0x17e5   :  { %7991 = vmatpush1.bf16.msra.mxu1 %v9798_v11  ;;  %7797 = vmatprep.subr.bf16.mxu0 %v7796_v41  ;;  %v7816_v41 = vpack.c.bf16 %v9824_v34, %v9823_v47  ;;  %v9827_v11 = vld [vmem:[#allocation73_spill] sm:$0xff] }
0x17e6   :  { %7993 = vmatprep.subr.bf16.mxu1 %v9801_v33  ;;  %v9829_v33 = vld [vmem:[#allocation75_spill] sm:$0xff] }
0x17e8   :  { %7799 = vmatpush1.bf16.msra.mxu0 %v7798_v0  ;;  %v7820_v0 = vpack.c.bf16 %v9763_v29, %v9762_v40  ;;  %v7828_v40 = vpack.c.bf16 %v9172_v59, %v9170_v43  ;;  %v9831_v29 = vld [vmem:[#allocation77_spill] sm:$0xff]  ;;  %v7836_v43 = vpack.c.bf16 %v9248_v9, %v9246_v63  ;;  %v9838_v59 = vld [vmem:[#allocation84_spill] sm:$0xff]  ;;  %v9842_v9 = vld [vmem:[#allocation91_spill] sm:$0xff]  ;;  %v5107_v63 = vlaneseq }
0x17e9   :  { %7995 = vmatpush1.bf16.msra.mxu1 %v9804_v25  ;;  %7801 = vmatprep.subr.bf16.mxu0 %v7800_v54  ;;  %v7824_v54 = vpack.c.bf16 %v9158_v49, %v9764_v60  ;;  %v9834_v49 = vld [vmem:[#allocation82_spill] sm:$0xff]  ;;  %v9835_v60 = vld [vmem:[#allocation83_spill] sm:$0xff]  ;;  %v9839_v25 = vld [vmem:[#allocation85_spill] sm:$0xff] }
0x17ea   :  { %7997 = vmatprep.subr.bf16.mxu1 %v9807_v61  ;;  %v7832_v48 = vpack.c.bf16 %v9835_v60, %v9834_v49  ;;  %v5108_v2 = vshrl.u32 %v5107_v63, 7 }
0x17ec   :  { %7803 = vmatpush1.bf16.msra.mxu0 %v7802_v55  ;;  %v9836_v55 = vld [vmem:[#allocation79_spill] sm:$0xff]  ;;  %v5109_v5 = vsub.s32 0, %v5108_v2  ;;  %v5113_v61 = vsub.s32 1, %v5108_v2 }
0x17ed   :  { %7999 = vmatpush1.bf16.msra.mxu1 %v9810_v23  ;;  %7805 = vmatprep.subr.bf16.mxu0 %v7804_v1  ;;  %v50_v1 = vld [vmem:[#allocation5 + $0x50] ss:$8 sm:$0x3] }
0x17ee   :  { %8001 = vmatprep.subr.bf16.mxu1 %v9813_v4  ;;  %v5110_v14 = vrot.slane %v50_v1, %v5109_v5  ;;  %v5114_v6 = vrot.slane %v50_v1, %v5113_v61 }
0x17f0   :  { %7807 = vmatpush1.bf16.msra.mxu0 %v7806_v36 }
0x17f1   :  { %8003 = vmatpush1.bf16.msra.mxu1 %v9816_v20  ;;  %7809 = vmatprep.subr.bf16.mxu0 %v7808_v8 }
0x17f2   :  { %8005 = vmatprep.subr.bf16.mxu1 %v9819_v28 }
0x17f4   :  { %7811 = vmatpush1.bf16.msra.mxu0 %v7810_v26 }
0x17f5   :  { %8007 = vmatpush1.bf16.msra.mxu1 %v9822_v39  ;;  %7813 = vmatprep.subr.bf16.mxu0 %v7812_v32 }
0x17f6   :  { %8009 = vmatprep.subr.bf16.mxu1 %v9825_v19 }
0x17f8   :  { %7815 = vmatpush1.bf16.msra.mxu0 %v7814_v45 }
0x17f9   :  { %8011 = vmatpush1.bf16.msra.mxu1 %v9826_v42  ;;  %7817 = vmatprep.subr.bf16.mxu0 %v7816_v41 }
0x17fa   :  { %8013 = vmatprep.subr.bf16.mxu1 %v9827_v11 }
0x17fc   :  { %7819 = vmatpush1.bf16.msra.mxu0 %v7818_v13 }
0x17fd   :  { %8015 = vmatpush1.bf16.msra.mxu1 %v9828_v53  ;;  %7821 = vmatprep.subr.bf16.mxu0 %v7820_v0 }
0x17fe   :  { %8017 = vmatprep.subr.bf16.mxu1 %v9829_v33 }
0x1800   :  { %7823 = vmatpush1.bf16.msra.mxu0 %v7822_v12 }
0x1801   :  { %8019 = vmatpush1.bf16.msra.mxu1 %v9830_v3  ;;  %7825 = vmatprep.subr.bf16.mxu0 %v7824_v54 }
0x1802   :  { %8021 = vmatprep.subr.bf16.mxu1 %v9831_v29 }
0x1804   :  { %7827 = vmatpush1.bf16.msra.mxu0 %v7826_v24 }
0x1805   :  { %8023 = vmatpush1.bf16.msra.mxu1 %v9833_v16  ;;  %7829 = vmatprep.subr.bf16.mxu0 %v7828_v40 }
0x1806   :  { %8025 = vmatprep.subr.bf16.mxu1 %v9836_v55 }
0x1808   :  { %7831 = vmatpush1.bf16.msra.mxu0 %v7830_v10 }
0x1809   :  { %8027 = vmatpush1.bf16.msra.mxu1 %v9837_v56  ;;  %7833 = vmatprep.subr.bf16.mxu0 %v7832_v48 }
0x180a   :  { %8029 = vmatprep.subr.bf16.mxu1 %v9838_v59 }
0x180c   :  { %7835 = vmatpush1.bf16.msra.mxu0 %v7834_v46 }
0x180d   :  { %8031 = vmatpush1.bf16.msra.mxu1 %v9839_v25  ;;  %7837 = vmatprep.subr.bf16.mxu0 %v7836_v43 }
0x180e   :  { %8033 = vmatprep.subr.bf16.mxu1 %v9840_v38 }
0x1810   :  { %7839 = vmatpush1.bf16.msra.mxu0 %v7838_v27 }
0x1811   :  { %8035 = vmatpush1.bf16.msra.mxu1 %v9841_v51  ;;  %7841 = vmatprep.subr.bf16.mxu0 %v7840_v17 }
0x1814   :  { %6395 = vmatmul.mubr.f32.vlgmr.msra.gmra.mrb[10].mxu1 %v9769_v18  ;;  %7843 = vmatpush1.bf16.msra.mxu0 %v7842_v50 }
0x1817   :  { %5852 = vmatmul.mubr.f32.vlgmr.msra.gmra.mrb[10].mxu0 %v9842_v9 }
0x18e7   :  { %v6396_v44 = vpop.f32.mrb[10].mxu1 }
0x18e8   :  { %v6398_v58 = vpop.f32.mrb[11].mxu1 }
0x18ea   :  { %v5853_v36 = vpop.f32.mrb[10].mxu0 }
0x18eb   :  { %v8040_v23 = vadd.f32 %v5853_v36, %v5110_v14  ;;  %v5855_v31 = vpop.f32.mrb[11].mxu0 }
0x18ec   :  { %v8042_v22 = vadd.f32 %v5855_v31, %v5114_v6 }
0x18ed   :  { %v8041_v21 = vadd.f32 %v8040_v23, %v6396_v44 }
0x18ee   :  { %v8043_v18 = vadd.f32 %v8042_v22, %v6398_v58 }
0x18f0   :  { %v6403_v7 = vcombine.low %v8041_v21, %v8043_v18 }
0x18f2   :  { %6445 = vst.sshfl [vmem:[#allocation7] sm:$0x33 pattern:$0x76325410] %v6403_v7 }
0x18f3   :  { %8336 = shalt.err (!%p8333_p6)
}
0x18f4   :  { %s8337_s15 = scalar_lea.hbm %s9550_s2, 64 }
0x18f5   :  { %p8338_p7 = scmp.ne.s32.totalorder %s9550_s2, %s8337_s15  ;;  %p8341_p8 = scmp.lt.u32.totalorder %s8337_s15, %s9550_s2 }
0x18f7   :  { %p8343_p9 = pnand %p8341_p8, %p8338_p7 }
0x18f9   :  { %8346 = shalt.err (!%p8343_p9)
}
0x18fa   :  { %6422 = dma.vmem_to_hbm [thread:$0]  %s6420_s11, 64, %s9550_s2, [#allocation4]  }
0x18fb   :  { %8351 = dma.done.wait [#allocation4], 64  }
0x18fc   :  { %8352 = vsyncadd [#allocation4], 4294967232 }
0x18fd   :  { %6426 = vsyncpa [#allocation3], 1 }
0x18fe   :  { %6427 = vsyncpa [#allocation6], 1 }
0x18ff   :  { %6428 = vsyncpa [#allocation4], 1 }

</bundles_post_ra>
